<compile_context>
chip_gen: v6e
topology: v6e:2x2x1
jax: 0.10.0
libtpu: 0.0.40
codegen_flags: <defaults>
</compile_context>

<pallas_src>
import jax
import jax.numpy as jnp
from jax.experimental import pallas as pl
from jax.experimental.pallas import tpu as pltpu

D_MODEL = 32
NHEAD = 4
DH = D_MODEL // NHEAD
DIM_FF = 64              # packing below assumes DIM_FF == 2 * D_MODEL
NUM_LAYERS = 2
EPS = 1e-5

# --- static indices into the packed parameter arrays ------------------------
# w64 / b64  : (NL, 2, 32, 64) / (NL, 2, 1, 64)
W_SQK, W_FF1 = 0, 1
# w32        : (NL, 6, 32, 32)
W_SV, W_SO, W_CQ, W_CK, W_CV, W_CO = range(6)
# vec32      : (NL, 13, 1, 32)
(V_SBV, V_SBO, V_CBQ, V_CBK, V_CBV, V_CBO, V_FB2,
 V_N1G, V_N1B, V_N2G, V_N2B, V_N3G, V_N3B) = range(13)


# ---------------------------------------------------------------------------
# Fused decoder kernel (whole batch, whole decoder, one invocation)
# ---------------------------------------------------------------------------

def _make_kernel(batch, seq_q, seq_k):
    scale = 1.0 / (DH ** 0.5)
    f32 = jnp.float32

    def layer_norm(y, g, b):
        mu = jnp.mean(y, axis=-1, keepdims=True)
        var = jnp.mean((y - mu) ** 2, axis=-1, keepdims=True)
        return (y - mu) * jax.lax.rsqrt(var + EPS) * g + b

    def attention(q, k, v, lq, lk):
        # q: (B*lq, D); k, v: (B*lk, D).  Projections are already fused; only
        # the tiny per-(batch, head) score / PV dots stay in a static loop.
        rows = []
        for b in range(batch):
            qb = q[b * lq:(b + 1) * lq]
            kb = k[b * lk:(b + 1) * lk]
            vb = v[b * lk:(b + 1) * lk]
            heads = []
            for h in range(NHEAD):
                qh = qb[:, h * DH:(h + 1) * DH]
                kh = kb[:, h * DH:(h + 1) * DH]
                vh = vb[:, h * DH:(h + 1) * DH]
                s = jax.lax.dot_general(qh, kh, (((1,), (1,)), ((), ())),
                                        preferred_element_type=f32) * scale
                s = s - jnp.max(s, axis=-1, keepdims=True)
                p = jnp.exp(s)
                p = p / jnp.sum(p, axis=-1, keepdims=True)   # exact softmax
                heads.append(jnp.dot(p, vh, preferred_element_type=f32))
            rows.append(jnp.concatenate(heads, axis=-1))      # (lq, D)
        return jnp.concatenate(rows, axis=0)                  # (B*lq, D)

    def kernel(actq_ref, actkv_ref, w64_ref, w32_ref, wff2_ref,
               b64_ref, vec_ref, fnorm_ref, out_ref):
        x = actq_ref[0].astype(f32)             # (B*SQ, D)   target
        qp = actq_ref[1].astype(f32)            # (B*SQ, D)   query_pos
        mem = actkv_ref[0].astype(f32)          # (B*SK, D)   memory
        kp = mem + actkv_ref[1].astype(f32)     # memory + pos (in-kernel add)

        # Cross-attn K/V depend only on memory/pos: hoist out of the serial
        # per-layer chain (one K dot + one V dot per layer, done up front).
        k_cross, v_cross = [], []
        for l in range(NUM_LAYERS):
            k_cross.append(jnp.dot(kp, w32_ref[l, W_CK],
                                   preferred_element_type=f32)
                           + vec_ref[l, V_CBK])
            v_cross.append(jnp.dot(mem, w32_ref[l, W_CV],
                                   preferred_element_type=f32)
                           + vec_ref[l, V_CBV])

        for l in range(NUM_LAYERS):
            # ---- self attention: fused [Wq|Wk] projection + V projection ----
            qk_in = x + qp
            qk = jnp.dot(qk_in, w64_ref[l, W_SQK],
                         preferred_element_type=f32) + b64_ref[l, W_SQK]
            v = jnp.dot(x, w32_ref[l, W_SV],
                        preferred_element_type=f32) + vec_ref[l, V_SBV]
            sa = attention(qk[:, :D_MODEL], qk[:, D_MODEL:], v, seq_q, seq_q)
            sa = jnp.dot(sa, w32_ref[l, W_SO],
                         preferred_element_type=f32) + vec_ref[l, V_SBO]
            x = layer_norm(x + sa, vec_ref[l, V_N1G], vec_ref[l, V_N1B])

            # ---- cross attention (K/V precomputed above) ----
            qc = jnp.dot(x + qp, w32_ref[l, W_CQ],
                         preferred_element_type=f32) + vec_ref[l, V_CBQ]
            ca = attention(qc, k_cross[l], v_cross[l], seq_q, seq_k)
            ca = jnp.dot(ca, w32_ref[l, W_CO],
                         preferred_element_type=f32) + vec_ref[l, V_CBO]
            x = layer_norm(x + ca, vec_ref[l, V_N2G], vec_ref[l, V_N2B])

            # ---- FFN (relu) ----
            h1 = jnp.dot(x, w64_ref[l, W_FF1],
                         preferred_element_type=f32) + b64_ref[l, W_FF1]
            h1 = jnp.maximum(h1, 0.0)
            ff = jnp.dot(h1, wff2_ref[l],
                         preferred_element_type=f32) + vec_ref[l, V_FB2]
            x = layer_norm(x + ff, vec_ref[l, V_N3G], vec_ref[l, V_N3B])

        # final decoder norm
        x = layer_norm(x, fnorm_ref[0], fnorm_ref[1])
        out_ref[...] = x.astype(out_ref.dtype)

    return kernel


# ---------------------------------------------------------------------------
# Parameter packing: 16+ weight tensors -> 6 layer-stacked, leading-dim
# indexed arrays (constant-folded under jit).
# ---------------------------------------------------------------------------

def _pack_params(params):
    assert DIM_FF == 2 * D_MODEL, "packing assumes dim_ff == 2 * d_model"
    layers = params['layers']

    def stack(fn):
        return jnp.stack([fn(lp) for lp in layers], axis=0)

    w64 = stack(lambda lp: jnp.stack([
        jnp.concatenate([lp['self_attn']['wq'], lp['self_attn']['wk']], axis=1),
        lp['w1']], axis=0))                                     # (NL, 2, 32, 64)
    b64 = stack(lambda lp: jnp.stack([
        jnp.concatenate([lp['self_attn']['bq'], lp['self_attn']['bk']], axis=1),
        lp['b1']], axis=0))                                     # (NL, 2, 1, 64)
    w32 = stack(lambda lp: jnp.stack([
        lp['self_attn']['wv'], lp['self_attn']['wo'],
        lp['cross_attn']['wq'], lp['cross_attn']['wk'],
        lp['cross_attn']['wv'], lp['cross_attn']['wo']], axis=0))  # (NL,6,32,32)
    wff2 = stack(lambda lp: lp['w2'])                           # (NL, 64, 32)
    vec32 = stack(lambda lp: jnp.stack([
        lp['self_attn']['bv'], lp['self_attn']['bo'],
        lp['cross_attn']['bq'], lp['cross_attn']['bk'],
        lp['cross_attn']['bv'], lp['cross_attn']['bo'],
        lp['b2'],
        lp['norm1_g'], lp['norm1_b'],
        lp['norm2_g'], lp['norm2_b'],
        lp['norm3_g'], lp['norm3_b']], axis=0))                 # (NL, 13, 1, 32)
    fnorm = jnp.stack([params['norm_g'], params['norm_b']], axis=0)  # (2, 1, 32)
    return w64, w32, wff2, b64, vec32, fnorm


# ---------------------------------------------------------------------------
# Forward wrapper
# ---------------------------------------------------------------------------

def transformer_decoder_forward(params, tgt, memory, pos=None, query_pos=None):
    SQ, B, D = tgt.shape
    SK = memory.shape[0]
    assert D == D_MODEL

    def to_rows(x, s):
        # (S, B, D) -> (B*S, D): batch folded into the sublane/M dimension.
        return jnp.transpose(x, (1, 0, 2)).reshape(B * s, D)

    tgt_r = to_rows(tgt, SQ)
    qp_r = to_rows(query_pos, SQ) if query_pos is not None else jnp.zeros_like(tgt_r)
    mem_r = to_rows(memory, SK)
    pos_r = to_rows(pos, SK) if pos is not None else jnp.zeros_like(mem_r)

    act_q = jnp.stack([tgt_r, qp_r], axis=0)      # (2, B*SQ, D)
    act_kv = jnp.stack([mem_r, pos_r], axis=0)    # (2, B*SK, D)

    packed = _pack_params(params)
    kernel = _make_kernel(B, SQ, SK)

    vmem = pl.BlockSpec(memory_space=pltpu.MemorySpace.VMEM)
    out = pl.pallas_call(
        kernel,
        out_shape=jax.ShapeDtypeStruct((B * SQ, D), jnp.float32),
        in_specs=[vmem] * (2 + len(packed)),   # whole arrays resident in VMEM
        out_specs=vmem,
    )(act_q, act_kv, *packed)

    # (B*SQ, D) -> (SQ, B, D), then unsqueeze(0) like the torch reference.
    out = out.reshape(B, SQ, D).transpose(1, 0, 2)
    return out[None]


# ---------------------------------------------------------------------------
# Pure-JAX reference (same math, batched) for a correctness check
# ---------------------------------------------------------------------------

def _reference_forward(params, tgt, memory, pos, query_pos):
    def ln(y, g, b):
        mu = y.mean(-1, keepdims=True)
        var = ((y - mu) ** 2).mean(-1, keepdims=True)
        return (y - mu) * jax.lax.rsqrt(var + EPS) * g + b

    def mha(ap, q_in, k_in, v_in):
        q = q_in @ ap['wq'] + ap['bq']
        k = k_in @ ap['wk'] + ap['bk']
        v = v_in @ ap['wv'] + ap['bv']

        def heads(x):
            L, B, _ = x.shape
            return x.reshape(L, B, NHEAD, DH).transpose(1, 2, 0, 3)  # (B,H,L,dh)

        qh, kh, vh = heads(q), heads(k), heads(v)
        s = jnp.einsum('bhqd,bhkd->bhqk', qh, kh) / jnp.sqrt(DH).astype(jnp.float32)
        p = jax.nn.softmax(s, axis=-1)
        o = jnp.einsum('bhqk,bhkd->bhqd', p, vh)
        o = o.transpose(2, 0, 1, 3).reshape(o.shape[2], o.shape[0], D_MODEL)
        return o @ ap['wo'] + ap['bo']

    x = tgt
    for lp in params['layers']:
        qk = x + query_pos
        x = ln(x + mha(lp['self_attn'], qk, qk, x), lp['norm1_g'], lp['norm1_b'])
        x = ln(x + mha(lp['cross_attn'], x + query_pos, memory + pos, memory),
               lp['norm2_g'], lp['norm2_b'])
        h = jnp.maximum(x @ lp['w1'] + lp['b1'], 0.0)
        x = ln(x + h @ lp['w2'] + lp['b2'], lp['norm3_g'], lp['norm3_b'])
    x = ln(x, params['norm_g'], params['norm_b'])
    return x[None]


# ---------------------------------------------------------------------------
# Deterministic parameter initialization
# ---------------------------------------------------------------------------

def init_params(key, num_layers=NUM_LAYERS, d_model=D_MODEL, dim_ff=DIM_FF):
    keys = iter(jax.random.split(key, 16 * num_layers + 8))

    def mat(shape, scale=0.05):
        return scale * jax.random.normal(next(keys), shape, dtype=jnp.float32)

    def mha_params():
        return dict(
            wq=mat((d_model, d_model)), bq=jnp.zeros((1, d_model), jnp.float32),
            wk=mat((d_model, d_model)), bk=jnp.zeros((1, d_model), jnp.float32),
            wv=mat((d_model, d_model)), bv=jnp.zeros((1, d_model), jnp.float32),
            wo=mat((d_model, d_model)), bo=jnp.zeros((1, d_model), jnp.float32),
        )

    layers = []
    for _ in range(num_layers):
        layers.append(dict(
            self_attn=mha_params(),
            cross_attn=mha_params(),
            w1=mat((d_model, dim_ff)), b1=jnp.zeros((1, dim_ff), jnp.float32),
            w2=mat((dim_ff, d_model)), b2=jnp.zeros((1, d_model), jnp.float32),
            norm1_g=jnp.ones((1, d_model), jnp.float32),
            norm1_b=jnp.zeros((1, d_model), jnp.float32),
            norm2_g=jnp.ones((1, d_model), jnp.float32),
            norm2_b=jnp.zeros((1, d_model), jnp.float32),
            norm3_g=jnp.ones((1, d_model), jnp.float32),
            norm3_b=jnp.zeros((1, d_model), jnp.float32),
        ))
    return dict(
        layers=layers,
        norm_g=jnp.ones((1, d_model), jnp.float32),
        norm_b=jnp.zeros((1, d_model), jnp.float32),
    )


# ---------------------------------------------------------------------------
# Main
# ---------------------------------------------------------------------------

if __name__ == "__main__":
    key = jax.random.PRNGKey(0)
    k_p, k_t, k_m, k_qp, k_pos = jax.random.split(key, 5)

    params = init_params(k_p)

    SQ, SK, B = 8, 16, 2   # num queries, memory length, batch
    tgt = jax.random.normal(k_t, (SQ, B, D_MODEL), dtype=jnp.float32)
    memory = jax.random.normal(k_m, (SK, B, D_MODEL), dtype=jnp.float32)
    query_pos = jax.random.normal(k_qp, (SQ, B, D_MODEL), dtype=jnp.float32)
    pos = jax.random.normal(k_pos, (SK, B, D_MODEL), dtype=jnp.float32)

    fwd = jax.jit(lambda t, m, p, qp: transformer_decoder_forward(params, t, m, p, qp))
    out = jax.block_until_ready(fwd(tgt, memory, pos, query_pos))

    assert out.shape == (1, SQ, B, D_MODEL), out.shape
    assert jnp.all(jnp.isfinite(out))

    ref = _reference_forward(params, tgt, memory, pos, query_pos)
    max_err = float(jnp.max(jnp.abs(out - ref)))
    assert jnp.allclose(out, ref, atol=1e-4, rtol=1e-4), max_err

    print("KERNEL_OK")
</pallas_src>

<mosaic_0001>
module attributes {stable_mosaic.version = 11 : i64} {
  func.func @kernel(%arg0: memref<2x16x32xf32, #tpu.memory_space<vmem>>, %arg1: memref<2x32x32xf32, #tpu.memory_space<vmem>>, %arg2: memref<2x2x32x64xf32, #tpu.memory_space<vmem>>, %arg3: memref<2x6x32x32xf32, #tpu.memory_space<vmem>>, %arg4: memref<2x64x32xf32, #tpu.memory_space<vmem>>, %arg5: memref<2x2x1x64xf32, #tpu.memory_space<vmem>>, %arg6: memref<2x13x1x32xf32, #tpu.memory_space<vmem>>, %arg7: memref<2x1x32xf32, #tpu.memory_space<vmem>>, %arg8: memref<16x32xf32, #tpu.memory_space<vmem>>) attributes {dimension_semantics = [], scalar_prefetch = 0 : i64, scratch_operands = 0 : i64, tpu.core_type = #tpu.core_type<tc>} {
    %c0 = arith.constant 0 : index
    %c0_0 = arith.constant 0 : index
    %c0_1 = arith.constant 0 : index
    %0 = vector.load %arg0[%c0, %c0_0, %c0_1] : memref<2x16x32xf32, #tpu.memory_space<vmem>>, vector<1x16x32xf32>
    %1 = vector.shape_cast %0 : vector<1x16x32xf32> to vector<16x32xf32>
    %c1 = arith.constant 1 : index
    %c0_2 = arith.constant 0 : index
    %c0_3 = arith.constant 0 : index
    %2 = vector.load %arg0[%c1, %c0_2, %c0_3] : memref<2x16x32xf32, #tpu.memory_space<vmem>>, vector<1x16x32xf32>
    %3 = vector.shape_cast %2 : vector<1x16x32xf32> to vector<16x32xf32>
    %c0_4 = arith.constant 0 : index
    %c0_5 = arith.constant 0 : index
    %c0_6 = arith.constant 0 : index
    %4 = vector.load %arg1[%c0_4, %c0_5, %c0_6] : memref<2x32x32xf32, #tpu.memory_space<vmem>>, vector<1x32x32xf32>
    %5 = vector.shape_cast %4 : vector<1x32x32xf32> to vector<32x32xf32>
    %c1_7 = arith.constant 1 : index
    %c0_8 = arith.constant 0 : index
    %c0_9 = arith.constant 0 : index
    %6 = vector.load %arg1[%c1_7, %c0_8, %c0_9] : memref<2x32x32xf32, #tpu.memory_space<vmem>>, vector<1x32x32xf32>
    %7 = vector.shape_cast %6 : vector<1x32x32xf32> to vector<32x32xf32>
    %8 = arith.addf %5, %7 : vector<32x32xf32>
    %c0_10 = arith.constant 0 : index
    %c3 = arith.constant 3 : index
    %c0_11 = arith.constant 0 : index
    %c0_12 = arith.constant 0 : index
    %9 = vector.load %arg3[%c0_10, %c3, %c0_11, %c0_12] : memref<2x6x32x32xf32, #tpu.memory_space<vmem>>, vector<1x1x32x32xf32>
    %10 = vector.shape_cast %9 : vector<1x1x32x32xf32> to vector<32x32xf32>
    %cst = arith.constant dense<0.000000e+00> : vector<32x32xf32>
    %11 = tpu.matmul %8, %10, %cst {dimension_numbers = #tpu.dot_dimension_numbers<[1], [0], [0], [1], [0, 0, 1, 1], [], []>} : vector<32x32xf32>, vector<32x32xf32>, vector<32x32xf32> -> vector<32x32xf32>
    %c0_13 = arith.constant 0 : index
    %c3_14 = arith.constant 3 : index
    %c0_15 = arith.constant 0 : index
    %c0_16 = arith.constant 0 : index
    %12 = vector.load %arg6[%c0_13, %c3_14, %c0_15, %c0_16] : memref<2x13x1x32xf32, #tpu.memory_space<vmem>>, vector<1x1x1x32xf32>
    %13 = vector.shape_cast %12 : vector<1x1x1x32xf32> to vector<1x32xf32>
    %14 = vector.broadcast %13 : vector<1x32xf32> to vector<32x32xf32>
    %15 = arith.addf %11, %14 : vector<32x32xf32>
    %c0_17 = arith.constant 0 : index
    %c4 = arith.constant 4 : index
    %c0_18 = arith.constant 0 : index
    %c0_19 = arith.constant 0 : index
    %16 = vector.load %arg3[%c0_17, %c4, %c0_18, %c0_19] : memref<2x6x32x32xf32, #tpu.memory_space<vmem>>, vector<1x1x32x32xf32>
    %17 = vector.shape_cast %16 : vector<1x1x32x32xf32> to vector<32x32xf32>
    %cst_20 = arith.constant dense<0.000000e+00> : vector<32x32xf32>
    %18 = tpu.matmul %5, %17, %cst_20 {dimension_numbers = #tpu.dot_dimension_numbers<[1], [0], [0], [1], [0, 0, 1, 1], [], []>} : vector<32x32xf32>, vector<32x32xf32>, vector<32x32xf32> -> vector<32x32xf32>
    %c0_21 = arith.constant 0 : index
    %c4_22 = arith.constant 4 : index
    %c0_23 = arith.constant 0 : index
    %c0_24 = arith.constant 0 : index
    %19 = vector.load %arg6[%c0_21, %c4_22, %c0_23, %c0_24] : memref<2x13x1x32xf32, #tpu.memory_space<vmem>>, vector<1x1x1x32xf32>
    %20 = vector.shape_cast %19 : vector<1x1x1x32xf32> to vector<1x32xf32>
    %21 = vector.broadcast %20 : vector<1x32xf32> to vector<32x32xf32>
    %22 = arith.addf %18, %21 : vector<32x32xf32>
    %c1_25 = arith.constant 1 : index
    %c3_26 = arith.constant 3 : index
    %c0_27 = arith.constant 0 : index
    %c0_28 = arith.constant 0 : index
    %23 = vector.load %arg3[%c1_25, %c3_26, %c0_27, %c0_28] : memref<2x6x32x32xf32, #tpu.memory_space<vmem>>, vector<1x1x32x32xf32>
    %24 = vector.shape_cast %23 : vector<1x1x32x32xf32> to vector<32x32xf32>
    %cst_29 = arith.constant dense<0.000000e+00> : vector<32x32xf32>
    %25 = tpu.matmul %8, %24, %cst_29 {dimension_numbers = #tpu.dot_dimension_numbers<[1], [0], [0], [1], [0, 0, 1, 1], [], []>} : vector<32x32xf32>, vector<32x32xf32>, vector<32x32xf32> -> vector<32x32xf32>
    %c1_30 = arith.constant 1 : index
    %c3_31 = arith.constant 3 : index
    %c0_32 = arith.constant 0 : index
    %c0_33 = arith.constant 0 : index
    %26 = vector.load %arg6[%c1_30, %c3_31, %c0_32, %c0_33] : memref<2x13x1x32xf32, #tpu.memory_space<vmem>>, vector<1x1x1x32xf32>
    %27 = vector.shape_cast %26 : vector<1x1x1x32xf32> to vector<1x32xf32>
    %28 = vector.broadcast %27 : vector<1x32xf32> to vector<32x32xf32>
    %29 = arith.addf %25, %28 : vector<32x32xf32>
    %c1_34 = arith.constant 1 : index
    %c4_35 = arith.constant 4 : index
    %c0_36 = arith.constant 0 : index
    %c0_37 = arith.constant 0 : index
    %30 = vector.load %arg3[%c1_34, %c4_35, %c0_36, %c0_37] : memref<2x6x32x32xf32, #tpu.memory_space<vmem>>, vector<1x1x32x32xf32>
    %31 = vector.shape_cast %30 : vector<1x1x32x32xf32> to vector<32x32xf32>
    %cst_38 = arith.constant dense<0.000000e+00> : vector<32x32xf32>
    %32 = tpu.matmul %5, %31, %cst_38 {dimension_numbers = #tpu.dot_dimension_numbers<[1], [0], [0], [1], [0, 0, 1, 1], [], []>} : vector<32x32xf32>, vector<32x32xf32>, vector<32x32xf32> -> vector<32x32xf32>
    %c1_39 = arith.constant 1 : index
    %c4_40 = arith.constant 4 : index
    %c0_41 = arith.constant 0 : index
    %c0_42 = arith.constant 0 : index
    %33 = vector.load %arg6[%c1_39, %c4_40, %c0_41, %c0_42] : memref<2x13x1x32xf32, #tpu.memory_space<vmem>>, vector<1x1x1x32xf32>
    %34 = vector.shape_cast %33 : vector<1x1x1x32xf32> to vector<1x32xf32>
    %35 = vector.broadcast %34 : vector<1x32xf32> to vector<32x32xf32>
    %36 = arith.addf %32, %35 : vector<32x32xf32>
    %37 = arith.addf %1, %3 : vector<16x32xf32>
    %c0_43 = arith.constant 0 : index
    %c0_44 = arith.constant 0 : index
    %c0_45 = arith.constant 0 : index
    %c0_46 = arith.constant 0 : index
    %38 = vector.load %arg2[%c0_43, %c0_44, %c0_45, %c0_46] : memref<2x2x32x64xf32, #tpu.memory_space<vmem>>, vector<1x1x32x64xf32>
    %39 = vector.shape_cast %38 : vector<1x1x32x64xf32> to vector<32x64xf32>
    %cst_47 = arith.constant dense<0.000000e+00> : vector<16x64xf32>
    %40 = tpu.matmul %37, %39, %cst_47 {dimension_numbers = #tpu.dot_dimension_numbers<[1], [0], [0], [1], [0, 0, 1, 1], [], []>} : vector<16x32xf32>, vector<32x64xf32>, vector<16x64xf32> -> vector<16x64xf32>
    %c0_48 = arith.constant 0 : index
    %c0_49 = arith.constant 0 : index
    %c0_50 = arith.constant 0 : index
    %c0_51 = arith.constant 0 : index
    %41 = vector.load %arg5[%c0_48, %c0_49, %c0_50, %c0_51] : memref<2x2x1x64xf32, #tpu.memory_space<vmem>>, vector<1x1x1x64xf32>
    %42 = vector.shape_cast %41 : vector<1x1x1x64xf32> to vector<1x64xf32>
    %43 = vector.broadcast %42 : vector<1x64xf32> to vector<16x64xf32>
    %44 = arith.addf %40, %43 : vector<16x64xf32>
    %c0_52 = arith.constant 0 : index
    %c0_53 = arith.constant 0 : index
    %c0_54 = arith.constant 0 : index
    %c0_55 = arith.constant 0 : index
    %45 = vector.load %arg3[%c0_52, %c0_53, %c0_54, %c0_55] : memref<2x6x32x32xf32, #tpu.memory_space<vmem>>, vector<1x1x32x32xf32>
    %46 = vector.shape_cast %45 : vector<1x1x32x32xf32> to vector<32x32xf32>
    %cst_56 = arith.constant dense<0.000000e+00> : vector<16x32xf32>
    %47 = tpu.matmul %1, %46, %cst_56 {dimension_numbers = #tpu.dot_dimension_numbers<[1], [0], [0], [1], [0, 0, 1, 1], [], []>} : vector<16x32xf32>, vector<32x32xf32>, vector<16x32xf32> -> vector<16x32xf32>
    %c0_57 = arith.constant 0 : index
    %c0_58 = arith.constant 0 : index
    %c0_59 = arith.constant 0 : index
    %c0_60 = arith.constant 0 : index
    %48 = vector.load %arg6[%c0_57, %c0_58, %c0_59, %c0_60] : memref<2x13x1x32xf32, #tpu.memory_space<vmem>>, vector<1x1x1x32xf32>
    %49 = vector.shape_cast %48 : vector<1x1x1x32xf32> to vector<1x32xf32>
    %50 = vector.broadcast %49 : vector<1x32xf32> to vector<16x32xf32>
    %51 = arith.addf %47, %50 : vector<16x32xf32>
    %52 = vector.extract_strided_slice %44 {offsets = [0, 0], sizes = [16, 32], strides = [1, 1]} : vector<16x64xf32> to vector<16x32xf32>
    %53 = vector.extract_strided_slice %44 {offsets = [0, 32], sizes = [16, 32], strides = [1, 1]} : vector<16x64xf32> to vector<16x32xf32>
    %54 = vector.extract_strided_slice %52 {offsets = [0, 0], sizes = [8, 32], strides = [1, 1]} : vector<16x32xf32> to vector<8x32xf32>
    %55 = vector.extract_strided_slice %53 {offsets = [0, 0], sizes = [8, 32], strides = [1, 1]} : vector<16x32xf32> to vector<8x32xf32>
    %56 = vector.extract_strided_slice %51 {offsets = [0, 0], sizes = [8, 32], strides = [1, 1]} : vector<16x32xf32> to vector<8x32xf32>
    %57 = vector.extract_strided_slice %54 {offsets = [0, 0], sizes = [8, 8], strides = [1, 1]} : vector<8x32xf32> to vector<8x8xf32>
    %58 = vector.extract_strided_slice %55 {offsets = [0, 0], sizes = [8, 8], strides = [1, 1]} : vector<8x32xf32> to vector<8x8xf32>
    %59 = vector.extract_strided_slice %56 {offsets = [0, 0], sizes = [8, 8], strides = [1, 1]} : vector<8x32xf32> to vector<8x8xf32>
    %cst_61 = arith.constant dense<0.000000e+00> : vector<8x8xf32>
    %60 = tpu.matmul %57, %58, %cst_61 {dimension_numbers = #tpu.dot_dimension_numbers<[1], [1], [0], [0], [0, 0, 1, 0], [], []>} : vector<8x8xf32>, vector<8x8xf32>, vector<8x8xf32> -> vector<8x8xf32>
    %cst_62 = arith.constant 0.353553385 : f32
    %61 = vector.broadcast %cst_62 : f32 to vector<8x8xf32>
    %62 = arith.mulf %60, %61 : vector<8x8xf32>
    %cst_63 = arith.constant dense<0xFF800000> : vector<8xf32>
    %63 = vector.multi_reduction <maximumf>, %62, %cst_63 [1] : vector<8x8xf32> to vector<8xf32>
    %64 = vector.shape_cast %63 : vector<8xf32> to vector<8x1xf32>
    %65 = vector.broadcast %64 : vector<8x1xf32> to vector<8x8xf32>
    %66 = arith.subf %62, %65 : vector<8x8xf32>
    %67 = math.exp %66 : vector<8x8xf32>
    %cst_64 = arith.constant dense<0.000000e+00> : vector<8xf32>
    %68 = vector.multi_reduction <add>, %67, %cst_64 [1] : vector<8x8xf32> to vector<8xf32>
    %69 = vector.shape_cast %68 : vector<8xf32> to vector<8x1xf32>
    %70 = vector.broadcast %69 : vector<8x1xf32> to vector<8x8xf32>
    %71 = arith.divf %67, %70 : vector<8x8xf32>
    %cst_65 = arith.constant dense<0.000000e+00> : vector<8x8xf32>
    %72 = tpu.matmul %71, %59, %cst_65 {dimension_numbers = #tpu.dot_dimension_numbers<[1], [0], [0], [1], [0, 0, 1, 1], [], []>} : vector<8x8xf32>, vector<8x8xf32>, vector<8x8xf32> -> vector<8x8xf32>
    %73 = vector.extract_strided_slice %54 {offsets = [0, 8], sizes = [8, 8], strides = [1, 1]} : vector<8x32xf32> to vector<8x8xf32>
    %74 = vector.extract_strided_slice %55 {offsets = [0, 8], sizes = [8, 8], strides = [1, 1]} : vector<8x32xf32> to vector<8x8xf32>
    %75 = vector.extract_strided_slice %56 {offsets = [0, 8], sizes = [8, 8], strides = [1, 1]} : vector<8x32xf32> to vector<8x8xf32>
    %cst_66 = arith.constant dense<0.000000e+00> : vector<8x8xf32>
    %76 = tpu.matmul %73, %74, %cst_66 {dimension_numbers = #tpu.dot_dimension_numbers<[1], [1], [0], [0], [0, 0, 1, 0], [], []>} : vector<8x8xf32>, vector<8x8xf32>, vector<8x8xf32> -> vector<8x8xf32>
    %cst_67 = arith.constant 0.353553385 : f32
    %77 = vector.broadcast %cst_67 : f32 to vector<8x8xf32>
    %78 = arith.mulf %76, %77 : vector<8x8xf32>
    %cst_68 = arith.constant dense<0xFF800000> : vector<8xf32>
    %79 = vector.multi_reduction <maximumf>, %78, %cst_68 [1] : vector<8x8xf32> to vector<8xf32>
    %80 = vector.shape_cast %79 : vector<8xf32> to vector<8x1xf32>
    %81 = vector.broadcast %80 : vector<8x1xf32> to vector<8x8xf32>
    %82 = arith.subf %78, %81 : vector<8x8xf32>
    %83 = math.exp %82 : vector<8x8xf32>
    %cst_69 = arith.constant dense<0.000000e+00> : vector<8xf32>
    %84 = vector.multi_reduction <add>, %83, %cst_69 [1] : vector<8x8xf32> to vector<8xf32>
    %85 = vector.shape_cast %84 : vector<8xf32> to vector<8x1xf32>
    %86 = vector.broadcast %85 : vector<8x1xf32> to vector<8x8xf32>
    %87 = arith.divf %83, %86 : vector<8x8xf32>
    %cst_70 = arith.constant dense<0.000000e+00> : vector<8x8xf32>
    %88 = tpu.matmul %87, %75, %cst_70 {dimension_numbers = #tpu.dot_dimension_numbers<[1], [0], [0], [1], [0, 0, 1, 1], [], []>} : vector<8x8xf32>, vector<8x8xf32>, vector<8x8xf32> -> vector<8x8xf32>
    %89 = vector.extract_strided_slice %54 {offsets = [0, 16], sizes = [8, 8], strides = [1, 1]} : vector<8x32xf32> to vector<8x8xf32>
    %90 = vector.extract_strided_slice %55 {offsets = [0, 16], sizes = [8, 8], strides = [1, 1]} : vector<8x32xf32> to vector<8x8xf32>
    %91 = vector.extract_strided_slice %56 {offsets = [0, 16], sizes = [8, 8], strides = [1, 1]} : vector<8x32xf32> to vector<8x8xf32>
    %cst_71 = arith.constant dense<0.000000e+00> : vector<8x8xf32>
    %92 = tpu.matmul %89, %90, %cst_71 {dimension_numbers = #tpu.dot_dimension_numbers<[1], [1], [0], [0], [0, 0, 1, 0], [], []>} : vector<8x8xf32>, vector<8x8xf32>, vector<8x8xf32> -> vector<8x8xf32>
    %cst_72 = arith.constant 0.353553385 : f32
    %93 = vector.broadcast %cst_72 : f32 to vector<8x8xf32>
    %94 = arith.mulf %92, %93 : vector<8x8xf32>
    %cst_73 = arith.constant dense<0xFF800000> : vector<8xf32>
    %95 = vector.multi_reduction <maximumf>, %94, %cst_73 [1] : vector<8x8xf32> to vector<8xf32>
    %96 = vector.shape_cast %95 : vector<8xf32> to vector<8x1xf32>
    %97 = vector.broadcast %96 : vector<8x1xf32> to vector<8x8xf32>
    %98 = arith.subf %94, %97 : vector<8x8xf32>
    %99 = math.exp %98 : vector<8x8xf32>
    %cst_74 = arith.constant dense<0.000000e+00> : vector<8xf32>
    %100 = vector.multi_reduction <add>, %99, %cst_74 [1] : vector<8x8xf32> to vector<8xf32>
    %101 = vector.shape_cast %100 : vector<8xf32> to vector<8x1xf32>
    %102 = vector.broadcast %101 : vector<8x1xf32> to vector<8x8xf32>
    %103 = arith.divf %99, %102 : vector<8x8xf32>
    %cst_75 = arith.constant dense<0.000000e+00> : vector<8x8xf32>
    %104 = tpu.matmul %103, %91, %cst_75 {dimension_numbers = #tpu.dot_dimension_numbers<[1], [0], [0], [1], [0, 0, 1, 1], [], []>} : vector<8x8xf32>, vector<8x8xf32>, vector<8x8xf32> -> vector<8x8xf32>
    %105 = vector.extract_strided_slice %54 {offsets = [0, 24], sizes = [8, 8], strides = [1, 1]} : vector<8x32xf32> to vector<8x8xf32>
    %106 = vector.extract_strided_slice %55 {offsets = [0, 24], sizes = [8, 8], strides = [1, 1]} : vector<8x32xf32> to vector<8x8xf32>
    %107 = vector.extract_strided_slice %56 {offsets = [0, 24], sizes = [8, 8], strides = [1, 1]} : vector<8x32xf32> to vector<8x8xf32>
    %cst_76 = arith.constant dense<0.000000e+00> : vector<8x8xf32>
    %108 = tpu.matmul %105, %106, %cst_76 {dimension_numbers = #tpu.dot_dimension_numbers<[1], [1], [0], [0], [0, 0, 1, 0], [], []>} : vector<8x8xf32>, vector<8x8xf32>, vector<8x8xf32> -> vector<8x8xf32>
    %cst_77 = arith.constant 0.353553385 : f32
    %109 = vector.broadcast %cst_77 : f32 to vector<8x8xf32>
    %110 = arith.mulf %108, %109 : vector<8x8xf32>
    %cst_78 = arith.constant dense<0xFF800000> : vector<8xf32>
    %111 = vector.multi_reduction <maximumf>, %110, %cst_78 [1] : vector<8x8xf32> to vector<8xf32>
    %112 = vector.shape_cast %111 : vector<8xf32> to vector<8x1xf32>
    %113 = vector.broadcast %112 : vector<8x1xf32> to vector<8x8xf32>
    %114 = arith.subf %110, %113 : vector<8x8xf32>
    %115 = math.exp %114 : vector<8x8xf32>
    %cst_79 = arith.constant dense<0.000000e+00> : vector<8xf32>
    %116 = vector.multi_reduction <add>, %115, %cst_79 [1] : vector<8x8xf32> to vector<8xf32>
    %117 = vector.shape_cast %116 : vector<8xf32> to vector<8x1xf32>
    %118 = vector.broadcast %117 : vector<8x1xf32> to vector<8x8xf32>
    %119 = arith.divf %115, %118 : vector<8x8xf32>
    %cst_80 = arith.constant dense<0.000000e+00> : vector<8x8xf32>
    %120 = tpu.matmul %119, %107, %cst_80 {dimension_numbers = #tpu.dot_dimension_numbers<[1], [0], [0], [1], [0, 0, 1, 1], [], []>} : vector<8x8xf32>, vector<8x8xf32>, vector<8x8xf32> -> vector<8x8xf32>
    %121 = tpu.concatenate %72, %88, %104, %120 in 1 : vector<8x8xf32>, vector<8x8xf32>, vector<8x8xf32>, vector<8x8xf32> -> vector<8x32xf32>
    %122 = vector.extract_strided_slice %52 {offsets = [8, 0], sizes = [8, 32], strides = [1, 1]} : vector<16x32xf32> to vector<8x32xf32>
    %123 = vector.extract_strided_slice %53 {offsets = [8, 0], sizes = [8, 32], strides = [1, 1]} : vector<16x32xf32> to vector<8x32xf32>
    %124 = vector.extract_strided_slice %51 {offsets = [8, 0], sizes = [8, 32], strides = [1, 1]} : vector<16x32xf32> to vector<8x32xf32>
    %125 = vector.extract_strided_slice %122 {offsets = [0, 0], sizes = [8, 8], strides = [1, 1]} : vector<8x32xf32> to vector<8x8xf32>
    %126 = vector.extract_strided_slice %123 {offsets = [0, 0], sizes = [8, 8], strides = [1, 1]} : vector<8x32xf32> to vector<8x8xf32>
    %127 = vector.extract_strided_slice %124 {offsets = [0, 0], sizes = [8, 8], strides = [1, 1]} : vector<8x32xf32> to vector<8x8xf32>
    %cst_81 = arith.constant dense<0.000000e+00> : vector<8x8xf32>
    %128 = tpu.matmul %125, %126, %cst_81 {dimension_numbers = #tpu.dot_dimension_numbers<[1], [1], [0], [0], [0, 0, 1, 0], [], []>} : vector<8x8xf32>, vector<8x8xf32>, vector<8x8xf32> -> vector<8x8xf32>
    %cst_82 = arith.constant 0.353553385 : f32
    %129 = vector.broadcast %cst_82 : f32 to vector<8x8xf32>
    %130 = arith.mulf %128, %129 : vector<8x8xf32>
    %cst_83 = arith.constant dense<0xFF800000> : vector<8xf32>
    %131 = vector.multi_reduction <maximumf>, %130, %cst_83 [1] : vector<8x8xf32> to vector<8xf32>
    %132 = vector.shape_cast %131 : vector<8xf32> to vector<8x1xf32>
    %133 = vector.broadcast %132 : vector<8x1xf32> to vector<8x8xf32>
    %134 = arith.subf %130, %133 : vector<8x8xf32>
    %135 = math.exp %134 : vector<8x8xf32>
    %cst_84 = arith.constant dense<0.000000e+00> : vector<8xf32>
    %136 = vector.multi_reduction <add>, %135, %cst_84 [1] : vector<8x8xf32> to vector<8xf32>
    %137 = vector.shape_cast %136 : vector<8xf32> to vector<8x1xf32>
    %138 = vector.broadcast %137 : vector<8x1xf32> to vector<8x8xf32>
    %139 = arith.divf %135, %138 : vector<8x8xf32>
    %cst_85 = arith.constant dense<0.000000e+00> : vector<8x8xf32>
    %140 = tpu.matmul %139, %127, %cst_85 {dimension_numbers = #tpu.dot_dimension_numbers<[1], [0], [0], [1], [0, 0, 1, 1], [], []>} : vector<8x8xf32>, vector<8x8xf32>, vector<8x8xf32> -> vector<8x8xf32>
    %141 = vector.extract_strided_slice %122 {offsets = [0, 8], sizes = [8, 8], strides = [1, 1]} : vector<8x32xf32> to vector<8x8xf32>
    %142 = vector.extract_strided_slice %123 {offsets = [0, 8], sizes = [8, 8], strides = [1, 1]} : vector<8x32xf32> to vector<8x8xf32>
    %143 = vector.extract_strided_slice %124 {offsets = [0, 8], sizes = [8, 8], strides = [1, 1]} : vector<8x32xf32> to vector<8x8xf32>
    %cst_86 = arith.constant dense<0.000000e+00> : vector<8x8xf32>
    %144 = tpu.matmul %141, %142, %cst_86 {dimension_numbers = #tpu.dot_dimension_numbers<[1], [1], [0], [0], [0, 0, 1, 0], [], []>} : vector<8x8xf32>, vector<8x8xf32>, vector<8x8xf32> -> vector<8x8xf32>
    %cst_87 = arith.constant 0.353553385 : f32
    %145 = vector.broadcast %cst_87 : f32 to vector<8x8xf32>
    %146 = arith.mulf %144, %145 : vector<8x8xf32>
    %cst_88 = arith.constant dense<0xFF800000> : vector<8xf32>
    %147 = vector.multi_reduction <maximumf>, %146, %cst_88 [1] : vector<8x8xf32> to vector<8xf32>
    %148 = vector.shape_cast %147 : vector<8xf32> to vector<8x1xf32>
    %149 = vector.broadcast %148 : vector<8x1xf32> to vector<8x8xf32>
    %150 = arith.subf %146, %149 : vector<8x8xf32>
    %151 = math.exp %150 : vector<8x8xf32>
    %cst_89 = arith.constant dense<0.000000e+00> : vector<8xf32>
    %152 = vector.multi_reduction <add>, %151, %cst_89 [1] : vector<8x8xf32> to vector<8xf32>
    %153 = vector.shape_cast %152 : vector<8xf32> to vector<8x1xf32>
    %154 = vector.broadcast %153 : vector<8x1xf32> to vector<8x8xf32>
    %155 = arith.divf %151, %154 : vector<8x8xf32>
    %cst_90 = arith.constant dense<0.000000e+00> : vector<8x8xf32>
    %156 = tpu.matmul %155, %143, %cst_90 {dimension_numbers = #tpu.dot_dimension_numbers<[1], [0], [0], [1], [0, 0, 1, 1], [], []>} : vector<8x8xf32>, vector<8x8xf32>, vector<8x8xf32> -> vector<8x8xf32>
    %157 = vector.extract_strided_slice %122 {offsets = [0, 16], sizes = [8, 8], strides = [1, 1]} : vector<8x32xf32> to vector<8x8xf32>
    %158 = vector.extract_strided_slice %123 {offsets = [0, 16], sizes = [8, 8], strides = [1, 1]} : vector<8x32xf32> to vector<8x8xf32>
    %159 = vector.extract_strided_slice %124 {offsets = [0, 16], sizes = [8, 8], strides = [1, 1]} : vector<8x32xf32> to vector<8x8xf32>
    %cst_91 = arith.constant dense<0.000000e+00> : vector<8x8xf32>
    %160 = tpu.matmul %157, %158, %cst_91 {dimension_numbers = #tpu.dot_dimension_numbers<[1], [1], [0], [0], [0, 0, 1, 0], [], []>} : vector<8x8xf32>, vector<8x8xf32>, vector<8x8xf32> -> vector<8x8xf32>
    %cst_92 = arith.constant 0.353553385 : f32
    %161 = vector.broadcast %cst_92 : f32 to vector<8x8xf32>
    %162 = arith.mulf %160, %161 : vector<8x8xf32>
    %cst_93 = arith.constant dense<0xFF800000> : vector<8xf32>
    %163 = vector.multi_reduction <maximumf>, %162, %cst_93 [1] : vector<8x8xf32> to vector<8xf32>
    %164 = vector.shape_cast %163 : vector<8xf32> to vector<8x1xf32>
    %165 = vector.broadcast %164 : vector<8x1xf32> to vector<8x8xf32>
    %166 = arith.subf %162, %165 : vector<8x8xf32>
    %167 = math.exp %166 : vector<8x8xf32>
    %cst_94 = arith.constant dense<0.000000e+00> : vector<8xf32>
    %168 = vector.multi_reduction <add>, %167, %cst_94 [1] : vector<8x8xf32> to vector<8xf32>
    %169 = vector.shape_cast %168 : vector<8xf32> to vector<8x1xf32>
    %170 = vector.broadcast %169 : vector<8x1xf32> to vector<8x8xf32>
    %171 = arith.divf %167, %170 : vector<8x8xf32>
    %cst_95 = arith.constant dense<0.000000e+00> : vector<8x8xf32>
    %172 = tpu.matmul %171, %159, %cst_95 {dimension_numbers = #tpu.dot_dimension_numbers<[1], [0], [0], [1], [0, 0, 1, 1], [], []>} : vector<8x8xf32>, vector<8x8xf32>, vector<8x8xf32> -> vector<8x8xf32>
    %173 = vector.extract_strided_slice %122 {offsets = [0, 24], sizes = [8, 8], strides = [1, 1]} : vector<8x32xf32> to vector<8x8xf32>
    %174 = vector.extract_strided_slice %123 {offsets = [0, 24], sizes = [8, 8], strides = [1, 1]} : vector<8x32xf32> to vector<8x8xf32>
    %175 = vector.extract_strided_slice %124 {offsets = [0, 24], sizes = [8, 8], strides = [1, 1]} : vector<8x32xf32> to vector<8x8xf32>
    %cst_96 = arith.constant dense<0.000000e+00> : vector<8x8xf32>
    %176 = tpu.matmul %173, %174, %cst_96 {dimension_numbers = #tpu.dot_dimension_numbers<[1], [1], [0], [0], [0, 0, 1, 0], [], []>} : vector<8x8xf32>, vector<8x8xf32>, vector<8x8xf32> -> vector<8x8xf32>
    %cst_97 = arith.constant 0.353553385 : f32
    %177 = vector.broadcast %cst_97 : f32 to vector<8x8xf32>
    %178 = arith.mulf %176, %177 : vector<8x8xf32>
    %cst_98 = arith.constant dense<0xFF800000> : vector<8xf32>
    %179 = vector.multi_reduction <maximumf>, %178, %cst_98 [1] : vector<8x8xf32> to vector<8xf32>
    %180 = vector.shape_cast %179 : vector<8xf32> to vector<8x1xf32>
    %181 = vector.broadcast %180 : vector<8x1xf32> to vector<8x8xf32>
    %182 = arith.subf %178, %181 : vector<8x8xf32>
    %183 = math.exp %182 : vector<8x8xf32>
    %cst_99 = arith.constant dense<0.000000e+00> : vector<8xf32>
    %184 = vector.multi_reduction <add>, %183, %cst_99 [1] : vector<8x8xf32> to vector<8xf32>
    %185 = vector.shape_cast %184 : vector<8xf32> to vector<8x1xf32>
    %186 = vector.broadcast %185 : vector<8x1xf32> to vector<8x8xf32>
    %187 = arith.divf %183, %186 : vector<8x8xf32>
    %cst_100 = arith.constant dense<0.000000e+00> : vector<8x8xf32>
    %188 = tpu.matmul %187, %175, %cst_100 {dimension_numbers = #tpu.dot_dimension_numbers<[1], [0], [0], [1], [0, 0, 1, 1], [], []>} : vector<8x8xf32>, vector<8x8xf32>, vector<8x8xf32> -> vector<8x8xf32>
    %189 = tpu.concatenate %140, %156, %172, %188 in 1 : vector<8x8xf32>, vector<8x8xf32>, vector<8x8xf32>, vector<8x8xf32> -> vector<8x32xf32>
    %190 = tpu.concatenate %121, %189 in 0 : vector<8x32xf32>, vector<8x32xf32> -> vector<16x32xf32>
    %c0_101 = arith.constant 0 : index
    %c1_102 = arith.constant 1 : index
    %c0_103 = arith.constant 0 : index
    %c0_104 = arith.constant 0 : index
    %191 = vector.load %arg3[%c0_101, %c1_102, %c0_103, %c0_104] : memref<2x6x32x32xf32, #tpu.memory_space<vmem>>, vector<1x1x32x32xf32>
    %192 = vector.shape_cast %191 : vector<1x1x32x32xf32> to vector<32x32xf32>
    %cst_105 = arith.constant dense<0.000000e+00> : vector<16x32xf32>
    %193 = tpu.matmul %190, %192, %cst_105 {dimension_numbers = #tpu.dot_dimension_numbers<[1], [0], [0], [1], [0, 0, 1, 1], [], []>} : vector<16x32xf32>, vector<32x32xf32>, vector<16x32xf32> -> vector<16x32xf32>
    %c0_106 = arith.constant 0 : index
    %c1_107 = arith.constant 1 : index
    %c0_108 = arith.constant 0 : index
    %c0_109 = arith.constant 0 : index
    %194 = vector.load %arg6[%c0_106, %c1_107, %c0_108, %c0_109] : memref<2x13x1x32xf32, #tpu.memory_space<vmem>>, vector<1x1x1x32xf32>
    %195 = vector.shape_cast %194 : vector<1x1x1x32xf32> to vector<1x32xf32>
    %196 = vector.broadcast %195 : vector<1x32xf32> to vector<16x32xf32>
    %197 = arith.addf %193, %196 : vector<16x32xf32>
    %198 = arith.addf %1, %197 : vector<16x32xf32>
    %c0_110 = arith.constant 0 : index
    %c7 = arith.constant 7 : index
    %c0_111 = arith.constant 0 : index
    %c0_112 = arith.constant 0 : index
    %199 = vector.load %arg6[%c0_110, %c7, %c0_111, %c0_112] : memref<2x13x1x32xf32, #tpu.memory_space<vmem>>, vector<1x1x1x32xf32>
    %200 = vector.shape_cast %199 : vector<1x1x1x32xf32> to vector<1x32xf32>
    %c0_113 = arith.constant 0 : index
    %c8 = arith.constant 8 : index
    %c0_114 = arith.constant 0 : index
    %c0_115 = arith.constant 0 : index
    %201 = vector.load %arg6[%c0_113, %c8, %c0_114, %c0_115] : memref<2x13x1x32xf32, #tpu.memory_space<vmem>>, vector<1x1x1x32xf32>
    %202 = vector.shape_cast %201 : vector<1x1x1x32xf32> to vector<1x32xf32>
    %cst_116 = arith.constant dense<0.000000e+00> : vector<16xf32>
    %203 = vector.multi_reduction <add>, %198, %cst_116 [1] : vector<16x32xf32> to vector<16xf32>
    %204 = vector.shape_cast %203 : vector<16xf32> to vector<16x1xf32>
    %cst_117 = arith.constant 3.200000e+01 : f32
    %205 = vector.broadcast %cst_117 : f32 to vector<16x1xf32>
    %206 = arith.divf %204, %205 : vector<16x1xf32>
    %207 = vector.broadcast %206 : vector<16x1xf32> to vector<16x32xf32>
    %208 = arith.subf %198, %207 : vector<16x32xf32>
    %209 = arith.mulf %208, %208 : vector<16x32xf32>
    %cst_118 = arith.constant dense<0.000000e+00> : vector<16xf32>
    %210 = vector.multi_reduction <add>, %209, %cst_118 [1] : vector<16x32xf32> to vector<16xf32>
    %211 = vector.shape_cast %210 : vector<16xf32> to vector<16x1xf32>
    %cst_119 = arith.constant 3.200000e+01 : f32
    %212 = vector.broadcast %cst_119 : f32 to vector<16x1xf32>
    %213 = arith.divf %211, %212 : vector<16x1xf32>
    %214 = vector.broadcast %206 : vector<16x1xf32> to vector<16x32xf32>
    %215 = arith.subf %198, %214 : vector<16x32xf32>
    %cst_120 = arith.constant 9.99999974E-6 : f32
    %216 = vector.broadcast %cst_120 : f32 to vector<16x1xf32>
    %217 = arith.addf %213, %216 : vector<16x1xf32>
    %218 = math.rsqrt %217 : vector<16x1xf32>
    %219 = vector.broadcast %218 : vector<16x1xf32> to vector<16x32xf32>
    %220 = arith.mulf %215, %219 : vector<16x32xf32>
    %221 = vector.broadcast %200 : vector<1x32xf32> to vector<16x32xf32>
    %222 = arith.mulf %220, %221 : vector<16x32xf32>
    %223 = vector.broadcast %202 : vector<1x32xf32> to vector<16x32xf32>
    %224 = arith.addf %222, %223 : vector<16x32xf32>
    %225 = arith.addf %224, %3 : vector<16x32xf32>
    %c0_121 = arith.constant 0 : index
    %c2 = arith.constant 2 : index
    %c0_122 = arith.constant 0 : index
    %c0_123 = arith.constant 0 : index
    %226 = vector.load %arg3[%c0_121, %c2, %c0_122, %c0_123] : memref<2x6x32x32xf32, #tpu.memory_space<vmem>>, vector<1x1x32x32xf32>
    %227 = vector.shape_cast %226 : vector<1x1x32x32xf32> to vector<32x32xf32>
    %cst_124 = arith.constant dense<0.000000e+00> : vector<16x32xf32>
    %228 = tpu.matmul %225, %227, %cst_124 {dimension_numbers = #tpu.dot_dimension_numbers<[1], [0], [0], [1], [0, 0, 1, 1], [], []>} : vector<16x32xf32>, vector<32x32xf32>, vector<16x32xf32> -> vector<16x32xf32>
    %c0_125 = arith.constant 0 : index
    %c2_126 = arith.constant 2 : index
    %c0_127 = arith.constant 0 : index
    %c0_128 = arith.constant 0 : index
    %229 = vector.load %arg6[%c0_125, %c2_126, %c0_127, %c0_128] : memref<2x13x1x32xf32, #tpu.memory_space<vmem>>, vector<1x1x1x32xf32>
    %230 = vector.shape_cast %229 : vector<1x1x1x32xf32> to vector<1x32xf32>
    %231 = vector.broadcast %230 : vector<1x32xf32> to vector<16x32xf32>
    %232 = arith.addf %228, %231 : vector<16x32xf32>
    %233 = vector.extract_strided_slice %232 {offsets = [0, 0], sizes = [8, 32], strides = [1, 1]} : vector<16x32xf32> to vector<8x32xf32>
    %234 = vector.extract_strided_slice %15 {offsets = [0, 0], sizes = [16, 32], strides = [1, 1]} : vector<32x32xf32> to vector<16x32xf32>
    %235 = vector.extract_strided_slice %22 {offsets = [0, 0], sizes = [16, 32], strides = [1, 1]} : vector<32x32xf32> to vector<16x32xf32>
    %236 = vector.extract_strided_slice %233 {offsets = [0, 0], sizes = [8, 8], strides = [1, 1]} : vector<8x32xf32> to vector<8x8xf32>
    %237 = vector.extract_strided_slice %234 {offsets = [0, 0], sizes = [16, 8], strides = [1, 1]} : vector<16x32xf32> to vector<16x8xf32>
    %238 = vector.extract_strided_slice %235 {offsets = [0, 0], sizes = [16, 8], strides = [1, 1]} : vector<16x32xf32> to vector<16x8xf32>
    %cst_129 = arith.constant dense<0.000000e+00> : vector<8x16xf32>
    %239 = tpu.matmul %236, %237, %cst_129 {dimension_numbers = #tpu.dot_dimension_numbers<[1], [1], [0], [0], [0, 0, 1, 0], [], []>} : vector<8x8xf32>, vector<16x8xf32>, vector<8x16xf32> -> vector<8x16xf32>
    %cst_130 = arith.constant 0.353553385 : f32
    %240 = vector.broadcast %cst_130 : f32 to vector<8x16xf32>
    %241 = arith.mulf %239, %240 : vector<8x16xf32>
    %cst_131 = arith.constant dense<0xFF800000> : vector<8xf32>
    %242 = vector.multi_reduction <maximumf>, %241, %cst_131 [1] : vector<8x16xf32> to vector<8xf32>
    %243 = vector.shape_cast %242 : vector<8xf32> to vector<8x1xf32>
    %244 = vector.broadcast %243 : vector<8x1xf32> to vector<8x16xf32>
    %245 = arith.subf %241, %244 : vector<8x16xf32>
    %246 = math.exp %245 : vector<8x16xf32>
    %cst_132 = arith.constant dense<0.000000e+00> : vector<8xf32>
    %247 = vector.multi_reduction <add>, %246, %cst_132 [1] : vector<8x16xf32> to vector<8xf32>
    %248 = vector.shape_cast %247 : vector<8xf32> to vector<8x1xf32>
    %249 = vector.broadcast %248 : vector<8x1xf32> to vector<8x16xf32>
    %250 = arith.divf %246, %249 : vector<8x16xf32>
    %cst_133 = arith.constant dense<0.000000e+00> : vector<8x8xf32>
    %251 = tpu.matmul %250, %238, %cst_133 {dimension_numbers = #tpu.dot_dimension_numbers<[1], [0], [0], [1], [0, 0, 1, 1], [], []>} : vector<8x16xf32>, vector<16x8xf32>, vector<8x8xf32> -> vector<8x8xf32>
    %252 = vector.extract_strided_slice %233 {offsets = [0, 8], sizes = [8, 8], strides = [1, 1]} : vector<8x32xf32> to vector<8x8xf32>
    %253 = vector.extract_strided_slice %234 {offsets = [0, 8], sizes = [16, 8], strides = [1, 1]} : vector<16x32xf32> to vector<16x8xf32>
    %254 = vector.extract_strided_slice %235 {offsets = [0, 8], sizes = [16, 8], strides = [1, 1]} : vector<16x32xf32> to vector<16x8xf32>
    %cst_134 = arith.constant dense<0.000000e+00> : vector<8x16xf32>
    %255 = tpu.matmul %252, %253, %cst_134 {dimension_numbers = #tpu.dot_dimension_numbers<[1], [1], [0], [0], [0, 0, 1, 0], [], []>} : vector<8x8xf32>, vector<16x8xf32>, vector<8x16xf32> -> vector<8x16xf32>
    %cst_135 = arith.constant 0.353553385 : f32
    %256 = vector.broadcast %cst_135 : f32 to vector<8x16xf32>
    %257 = arith.mulf %255, %256 : vector<8x16xf32>
    %cst_136 = arith.constant dense<0xFF800000> : vector<8xf32>
    %258 = vector.multi_reduction <maximumf>, %257, %cst_136 [1] : vector<8x16xf32> to vector<8xf32>
    %259 = vector.shape_cast %258 : vector<8xf32> to vector<8x1xf32>
    %260 = vector.broadcast %259 : vector<8x1xf32> to vector<8x16xf32>
    %261 = arith.subf %257, %260 : vector<8x16xf32>
    %262 = math.exp %261 : vector<8x16xf32>
    %cst_137 = arith.constant dense<0.000000e+00> : vector<8xf32>
    %263 = vector.multi_reduction <add>, %262, %cst_137 [1] : vector<8x16xf32> to vector<8xf32>
    %264 = vector.shape_cast %263 : vector<8xf32> to vector<8x1xf32>
    %265 = vector.broadcast %264 : vector<8x1xf32> to vector<8x16xf32>
    %266 = arith.divf %262, %265 : vector<8x16xf32>
    %cst_138 = arith.constant dense<0.000000e+00> : vector<8x8xf32>
    %267 = tpu.matmul %266, %254, %cst_138 {dimension_numbers = #tpu.dot_dimension_numbers<[1], [0], [0], [1], [0, 0, 1, 1], [], []>} : vector<8x16xf32>, vector<16x8xf32>, vector<8x8xf32> -> vector<8x8xf32>
    %268 = vector.extract_strided_slice %233 {offsets = [0, 16], sizes = [8, 8], strides = [1, 1]} : vector<8x32xf32> to vector<8x8xf32>
    %269 = vector.extract_strided_slice %234 {offsets = [0, 16], sizes = [16, 8], strides = [1, 1]} : vector<16x32xf32> to vector<16x8xf32>
    %270 = vector.extract_strided_slice %235 {offsets = [0, 16], sizes = [16, 8], strides = [1, 1]} : vector<16x32xf32> to vector<16x8xf32>
    %cst_139 = arith.constant dense<0.000000e+00> : vector<8x16xf32>
    %271 = tpu.matmul %268, %269, %cst_139 {dimension_numbers = #tpu.dot_dimension_numbers<[1], [1], [0], [0], [0, 0, 1, 0], [], []>} : vector<8x8xf32>, vector<16x8xf32>, vector<8x16xf32> -> vector<8x16xf32>
    %cst_140 = arith.constant 0.353553385 : f32
    %272 = vector.broadcast %cst_140 : f32 to vector<8x16xf32>
    %273 = arith.mulf %271, %272 : vector<8x16xf32>
    %cst_141 = arith.constant dense<0xFF800000> : vector<8xf32>
    %274 = vector.multi_reduction <maximumf>, %273, %cst_141 [1] : vector<8x16xf32> to vector<8xf32>
    %275 = vector.shape_cast %274 : vector<8xf32> to vector<8x1xf32>
    %276 = vector.broadcast %275 : vector<8x1xf32> to vector<8x16xf32>
    %277 = arith.subf %273, %276 : vector<8x16xf32>
    %278 = math.exp %277 : vector<8x16xf32>
    %cst_142 = arith.constant dense<0.000000e+00> : vector<8xf32>
    %279 = vector.multi_reduction <add>, %278, %cst_142 [1] : vector<8x16xf32> to vector<8xf32>
    %280 = vector.shape_cast %279 : vector<8xf32> to vector<8x1xf32>
    %281 = vector.broadcast %280 : vector<8x1xf32> to vector<8x16xf32>
    %282 = arith.divf %278, %281 : vector<8x16xf32>
    %cst_143 = arith.constant dense<0.000000e+00> : vector<8x8xf32>
    %283 = tpu.matmul %282, %270, %cst_143 {dimension_numbers = #tpu.dot_dimension_numbers<[1], [0], [0], [1], [0, 0, 1, 1], [], []>} : vector<8x16xf32>, vector<16x8xf32>, vector<8x8xf32> -> vector<8x8xf32>
    %284 = vector.extract_strided_slice %233 {offsets = [0, 24], sizes = [8, 8], strides = [1, 1]} : vector<8x32xf32> to vector<8x8xf32>
    %285 = vector.extract_strided_slice %234 {offsets = [0, 24], sizes = [16, 8], strides = [1, 1]} : vector<16x32xf32> to vector<16x8xf32>
    %286 = vector.extract_strided_slice %235 {offsets = [0, 24], sizes = [16, 8], strides = [1, 1]} : vector<16x32xf32> to vector<16x8xf32>
    %cst_144 = arith.constant dense<0.000000e+00> : vector<8x16xf32>
    %287 = tpu.matmul %284, %285, %cst_144 {dimension_numbers = #tpu.dot_dimension_numbers<[1], [1], [0], [0], [0, 0, 1, 0], [], []>} : vector<8x8xf32>, vector<16x8xf32>, vector<8x16xf32> -> vector<8x16xf32>
    %cst_145 = arith.constant 0.353553385 : f32
    %288 = vector.broadcast %cst_145 : f32 to vector<8x16xf32>
    %289 = arith.mulf %287, %288 : vector<8x16xf32>
    %cst_146 = arith.constant dense<0xFF800000> : vector<8xf32>
    %290 = vector.multi_reduction <maximumf>, %289, %cst_146 [1] : vector<8x16xf32> to vector<8xf32>
    %291 = vector.shape_cast %290 : vector<8xf32> to vector<8x1xf32>
    %292 = vector.broadcast %291 : vector<8x1xf32> to vector<8x16xf32>
    %293 = arith.subf %289, %292 : vector<8x16xf32>
    %294 = math.exp %293 : vector<8x16xf32>
    %cst_147 = arith.constant dense<0.000000e+00> : vector<8xf32>
    %295 = vector.multi_reduction <add>, %294, %cst_147 [1] : vector<8x16xf32> to vector<8xf32>
    %296 = vector.shape_cast %295 : vector<8xf32> to vector<8x1xf32>
    %297 = vector.broadcast %296 : vector<8x1xf32> to vector<8x16xf32>
    %298 = arith.divf %294, %297 : vector<8x16xf32>
    %cst_148 = arith.constant dense<0.000000e+00> : vector<8x8xf32>
    %299 = tpu.matmul %298, %286, %cst_148 {dimension_numbers = #tpu.dot_dimension_numbers<[1], [0], [0], [1], [0, 0, 1, 1], [], []>} : vector<8x16xf32>, vector<16x8xf32>, vector<8x8xf32> -> vector<8x8xf32>
    %300 = tpu.concatenate %251, %267, %283, %299 in 1 : vector<8x8xf32>, vector<8x8xf32>, vector<8x8xf32>, vector<8x8xf32> -> vector<8x32xf32>
    %301 = vector.extract_strided_slice %232 {offsets = [8, 0], sizes = [8, 32], strides = [1, 1]} : vector<16x32xf32> to vector<8x32xf32>
    %302 = vector.extract_strided_slice %15 {offsets = [16, 0], sizes = [16, 32], strides = [1, 1]} : vector<32x32xf32> to vector<16x32xf32>
    %303 = vector.extract_strided_slice %22 {offsets = [16, 0], sizes = [16, 32], strides = [1, 1]} : vector<32x32xf32> to vector<16x32xf32>
    %304 = vector.extract_strided_slice %301 {offsets = [0, 0], sizes = [8, 8], strides = [1, 1]} : vector<8x32xf32> to vector<8x8xf32>
    %305 = vector.extract_strided_slice %302 {offsets = [0, 0], sizes = [16, 8], strides = [1, 1]} : vector<16x32xf32> to vector<16x8xf32>
    %306 = vector.extract_strided_slice %303 {offsets = [0, 0], sizes = [16, 8], strides = [1, 1]} : vector<16x32xf32> to vector<16x8xf32>
    %cst_149 = arith.constant dense<0.000000e+00> : vector<8x16xf32>
    %307 = tpu.matmul %304, %305, %cst_149 {dimension_numbers = #tpu.dot_dimension_numbers<[1], [1], [0], [0], [0, 0, 1, 0], [], []>} : vector<8x8xf32>, vector<16x8xf32>, vector<8x16xf32> -> vector<8x16xf32>
    %cst_150 = arith.constant 0.353553385 : f32
    %308 = vector.broadcast %cst_150 : f32 to vector<8x16xf32>
    %309 = arith.mulf %307, %308 : vector<8x16xf32>
    %cst_151 = arith.constant dense<0xFF800000> : vector<8xf32>
    %310 = vector.multi_reduction <maximumf>, %309, %cst_151 [1] : vector<8x16xf32> to vector<8xf32>
    %311 = vector.shape_cast %310 : vector<8xf32> to vector<8x1xf32>
    %312 = vector.broadcast %311 : vector<8x1xf32> to vector<8x16xf32>
    %313 = arith.subf %309, %312 : vector<8x16xf32>
    %314 = math.exp %313 : vector<8x16xf32>
    %cst_152 = arith.constant dense<0.000000e+00> : vector<8xf32>
    %315 = vector.multi_reduction <add>, %314, %cst_152 [1] : vector<8x16xf32> to vector<8xf32>
    %316 = vector.shape_cast %315 : vector<8xf32> to vector<8x1xf32>
    %317 = vector.broadcast %316 : vector<8x1xf32> to vector<8x16xf32>
    %318 = arith.divf %314, %317 : vector<8x16xf32>
    %cst_153 = arith.constant dense<0.000000e+00> : vector<8x8xf32>
    %319 = tpu.matmul %318, %306, %cst_153 {dimension_numbers = #tpu.dot_dimension_numbers<[1], [0], [0], [1], [0, 0, 1, 1], [], []>} : vector<8x16xf32>, vector<16x8xf32>, vector<8x8xf32> -> vector<8x8xf32>
    %320 = vector.extract_strided_slice %301 {offsets = [0, 8], sizes = [8, 8], strides = [1, 1]} : vector<8x32xf32> to vector<8x8xf32>
    %321 = vector.extract_strided_slice %302 {offsets = [0, 8], sizes = [16, 8], strides = [1, 1]} : vector<16x32xf32> to vector<16x8xf32>
    %322 = vector.extract_strided_slice %303 {offsets = [0, 8], sizes = [16, 8], strides = [1, 1]} : vector<16x32xf32> to vector<16x8xf32>
    %cst_154 = arith.constant dense<0.000000e+00> : vector<8x16xf32>
    %323 = tpu.matmul %320, %321, %cst_154 {dimension_numbers = #tpu.dot_dimension_numbers<[1], [1], [0], [0], [0, 0, 1, 0], [], []>} : vector<8x8xf32>, vector<16x8xf32>, vector<8x16xf32> -> vector<8x16xf32>
    %cst_155 = arith.constant 0.353553385 : f32
    %324 = vector.broadcast %cst_155 : f32 to vector<8x16xf32>
    %325 = arith.mulf %323, %324 : vector<8x16xf32>
    %cst_156 = arith.constant dense<0xFF800000> : vector<8xf32>
    %326 = vector.multi_reduction <maximumf>, %325, %cst_156 [1] : vector<8x16xf32> to vector<8xf32>
    %327 = vector.shape_cast %326 : vector<8xf32> to vector<8x1xf32>
    %328 = vector.broadcast %327 : vector<8x1xf32> to vector<8x16xf32>
    %329 = arith.subf %325, %328 : vector<8x16xf32>
    %330 = math.exp %329 : vector<8x16xf32>
    %cst_157 = arith.constant dense<0.000000e+00> : vector<8xf32>
    %331 = vector.multi_reduction <add>, %330, %cst_157 [1] : vector<8x16xf32> to vector<8xf32>
    %332 = vector.shape_cast %331 : vector<8xf32> to vector<8x1xf32>
    %333 = vector.broadcast %332 : vector<8x1xf32> to vector<8x16xf32>
    %334 = arith.divf %330, %333 : vector<8x16xf32>
    %cst_158 = arith.constant dense<0.000000e+00> : vector<8x8xf32>
    %335 = tpu.matmul %334, %322, %cst_158 {dimension_numbers = #tpu.dot_dimension_numbers<[1], [0], [0], [1], [0, 0, 1, 1], [], []>} : vector<8x16xf32>, vector<16x8xf32>, vector<8x8xf32> -> vector<8x8xf32>
    %336 = vector.extract_strided_slice %301 {offsets = [0, 16], sizes = [8, 8], strides = [1, 1]} : vector<8x32xf32> to vector<8x8xf32>
    %337 = vector.extract_strided_slice %302 {offsets = [0, 16], sizes = [16, 8], strides = [1, 1]} : vector<16x32xf32> to vector<16x8xf32>
    %338 = vector.extract_strided_slice %303 {offsets = [0, 16], sizes = [16, 8], strides = [1, 1]} : vector<16x32xf32> to vector<16x8xf32>
    %cst_159 = arith.constant dense<0.000000e+00> : vector<8x16xf32>
    %339 = tpu.matmul %336, %337, %cst_159 {dimension_numbers = #tpu.dot_dimension_numbers<[1], [1], [0], [0], [0, 0, 1, 0], [], []>} : vector<8x8xf32>, vector<16x8xf32>, vector<8x16xf32> -> vector<8x16xf32>
    %cst_160 = arith.constant 0.353553385 : f32
    %340 = vector.broadcast %cst_160 : f32 to vector<8x16xf32>
    %341 = arith.mulf %339, %340 : vector<8x16xf32>
    %cst_161 = arith.constant dense<0xFF800000> : vector<8xf32>
    %342 = vector.multi_reduction <maximumf>, %341, %cst_161 [1] : vector<8x16xf32> to vector<8xf32>
    %343 = vector.shape_cast %342 : vector<8xf32> to vector<8x1xf32>
    %344 = vector.broadcast %343 : vector<8x1xf32> to vector<8x16xf32>
    %345 = arith.subf %341, %344 : vector<8x16xf32>
    %346 = math.exp %345 : vector<8x16xf32>
    %cst_162 = arith.constant dense<0.000000e+00> : vector<8xf32>
    %347 = vector.multi_reduction <add>, %346, %cst_162 [1] : vector<8x16xf32> to vector<8xf32>
    %348 = vector.shape_cast %347 : vector<8xf32> to vector<8x1xf32>
    %349 = vector.broadcast %348 : vector<8x1xf32> to vector<8x16xf32>
    %350 = arith.divf %346, %349 : vector<8x16xf32>
    %cst_163 = arith.constant dense<0.000000e+00> : vector<8x8xf32>
    %351 = tpu.matmul %350, %338, %cst_163 {dimension_numbers = #tpu.dot_dimension_numbers<[1], [0], [0], [1], [0, 0, 1, 1], [], []>} : vector<8x16xf32>, vector<16x8xf32>, vector<8x8xf32> -> vector<8x8xf32>
    %352 = vector.extract_strided_slice %301 {offsets = [0, 24], sizes = [8, 8], strides = [1, 1]} : vector<8x32xf32> to vector<8x8xf32>
    %353 = vector.extract_strided_slice %302 {offsets = [0, 24], sizes = [16, 8], strides = [1, 1]} : vector<16x32xf32> to vector<16x8xf32>
    %354 = vector.extract_strided_slice %303 {offsets = [0, 24], sizes = [16, 8], strides = [1, 1]} : vector<16x32xf32> to vector<16x8xf32>
    %cst_164 = arith.constant dense<0.000000e+00> : vector<8x16xf32>
    %355 = tpu.matmul %352, %353, %cst_164 {dimension_numbers = #tpu.dot_dimension_numbers<[1], [1], [0], [0], [0, 0, 1, 0], [], []>} : vector<8x8xf32>, vector<16x8xf32>, vector<8x16xf32> -> vector<8x16xf32>
    %cst_165 = arith.constant 0.353553385 : f32
    %356 = vector.broadcast %cst_165 : f32 to vector<8x16xf32>
    %357 = arith.mulf %355, %356 : vector<8x16xf32>
    %cst_166 = arith.constant dense<0xFF800000> : vector<8xf32>
    %358 = vector.multi_reduction <maximumf>, %357, %cst_166 [1] : vector<8x16xf32> to vector<8xf32>
    %359 = vector.shape_cast %358 : vector<8xf32> to vector<8x1xf32>
    %360 = vector.broadcast %359 : vector<8x1xf32> to vector<8x16xf32>
    %361 = arith.subf %357, %360 : vector<8x16xf32>
    %362 = math.exp %361 : vector<8x16xf32>
    %cst_167 = arith.constant dense<0.000000e+00> : vector<8xf32>
    %363 = vector.multi_reduction <add>, %362, %cst_167 [1] : vector<8x16xf32> to vector<8xf32>
    %364 = vector.shape_cast %363 : vector<8xf32> to vector<8x1xf32>
    %365 = vector.broadcast %364 : vector<8x1xf32> to vector<8x16xf32>
    %366 = arith.divf %362, %365 : vector<8x16xf32>
    %cst_168 = arith.constant dense<0.000000e+00> : vector<8x8xf32>
    %367 = tpu.matmul %366, %354, %cst_168 {dimension_numbers = #tpu.dot_dimension_numbers<[1], [0], [0], [1], [0, 0, 1, 1], [], []>} : vector<8x16xf32>, vector<16x8xf32>, vector<8x8xf32> -> vector<8x8xf32>
    %368 = tpu.concatenate %319, %335, %351, %367 in 1 : vector<8x8xf32>, vector<8x8xf32>, vector<8x8xf32>, vector<8x8xf32> -> vector<8x32xf32>
    %369 = tpu.concatenate %300, %368 in 0 : vector<8x32xf32>, vector<8x32xf32> -> vector<16x32xf32>
    %c0_169 = arith.constant 0 : index
    %c5 = arith.constant 5 : index
    %c0_170 = arith.constant 0 : index
    %c0_171 = arith.constant 0 : index
    %370 = vector.load %arg3[%c0_169, %c5, %c0_170, %c0_171] : memref<2x6x32x32xf32, #tpu.memory_space<vmem>>, vector<1x1x32x32xf32>
    %371 = vector.shape_cast %370 : vector<1x1x32x32xf32> to vector<32x32xf32>
    %cst_172 = arith.constant dense<0.000000e+00> : vector<16x32xf32>
    %372 = tpu.matmul %369, %371, %cst_172 {dimension_numbers = #tpu.dot_dimension_numbers<[1], [0], [0], [1], [0, 0, 1, 1], [], []>} : vector<16x32xf32>, vector<32x32xf32>, vector<16x32xf32> -> vector<16x32xf32>
    %c0_173 = arith.constant 0 : index
    %c5_174 = arith.constant 5 : index
    %c0_175 = arith.constant 0 : index
    %c0_176 = arith.constant 0 : index
    %373 = vector.load %arg6[%c0_173, %c5_174, %c0_175, %c0_176] : memref<2x13x1x32xf32, #tpu.memory_space<vmem>>, vector<1x1x1x32xf32>
    %374 = vector.shape_cast %373 : vector<1x1x1x32xf32> to vector<1x32xf32>
    %375 = vector.broadcast %374 : vector<1x32xf32> to vector<16x32xf32>
    %376 = arith.addf %372, %375 : vector<16x32xf32>
    %377 = arith.addf %224, %376 : vector<16x32xf32>
    %c0_177 = arith.constant 0 : index
    %c9 = arith.constant 9 : index
    %c0_178 = arith.constant 0 : index
    %c0_179 = arith.constant 0 : index
    %378 = vector.load %arg6[%c0_177, %c9, %c0_178, %c0_179] : memref<2x13x1x32xf32, #tpu.memory_space<vmem>>, vector<1x1x1x32xf32>
    %379 = vector.shape_cast %378 : vector<1x1x1x32xf32> to vector<1x32xf32>
    %c0_180 = arith.constant 0 : index
    %c10 = arith.constant 10 : index
    %c0_181 = arith.constant 0 : index
    %c0_182 = arith.constant 0 : index
    %380 = vector.load %arg6[%c0_180, %c10, %c0_181, %c0_182] : memref<2x13x1x32xf32, #tpu.memory_space<vmem>>, vector<1x1x1x32xf32>
    %381 = vector.shape_cast %380 : vector<1x1x1x32xf32> to vector<1x32xf32>
    %cst_183 = arith.constant dense<0.000000e+00> : vector<16xf32>
    %382 = vector.multi_reduction <add>, %377, %cst_183 [1] : vector<16x32xf32> to vector<16xf32>
    %383 = vector.shape_cast %382 : vector<16xf32> to vector<16x1xf32>
    %cst_184 = arith.constant 3.200000e+01 : f32
    %384 = vector.broadcast %cst_184 : f32 to vector<16x1xf32>
    %385 = arith.divf %383, %384 : vector<16x1xf32>
    %386 = vector.broadcast %385 : vector<16x1xf32> to vector<16x32xf32>
    %387 = arith.subf %377, %386 : vector<16x32xf32>
    %388 = arith.mulf %387, %387 : vector<16x32xf32>
    %cst_185 = arith.constant dense<0.000000e+00> : vector<16xf32>
    %389 = vector.multi_reduction <add>, %388, %cst_185 [1] : vector<16x32xf32> to vector<16xf32>
    %390 = vector.shape_cast %389 : vector<16xf32> to vector<16x1xf32>
    %cst_186 = arith.constant 3.200000e+01 : f32
    %391 = vector.broadcast %cst_186 : f32 to vector<16x1xf32>
    %392 = arith.divf %390, %391 : vector<16x1xf32>
    %393 = vector.broadcast %385 : vector<16x1xf32> to vector<16x32xf32>
    %394 = arith.subf %377, %393 : vector<16x32xf32>
    %cst_187 = arith.constant 9.99999974E-6 : f32
    %395 = vector.broadcast %cst_187 : f32 to vector<16x1xf32>
    %396 = arith.addf %392, %395 : vector<16x1xf32>
    %397 = math.rsqrt %396 : vector<16x1xf32>
    %398 = vector.broadcast %397 : vector<16x1xf32> to vector<16x32xf32>
    %399 = arith.mulf %394, %398 : vector<16x32xf32>
    %400 = vector.broadcast %379 : vector<1x32xf32> to vector<16x32xf32>
    %401 = arith.mulf %399, %400 : vector<16x32xf32>
    %402 = vector.broadcast %381 : vector<1x32xf32> to vector<16x32xf32>
    %403 = arith.addf %401, %402 : vector<16x32xf32>
    %c0_188 = arith.constant 0 : index
    %c1_189 = arith.constant 1 : index
    %c0_190 = arith.constant 0 : index
    %c0_191 = arith.constant 0 : index
    %404 = vector.load %arg2[%c0_188, %c1_189, %c0_190, %c0_191] : memref<2x2x32x64xf32, #tpu.memory_space<vmem>>, vector<1x1x32x64xf32>
    %405 = vector.shape_cast %404 : vector<1x1x32x64xf32> to vector<32x64xf32>
    %cst_192 = arith.constant dense<0.000000e+00> : vector<16x64xf32>
    %406 = tpu.matmul %403, %405, %cst_192 {dimension_numbers = #tpu.dot_dimension_numbers<[1], [0], [0], [1], [0, 0, 1, 1], [], []>} : vector<16x32xf32>, vector<32x64xf32>, vector<16x64xf32> -> vector<16x64xf32>
    %c0_193 = arith.constant 0 : index
    %c1_194 = arith.constant 1 : index
    %c0_195 = arith.constant 0 : index
    %c0_196 = arith.constant 0 : index
    %407 = vector.load %arg5[%c0_193, %c1_194, %c0_195, %c0_196] : memref<2x2x1x64xf32, #tpu.memory_space<vmem>>, vector<1x1x1x64xf32>
    %408 = vector.shape_cast %407 : vector<1x1x1x64xf32> to vector<1x64xf32>
    %409 = vector.broadcast %408 : vector<1x64xf32> to vector<16x64xf32>
    %410 = arith.addf %406, %409 : vector<16x64xf32>
    %cst_197 = arith.constant 0.000000e+00 : f32
    %411 = vector.broadcast %cst_197 : f32 to vector<16x64xf32>
    %412 = arith.maximumf %410, %411 : vector<16x64xf32>
    %c0_198 = arith.constant 0 : index
    %c0_199 = arith.constant 0 : index
    %c0_200 = arith.constant 0 : index
    %413 = vector.load %arg4[%c0_198, %c0_199, %c0_200] : memref<2x64x32xf32, #tpu.memory_space<vmem>>, vector<1x64x32xf32>
    %414 = vector.shape_cast %413 : vector<1x64x32xf32> to vector<64x32xf32>
    %cst_201 = arith.constant dense<0.000000e+00> : vector<16x32xf32>
    %415 = tpu.matmul %412, %414, %cst_201 {dimension_numbers = #tpu.dot_dimension_numbers<[1], [0], [0], [1], [0, 0, 1, 1], [], []>} : vector<16x64xf32>, vector<64x32xf32>, vector<16x32xf32> -> vector<16x32xf32>
    %c0_202 = arith.constant 0 : index
    %c6 = arith.constant 6 : index
    %c0_203 = arith.constant 0 : index
    %c0_204 = arith.constant 0 : index
    %416 = vector.load %arg6[%c0_202, %c6, %c0_203, %c0_204] : memref<2x13x1x32xf32, #tpu.memory_space<vmem>>, vector<1x1x1x32xf32>
    %417 = vector.shape_cast %416 : vector<1x1x1x32xf32> to vector<1x32xf32>
    %418 = vector.broadcast %417 : vector<1x32xf32> to vector<16x32xf32>
    %419 = arith.addf %415, %418 : vector<16x32xf32>
    %420 = arith.addf %403, %419 : vector<16x32xf32>
    %c0_205 = arith.constant 0 : index
    %c11 = arith.constant 11 : index
    %c0_206 = arith.constant 0 : index
    %c0_207 = arith.constant 0 : index
    %421 = vector.load %arg6[%c0_205, %c11, %c0_206, %c0_207] : memref<2x13x1x32xf32, #tpu.memory_space<vmem>>, vector<1x1x1x32xf32>
    %422 = vector.shape_cast %421 : vector<1x1x1x32xf32> to vector<1x32xf32>
    %c0_208 = arith.constant 0 : index
    %c12 = arith.constant 12 : index
    %c0_209 = arith.constant 0 : index
    %c0_210 = arith.constant 0 : index
    %423 = vector.load %arg6[%c0_208, %c12, %c0_209, %c0_210] : memref<2x13x1x32xf32, #tpu.memory_space<vmem>>, vector<1x1x1x32xf32>
    %424 = vector.shape_cast %423 : vector<1x1x1x32xf32> to vector<1x32xf32>
    %cst_211 = arith.constant dense<0.000000e+00> : vector<16xf32>
    %425 = vector.multi_reduction <add>, %420, %cst_211 [1] : vector<16x32xf32> to vector<16xf32>
    %426 = vector.shape_cast %425 : vector<16xf32> to vector<16x1xf32>
    %cst_212 = arith.constant 3.200000e+01 : f32
    %427 = vector.broadcast %cst_212 : f32 to vector<16x1xf32>
    %428 = arith.divf %426, %427 : vector<16x1xf32>
    %429 = vector.broadcast %428 : vector<16x1xf32> to vector<16x32xf32>
    %430 = arith.subf %420, %429 : vector<16x32xf32>
    %431 = arith.mulf %430, %430 : vector<16x32xf32>
    %cst_213 = arith.constant dense<0.000000e+00> : vector<16xf32>
    %432 = vector.multi_reduction <add>, %431, %cst_213 [1] : vector<16x32xf32> to vector<16xf32>
    %433 = vector.shape_cast %432 : vector<16xf32> to vector<16x1xf32>
    %cst_214 = arith.constant 3.200000e+01 : f32
    %434 = vector.broadcast %cst_214 : f32 to vector<16x1xf32>
    %435 = arith.divf %433, %434 : vector<16x1xf32>
    %436 = vector.broadcast %428 : vector<16x1xf32> to vector<16x32xf32>
    %437 = arith.subf %420, %436 : vector<16x32xf32>
    %cst_215 = arith.constant 9.99999974E-6 : f32
    %438 = vector.broadcast %cst_215 : f32 to vector<16x1xf32>
    %439 = arith.addf %435, %438 : vector<16x1xf32>
    %440 = math.rsqrt %439 : vector<16x1xf32>
    %441 = vector.broadcast %440 : vector<16x1xf32> to vector<16x32xf32>
    %442 = arith.mulf %437, %441 : vector<16x32xf32>
    %443 = vector.broadcast %422 : vector<1x32xf32> to vector<16x32xf32>
    %444 = arith.mulf %442, %443 : vector<16x32xf32>
    %445 = vector.broadcast %424 : vector<1x32xf32> to vector<16x32xf32>
    %446 = arith.addf %444, %445 : vector<16x32xf32>
    %447 = arith.addf %446, %3 : vector<16x32xf32>
    %c1_216 = arith.constant 1 : index
    %c0_217 = arith.constant 0 : index
    %c0_218 = arith.constant 0 : index
    %c0_219 = arith.constant 0 : index
    %448 = vector.load %arg2[%c1_216, %c0_217, %c0_218, %c0_219] : memref<2x2x32x64xf32, #tpu.memory_space<vmem>>, vector<1x1x32x64xf32>
    %449 = vector.shape_cast %448 : vector<1x1x32x64xf32> to vector<32x64xf32>
    %cst_220 = arith.constant dense<0.000000e+00> : vector<16x64xf32>
    %450 = tpu.matmul %447, %449, %cst_220 {dimension_numbers = #tpu.dot_dimension_numbers<[1], [0], [0], [1], [0, 0, 1, 1], [], []>} : vector<16x32xf32>, vector<32x64xf32>, vector<16x64xf32> -> vector<16x64xf32>
    %c1_221 = arith.constant 1 : index
    %c0_222 = arith.constant 0 : index
    %c0_223 = arith.constant 0 : index
    %c0_224 = arith.constant 0 : index
    %451 = vector.load %arg5[%c1_221, %c0_222, %c0_223, %c0_224] : memref<2x2x1x64xf32, #tpu.memory_space<vmem>>, vector<1x1x1x64xf32>
    %452 = vector.shape_cast %451 : vector<1x1x1x64xf32> to vector<1x64xf32>
    %453 = vector.broadcast %452 : vector<1x64xf32> to vector<16x64xf32>
    %454 = arith.addf %450, %453 : vector<16x64xf32>
    %c1_225 = arith.constant 1 : index
    %c0_226 = arith.constant 0 : index
    %c0_227 = arith.constant 0 : index
    %c0_228 = arith.constant 0 : index
    %455 = vector.load %arg3[%c1_225, %c0_226, %c0_227, %c0_228] : memref<2x6x32x32xf32, #tpu.memory_space<vmem>>, vector<1x1x32x32xf32>
    %456 = vector.shape_cast %455 : vector<1x1x32x32xf32> to vector<32x32xf32>
    %cst_229 = arith.constant dense<0.000000e+00> : vector<16x32xf32>
    %457 = tpu.matmul %446, %456, %cst_229 {dimension_numbers = #tpu.dot_dimension_numbers<[1], [0], [0], [1], [0, 0, 1, 1], [], []>} : vector<16x32xf32>, vector<32x32xf32>, vector<16x32xf32> -> vector<16x32xf32>
    %c1_230 = arith.constant 1 : index
    %c0_231 = arith.constant 0 : index
    %c0_232 = arith.constant 0 : index
    %c0_233 = arith.constant 0 : index
    %458 = vector.load %arg6[%c1_230, %c0_231, %c0_232, %c0_233] : memref<2x13x1x32xf32, #tpu.memory_space<vmem>>, vector<1x1x1x32xf32>
    %459 = vector.shape_cast %458 : vector<1x1x1x32xf32> to vector<1x32xf32>
    %460 = vector.broadcast %459 : vector<1x32xf32> to vector<16x32xf32>
    %461 = arith.addf %457, %460 : vector<16x32xf32>
    %462 = vector.extract_strided_slice %454 {offsets = [0, 0], sizes = [16, 32], strides = [1, 1]} : vector<16x64xf32> to vector<16x32xf32>
    %463 = vector.extract_strided_slice %454 {offsets = [0, 32], sizes = [16, 32], strides = [1, 1]} : vector<16x64xf32> to vector<16x32xf32>
    %464 = vector.extract_strided_slice %462 {offsets = [0, 0], sizes = [8, 32], strides = [1, 1]} : vector<16x32xf32> to vector<8x32xf32>
    %465 = vector.extract_strided_slice %463 {offsets = [0, 0], sizes = [8, 32], strides = [1, 1]} : vector<16x32xf32> to vector<8x32xf32>
    %466 = vector.extract_strided_slice %461 {offsets = [0, 0], sizes = [8, 32], strides = [1, 1]} : vector<16x32xf32> to vector<8x32xf32>
    %467 = vector.extract_strided_slice %464 {offsets = [0, 0], sizes = [8, 8], strides = [1, 1]} : vector<8x32xf32> to vector<8x8xf32>
    %468 = vector.extract_strided_slice %465 {offsets = [0, 0], sizes = [8, 8], strides = [1, 1]} : vector<8x32xf32> to vector<8x8xf32>
    %469 = vector.extract_strided_slice %466 {offsets = [0, 0], sizes = [8, 8], strides = [1, 1]} : vector<8x32xf32> to vector<8x8xf32>
    %cst_234 = arith.constant dense<0.000000e+00> : vector<8x8xf32>
    %470 = tpu.matmul %467, %468, %cst_234 {dimension_numbers = #tpu.dot_dimension_numbers<[1], [1], [0], [0], [0, 0, 1, 0], [], []>} : vector<8x8xf32>, vector<8x8xf32>, vector<8x8xf32> -> vector<8x8xf32>
    %cst_235 = arith.constant 0.353553385 : f32
    %471 = vector.broadcast %cst_235 : f32 to vector<8x8xf32>
    %472 = arith.mulf %470, %471 : vector<8x8xf32>
    %cst_236 = arith.constant dense<0xFF800000> : vector<8xf32>
    %473 = vector.multi_reduction <maximumf>, %472, %cst_236 [1] : vector<8x8xf32> to vector<8xf32>
    %474 = vector.shape_cast %473 : vector<8xf32> to vector<8x1xf32>
    %475 = vector.broadcast %474 : vector<8x1xf32> to vector<8x8xf32>
    %476 = arith.subf %472, %475 : vector<8x8xf32>
    %477 = math.exp %476 : vector<8x8xf32>
    %cst_237 = arith.constant dense<0.000000e+00> : vector<8xf32>
    %478 = vector.multi_reduction <add>, %477, %cst_237 [1] : vector<8x8xf32> to vector<8xf32>
    %479 = vector.shape_cast %478 : vector<8xf32> to vector<8x1xf32>
    %480 = vector.broadcast %479 : vector<8x1xf32> to vector<8x8xf32>
    %481 = arith.divf %477, %480 : vector<8x8xf32>
    %cst_238 = arith.constant dense<0.000000e+00> : vector<8x8xf32>
    %482 = tpu.matmul %481, %469, %cst_238 {dimension_numbers = #tpu.dot_dimension_numbers<[1], [0], [0], [1], [0, 0, 1, 1], [], []>} : vector<8x8xf32>, vector<8x8xf32>, vector<8x8xf32> -> vector<8x8xf32>
    %483 = vector.extract_strided_slice %464 {offsets = [0, 8], sizes = [8, 8], strides = [1, 1]} : vector<8x32xf32> to vector<8x8xf32>
    %484 = vector.extract_strided_slice %465 {offsets = [0, 8], sizes = [8, 8], strides = [1, 1]} : vector<8x32xf32> to vector<8x8xf32>
    %485 = vector.extract_strided_slice %466 {offsets = [0, 8], sizes = [8, 8], strides = [1, 1]} : vector<8x32xf32> to vector<8x8xf32>
    %cst_239 = arith.constant dense<0.000000e+00> : vector<8x8xf32>
    %486 = tpu.matmul %483, %484, %cst_239 {dimension_numbers = #tpu.dot_dimension_numbers<[1], [1], [0], [0], [0, 0, 1, 0], [], []>} : vector<8x8xf32>, vector<8x8xf32>, vector<8x8xf32> -> vector<8x8xf32>
    %cst_240 = arith.constant 0.353553385 : f32
    %487 = vector.broadcast %cst_240 : f32 to vector<8x8xf32>
    %488 = arith.mulf %486, %487 : vector<8x8xf32>
    %cst_241 = arith.constant dense<0xFF800000> : vector<8xf32>
    %489 = vector.multi_reduction <maximumf>, %488, %cst_241 [1] : vector<8x8xf32> to vector<8xf32>
    %490 = vector.shape_cast %489 : vector<8xf32> to vector<8x1xf32>
    %491 = vector.broadcast %490 : vector<8x1xf32> to vector<8x8xf32>
    %492 = arith.subf %488, %491 : vector<8x8xf32>
    %493 = math.exp %492 : vector<8x8xf32>
    %cst_242 = arith.constant dense<0.000000e+00> : vector<8xf32>
    %494 = vector.multi_reduction <add>, %493, %cst_242 [1] : vector<8x8xf32> to vector<8xf32>
    %495 = vector.shape_cast %494 : vector<8xf32> to vector<8x1xf32>
    %496 = vector.broadcast %495 : vector<8x1xf32> to vector<8x8xf32>
    %497 = arith.divf %493, %496 : vector<8x8xf32>
    %cst_243 = arith.constant dense<0.000000e+00> : vector<8x8xf32>
    %498 = tpu.matmul %497, %485, %cst_243 {dimension_numbers = #tpu.dot_dimension_numbers<[1], [0], [0], [1], [0, 0, 1, 1], [], []>} : vector<8x8xf32>, vector<8x8xf32>, vector<8x8xf32> -> vector<8x8xf32>
    %499 = vector.extract_strided_slice %464 {offsets = [0, 16], sizes = [8, 8], strides = [1, 1]} : vector<8x32xf32> to vector<8x8xf32>
    %500 = vector.extract_strided_slice %465 {offsets = [0, 16], sizes = [8, 8], strides = [1, 1]} : vector<8x32xf32> to vector<8x8xf32>
    %501 = vector.extract_strided_slice %466 {offsets = [0, 16], sizes = [8, 8], strides = [1, 1]} : vector<8x32xf32> to vector<8x8xf32>
    %cst_244 = arith.constant dense<0.000000e+00> : vector<8x8xf32>
    %502 = tpu.matmul %499, %500, %cst_244 {dimension_numbers = #tpu.dot_dimension_numbers<[1], [1], [0], [0], [0, 0, 1, 0], [], []>} : vector<8x8xf32>, vector<8x8xf32>, vector<8x8xf32> -> vector<8x8xf32>
    %cst_245 = arith.constant 0.353553385 : f32
    %503 = vector.broadcast %cst_245 : f32 to vector<8x8xf32>
    %504 = arith.mulf %502, %503 : vector<8x8xf32>
    %cst_246 = arith.constant dense<0xFF800000> : vector<8xf32>
    %505 = vector.multi_reduction <maximumf>, %504, %cst_246 [1] : vector<8x8xf32> to vector<8xf32>
    %506 = vector.shape_cast %505 : vector<8xf32> to vector<8x1xf32>
    %507 = vector.broadcast %506 : vector<8x1xf32> to vector<8x8xf32>
    %508 = arith.subf %504, %507 : vector<8x8xf32>
    %509 = math.exp %508 : vector<8x8xf32>
    %cst_247 = arith.constant dense<0.000000e+00> : vector<8xf32>
    %510 = vector.multi_reduction <add>, %509, %cst_247 [1] : vector<8x8xf32> to vector<8xf32>
    %511 = vector.shape_cast %510 : vector<8xf32> to vector<8x1xf32>
    %512 = vector.broadcast %511 : vector<8x1xf32> to vector<8x8xf32>
    %513 = arith.divf %509, %512 : vector<8x8xf32>
    %cst_248 = arith.constant dense<0.000000e+00> : vector<8x8xf32>
    %514 = tpu.matmul %513, %501, %cst_248 {dimension_numbers = #tpu.dot_dimension_numbers<[1], [0], [0], [1], [0, 0, 1, 1], [], []>} : vector<8x8xf32>, vector<8x8xf32>, vector<8x8xf32> -> vector<8x8xf32>
    %515 = vector.extract_strided_slice %464 {offsets = [0, 24], sizes = [8, 8], strides = [1, 1]} : vector<8x32xf32> to vector<8x8xf32>
    %516 = vector.extract_strided_slice %465 {offsets = [0, 24], sizes = [8, 8], strides = [1, 1]} : vector<8x32xf32> to vector<8x8xf32>
    %517 = vector.extract_strided_slice %466 {offsets = [0, 24], sizes = [8, 8], strides = [1, 1]} : vector<8x32xf32> to vector<8x8xf32>
    %cst_249 = arith.constant dense<0.000000e+00> : vector<8x8xf32>
    %518 = tpu.matmul %515, %516, %cst_249 {dimension_numbers = #tpu.dot_dimension_numbers<[1], [1], [0], [0], [0, 0, 1, 0], [], []>} : vector<8x8xf32>, vector<8x8xf32>, vector<8x8xf32> -> vector<8x8xf32>
    %cst_250 = arith.constant 0.353553385 : f32
    %519 = vector.broadcast %cst_250 : f32 to vector<8x8xf32>
    %520 = arith.mulf %518, %519 : vector<8x8xf32>
    %cst_251 = arith.constant dense<0xFF800000> : vector<8xf32>
    %521 = vector.multi_reduction <maximumf>, %520, %cst_251 [1] : vector<8x8xf32> to vector<8xf32>
    %522 = vector.shape_cast %521 : vector<8xf32> to vector<8x1xf32>
    %523 = vector.broadcast %522 : vector<8x1xf32> to vector<8x8xf32>
    %524 = arith.subf %520, %523 : vector<8x8xf32>
    %525 = math.exp %524 : vector<8x8xf32>
    %cst_252 = arith.constant dense<0.000000e+00> : vector<8xf32>
    %526 = vector.multi_reduction <add>, %525, %cst_252 [1] : vector<8x8xf32> to vector<8xf32>
    %527 = vector.shape_cast %526 : vector<8xf32> to vector<8x1xf32>
    %528 = vector.broadcast %527 : vector<8x1xf32> to vector<8x8xf32>
    %529 = arith.divf %525, %528 : vector<8x8xf32>
    %cst_253 = arith.constant dense<0.000000e+00> : vector<8x8xf32>
    %530 = tpu.matmul %529, %517, %cst_253 {dimension_numbers = #tpu.dot_dimension_numbers<[1], [0], [0], [1], [0, 0, 1, 1], [], []>} : vector<8x8xf32>, vector<8x8xf32>, vector<8x8xf32> -> vector<8x8xf32>
    %531 = tpu.concatenate %482, %498, %514, %530 in 1 : vector<8x8xf32>, vector<8x8xf32>, vector<8x8xf32>, vector<8x8xf32> -> vector<8x32xf32>
    %532 = vector.extract_strided_slice %462 {offsets = [8, 0], sizes = [8, 32], strides = [1, 1]} : vector<16x32xf32> to vector<8x32xf32>
    %533 = vector.extract_strided_slice %463 {offsets = [8, 0], sizes = [8, 32], strides = [1, 1]} : vector<16x32xf32> to vector<8x32xf32>
    %534 = vector.extract_strided_slice %461 {offsets = [8, 0], sizes = [8, 32], strides = [1, 1]} : vector<16x32xf32> to vector<8x32xf32>
    %535 = vector.extract_strided_slice %532 {offsets = [0, 0], sizes = [8, 8], strides = [1, 1]} : vector<8x32xf32> to vector<8x8xf32>
    %536 = vector.extract_strided_slice %533 {offsets = [0, 0], sizes = [8, 8], strides = [1, 1]} : vector<8x32xf32> to vector<8x8xf32>
    %537 = vector.extract_strided_slice %534 {offsets = [0, 0], sizes = [8, 8], strides = [1, 1]} : vector<8x32xf32> to vector<8x8xf32>
    %cst_254 = arith.constant dense<0.000000e+00> : vector<8x8xf32>
    %538 = tpu.matmul %535, %536, %cst_254 {dimension_numbers = #tpu.dot_dimension_numbers<[1], [1], [0], [0], [0, 0, 1, 0], [], []>} : vector<8x8xf32>, vector<8x8xf32>, vector<8x8xf32> -> vector<8x8xf32>
    %cst_255 = arith.constant 0.353553385 : f32
    %539 = vector.broadcast %cst_255 : f32 to vector<8x8xf32>
    %540 = arith.mulf %538, %539 : vector<8x8xf32>
    %cst_256 = arith.constant dense<0xFF800000> : vector<8xf32>
    %541 = vector.multi_reduction <maximumf>, %540, %cst_256 [1] : vector<8x8xf32> to vector<8xf32>
    %542 = vector.shape_cast %541 : vector<8xf32> to vector<8x1xf32>
    %543 = vector.broadcast %542 : vector<8x1xf32> to vector<8x8xf32>
    %544 = arith.subf %540, %543 : vector<8x8xf32>
    %545 = math.exp %544 : vector<8x8xf32>
    %cst_257 = arith.constant dense<0.000000e+00> : vector<8xf32>
    %546 = vector.multi_reduction <add>, %545, %cst_257 [1] : vector<8x8xf32> to vector<8xf32>
    %547 = vector.shape_cast %546 : vector<8xf32> to vector<8x1xf32>
    %548 = vector.broadcast %547 : vector<8x1xf32> to vector<8x8xf32>
    %549 = arith.divf %545, %548 : vector<8x8xf32>
    %cst_258 = arith.constant dense<0.000000e+00> : vector<8x8xf32>
    %550 = tpu.matmul %549, %537, %cst_258 {dimension_numbers = #tpu.dot_dimension_numbers<[1], [0], [0], [1], [0, 0, 1, 1], [], []>} : vector<8x8xf32>, vector<8x8xf32>, vector<8x8xf32> -> vector<8x8xf32>
    %551 = vector.extract_strided_slice %532 {offsets = [0, 8], sizes = [8, 8], strides = [1, 1]} : vector<8x32xf32> to vector<8x8xf32>
    %552 = vector.extract_strided_slice %533 {offsets = [0, 8], sizes = [8, 8], strides = [1, 1]} : vector<8x32xf32> to vector<8x8xf32>
    %553 = vector.extract_strided_slice %534 {offsets = [0, 8], sizes = [8, 8], strides = [1, 1]} : vector<8x32xf32> to vector<8x8xf32>
    %cst_259 = arith.constant dense<0.000000e+00> : vector<8x8xf32>
    %554 = tpu.matmul %551, %552, %cst_259 {dimension_numbers = #tpu.dot_dimension_numbers<[1], [1], [0], [0], [0, 0, 1, 0], [], []>} : vector<8x8xf32>, vector<8x8xf32>, vector<8x8xf32> -> vector<8x8xf32>
    %cst_260 = arith.constant 0.353553385 : f32
    %555 = vector.broadcast %cst_260 : f32 to vector<8x8xf32>
    %556 = arith.mulf %554, %555 : vector<8x8xf32>
    %cst_261 = arith.constant dense<0xFF800000> : vector<8xf32>
    %557 = vector.multi_reduction <maximumf>, %556, %cst_261 [1] : vector<8x8xf32> to vector<8xf32>
    %558 = vector.shape_cast %557 : vector<8xf32> to vector<8x1xf32>
    %559 = vector.broadcast %558 : vector<8x1xf32> to vector<8x8xf32>
    %560 = arith.subf %556, %559 : vector<8x8xf32>
    %561 = math.exp %560 : vector<8x8xf32>
    %cst_262 = arith.constant dense<0.000000e+00> : vector<8xf32>
    %562 = vector.multi_reduction <add>, %561, %cst_262 [1] : vector<8x8xf32> to vector<8xf32>
    %563 = vector.shape_cast %562 : vector<8xf32> to vector<8x1xf32>
    %564 = vector.broadcast %563 : vector<8x1xf32> to vector<8x8xf32>
    %565 = arith.divf %561, %564 : vector<8x8xf32>
    %cst_263 = arith.constant dense<0.000000e+00> : vector<8x8xf32>
    %566 = tpu.matmul %565, %553, %cst_263 {dimension_numbers = #tpu.dot_dimension_numbers<[1], [0], [0], [1], [0, 0, 1, 1], [], []>} : vector<8x8xf32>, vector<8x8xf32>, vector<8x8xf32> -> vector<8x8xf32>
    %567 = vector.extract_strided_slice %532 {offsets = [0, 16], sizes = [8, 8], strides = [1, 1]} : vector<8x32xf32> to vector<8x8xf32>
    %568 = vector.extract_strided_slice %533 {offsets = [0, 16], sizes = [8, 8], strides = [1, 1]} : vector<8x32xf32> to vector<8x8xf32>
    %569 = vector.extract_strided_slice %534 {offsets = [0, 16], sizes = [8, 8], strides = [1, 1]} : vector<8x32xf32> to vector<8x8xf32>
    %cst_264 = arith.constant dense<0.000000e+00> : vector<8x8xf32>
    %570 = tpu.matmul %567, %568, %cst_264 {dimension_numbers = #tpu.dot_dimension_numbers<[1], [1], [0], [0], [0, 0, 1, 0], [], []>} : vector<8x8xf32>, vector<8x8xf32>, vector<8x8xf32> -> vector<8x8xf32>
    %cst_265 = arith.constant 0.353553385 : f32
    %571 = vector.broadcast %cst_265 : f32 to vector<8x8xf32>
    %572 = arith.mulf %570, %571 : vector<8x8xf32>
    %cst_266 = arith.constant dense<0xFF800000> : vector<8xf32>
    %573 = vector.multi_reduction <maximumf>, %572, %cst_266 [1] : vector<8x8xf32> to vector<8xf32>
    %574 = vector.shape_cast %573 : vector<8xf32> to vector<8x1xf32>
    %575 = vector.broadcast %574 : vector<8x1xf32> to vector<8x8xf32>
    %576 = arith.subf %572, %575 : vector<8x8xf32>
    %577 = math.exp %576 : vector<8x8xf32>
    %cst_267 = arith.constant dense<0.000000e+00> : vector<8xf32>
    %578 = vector.multi_reduction <add>, %577, %cst_267 [1] : vector<8x8xf32> to vector<8xf32>
    %579 = vector.shape_cast %578 : vector<8xf32> to vector<8x1xf32>
    %580 = vector.broadcast %579 : vector<8x1xf32> to vector<8x8xf32>
    %581 = arith.divf %577, %580 : vector<8x8xf32>
    %cst_268 = arith.constant dense<0.000000e+00> : vector<8x8xf32>
    %582 = tpu.matmul %581, %569, %cst_268 {dimension_numbers = #tpu.dot_dimension_numbers<[1], [0], [0], [1], [0, 0, 1, 1], [], []>} : vector<8x8xf32>, vector<8x8xf32>, vector<8x8xf32> -> vector<8x8xf32>
    %583 = vector.extract_strided_slice %532 {offsets = [0, 24], sizes = [8, 8], strides = [1, 1]} : vector<8x32xf32> to vector<8x8xf32>
    %584 = vector.extract_strided_slice %533 {offsets = [0, 24], sizes = [8, 8], strides = [1, 1]} : vector<8x32xf32> to vector<8x8xf32>
    %585 = vector.extract_strided_slice %534 {offsets = [0, 24], sizes = [8, 8], strides = [1, 1]} : vector<8x32xf32> to vector<8x8xf32>
    %cst_269 = arith.constant dense<0.000000e+00> : vector<8x8xf32>
    %586 = tpu.matmul %583, %584, %cst_269 {dimension_numbers = #tpu.dot_dimension_numbers<[1], [1], [0], [0], [0, 0, 1, 0], [], []>} : vector<8x8xf32>, vector<8x8xf32>, vector<8x8xf32> -> vector<8x8xf32>
    %cst_270 = arith.constant 0.353553385 : f32
    %587 = vector.broadcast %cst_270 : f32 to vector<8x8xf32>
    %588 = arith.mulf %586, %587 : vector<8x8xf32>
    %cst_271 = arith.constant dense<0xFF800000> : vector<8xf32>
    %589 = vector.multi_reduction <maximumf>, %588, %cst_271 [1] : vector<8x8xf32> to vector<8xf32>
    %590 = vector.shape_cast %589 : vector<8xf32> to vector<8x1xf32>
    %591 = vector.broadcast %590 : vector<8x1xf32> to vector<8x8xf32>
    %592 = arith.subf %588, %591 : vector<8x8xf32>
    %593 = math.exp %592 : vector<8x8xf32>
    %cst_272 = arith.constant dense<0.000000e+00> : vector<8xf32>
    %594 = vector.multi_reduction <add>, %593, %cst_272 [1] : vector<8x8xf32> to vector<8xf32>
    %595 = vector.shape_cast %594 : vector<8xf32> to vector<8x1xf32>
    %596 = vector.broadcast %595 : vector<8x1xf32> to vector<8x8xf32>
    %597 = arith.divf %593, %596 : vector<8x8xf32>
    %cst_273 = arith.constant dense<0.000000e+00> : vector<8x8xf32>
    %598 = tpu.matmul %597, %585, %cst_273 {dimension_numbers = #tpu.dot_dimension_numbers<[1], [0], [0], [1], [0, 0, 1, 1], [], []>} : vector<8x8xf32>, vector<8x8xf32>, vector<8x8xf32> -> vector<8x8xf32>
    %599 = tpu.concatenate %550, %566, %582, %598 in 1 : vector<8x8xf32>, vector<8x8xf32>, vector<8x8xf32>, vector<8x8xf32> -> vector<8x32xf32>
    %600 = tpu.concatenate %531, %599 in 0 : vector<8x32xf32>, vector<8x32xf32> -> vector<16x32xf32>
    %c1_274 = arith.constant 1 : index
    %c1_275 = arith.constant 1 : index
    %c0_276 = arith.constant 0 : index
    %c0_277 = arith.constant 0 : index
    %601 = vector.load %arg3[%c1_274, %c1_275, %c0_276, %c0_277] : memref<2x6x32x32xf32, #tpu.memory_space<vmem>>, vector<1x1x32x32xf32>
    %602 = vector.shape_cast %601 : vector<1x1x32x32xf32> to vector<32x32xf32>
    %cst_278 = arith.constant dense<0.000000e+00> : vector<16x32xf32>
    %603 = tpu.matmul %600, %602, %cst_278 {dimension_numbers = #tpu.dot_dimension_numbers<[1], [0], [0], [1], [0, 0, 1, 1], [], []>} : vector<16x32xf32>, vector<32x32xf32>, vector<16x32xf32> -> vector<16x32xf32>
    %c1_279 = arith.constant 1 : index
    %c1_280 = arith.constant 1 : index
    %c0_281 = arith.constant 0 : index
    %c0_282 = arith.constant 0 : index
    %604 = vector.load %arg6[%c1_279, %c1_280, %c0_281, %c0_282] : memref<2x13x1x32xf32, #tpu.memory_space<vmem>>, vector<1x1x1x32xf32>
    %605 = vector.shape_cast %604 : vector<1x1x1x32xf32> to vector<1x32xf32>
    %606 = vector.broadcast %605 : vector<1x32xf32> to vector<16x32xf32>
    %607 = arith.addf %603, %606 : vector<16x32xf32>
    %608 = arith.addf %446, %607 : vector<16x32xf32>
    %c1_283 = arith.constant 1 : index
    %c7_284 = arith.constant 7 : index
    %c0_285 = arith.constant 0 : index
    %c0_286 = arith.constant 0 : index
    %609 = vector.load %arg6[%c1_283, %c7_284, %c0_285, %c0_286] : memref<2x13x1x32xf32, #tpu.memory_space<vmem>>, vector<1x1x1x32xf32>
    %610 = vector.shape_cast %609 : vector<1x1x1x32xf32> to vector<1x32xf32>
    %c1_287 = arith.constant 1 : index
    %c8_288 = arith.constant 8 : index
    %c0_289 = arith.constant 0 : index
    %c0_290 = arith.constant 0 : index
    %611 = vector.load %arg6[%c1_287, %c8_288, %c0_289, %c0_290] : memref<2x13x1x32xf32, #tpu.memory_space<vmem>>, vector<1x1x1x32xf32>
    %612 = vector.shape_cast %611 : vector<1x1x1x32xf32> to vector<1x32xf32>
    %cst_291 = arith.constant dense<0.000000e+00> : vector<16xf32>
    %613 = vector.multi_reduction <add>, %608, %cst_291 [1] : vector<16x32xf32> to vector<16xf32>
    %614 = vector.shape_cast %613 : vector<16xf32> to vector<16x1xf32>
    %cst_292 = arith.constant 3.200000e+01 : f32
    %615 = vector.broadcast %cst_292 : f32 to vector<16x1xf32>
    %616 = arith.divf %614, %615 : vector<16x1xf32>
    %617 = vector.broadcast %616 : vector<16x1xf32> to vector<16x32xf32>
    %618 = arith.subf %608, %617 : vector<16x32xf32>
    %619 = arith.mulf %618, %618 : vector<16x32xf32>
    %cst_293 = arith.constant dense<0.000000e+00> : vector<16xf32>
    %620 = vector.multi_reduction <add>, %619, %cst_293 [1] : vector<16x32xf32> to vector<16xf32>
    %621 = vector.shape_cast %620 : vector<16xf32> to vector<16x1xf32>
    %cst_294 = arith.constant 3.200000e+01 : f32
    %622 = vector.broadcast %cst_294 : f32 to vector<16x1xf32>
    %623 = arith.divf %621, %622 : vector<16x1xf32>
    %624 = vector.broadcast %616 : vector<16x1xf32> to vector<16x32xf32>
    %625 = arith.subf %608, %624 : vector<16x32xf32>
    %cst_295 = arith.constant 9.99999974E-6 : f32
    %626 = vector.broadcast %cst_295 : f32 to vector<16x1xf32>
    %627 = arith.addf %623, %626 : vector<16x1xf32>
    %628 = math.rsqrt %627 : vector<16x1xf32>
    %629 = vector.broadcast %628 : vector<16x1xf32> to vector<16x32xf32>
    %630 = arith.mulf %625, %629 : vector<16x32xf32>
    %631 = vector.broadcast %610 : vector<1x32xf32> to vector<16x32xf32>
    %632 = arith.mulf %630, %631 : vector<16x32xf32>
    %633 = vector.broadcast %612 : vector<1x32xf32> to vector<16x32xf32>
    %634 = arith.addf %632, %633 : vector<16x32xf32>
    %635 = arith.addf %634, %3 : vector<16x32xf32>
    %c1_296 = arith.constant 1 : index
    %c2_297 = arith.constant 2 : index
    %c0_298 = arith.constant 0 : index
    %c0_299 = arith.constant 0 : index
    %636 = vector.load %arg3[%c1_296, %c2_297, %c0_298, %c0_299] : memref<2x6x32x32xf32, #tpu.memory_space<vmem>>, vector<1x1x32x32xf32>
    %637 = vector.shape_cast %636 : vector<1x1x32x32xf32> to vector<32x32xf32>
    %cst_300 = arith.constant dense<0.000000e+00> : vector<16x32xf32>
    %638 = tpu.matmul %635, %637, %cst_300 {dimension_numbers = #tpu.dot_dimension_numbers<[1], [0], [0], [1], [0, 0, 1, 1], [], []>} : vector<16x32xf32>, vector<32x32xf32>, vector<16x32xf32> -> vector<16x32xf32>
    %c1_301 = arith.constant 1 : index
    %c2_302 = arith.constant 2 : index
    %c0_303 = arith.constant 0 : index
    %c0_304 = arith.constant 0 : index
    %639 = vector.load %arg6[%c1_301, %c2_302, %c0_303, %c0_304] : memref<2x13x1x32xf32, #tpu.memory_space<vmem>>, vector<1x1x1x32xf32>
    %640 = vector.shape_cast %639 : vector<1x1x1x32xf32> to vector<1x32xf32>
    %641 = vector.broadcast %640 : vector<1x32xf32> to vector<16x32xf32>
    %642 = arith.addf %638, %641 : vector<16x32xf32>
    %643 = vector.extract_strided_slice %642 {offsets = [0, 0], sizes = [8, 32], strides = [1, 1]} : vector<16x32xf32> to vector<8x32xf32>
    %644 = vector.extract_strided_slice %29 {offsets = [0, 0], sizes = [16, 32], strides = [1, 1]} : vector<32x32xf32> to vector<16x32xf32>
    %645 = vector.extract_strided_slice %36 {offsets = [0, 0], sizes = [16, 32], strides = [1, 1]} : vector<32x32xf32> to vector<16x32xf32>
    %646 = vector.extract_strided_slice %643 {offsets = [0, 0], sizes = [8, 8], strides = [1, 1]} : vector<8x32xf32> to vector<8x8xf32>
    %647 = vector.extract_strided_slice %644 {offsets = [0, 0], sizes = [16, 8], strides = [1, 1]} : vector<16x32xf32> to vector<16x8xf32>
    %648 = vector.extract_strided_slice %645 {offsets = [0, 0], sizes = [16, 8], strides = [1, 1]} : vector<16x32xf32> to vector<16x8xf32>
    %cst_305 = arith.constant dense<0.000000e+00> : vector<8x16xf32>
    %649 = tpu.matmul %646, %647, %cst_305 {dimension_numbers = #tpu.dot_dimension_numbers<[1], [1], [0], [0], [0, 0, 1, 0], [], []>} : vector<8x8xf32>, vector<16x8xf32>, vector<8x16xf32> -> vector<8x16xf32>
    %cst_306 = arith.constant 0.353553385 : f32
    %650 = vector.broadcast %cst_306 : f32 to vector<8x16xf32>
    %651 = arith.mulf %649, %650 : vector<8x16xf32>
    %cst_307 = arith.constant dense<0xFF800000> : vector<8xf32>
    %652 = vector.multi_reduction <maximumf>, %651, %cst_307 [1] : vector<8x16xf32> to vector<8xf32>
    %653 = vector.shape_cast %652 : vector<8xf32> to vector<8x1xf32>
    %654 = vector.broadcast %653 : vector<8x1xf32> to vector<8x16xf32>
    %655 = arith.subf %651, %654 : vector<8x16xf32>
    %656 = math.exp %655 : vector<8x16xf32>
    %cst_308 = arith.constant dense<0.000000e+00> : vector<8xf32>
    %657 = vector.multi_reduction <add>, %656, %cst_308 [1] : vector<8x16xf32> to vector<8xf32>
    %658 = vector.shape_cast %657 : vector<8xf32> to vector<8x1xf32>
    %659 = vector.broadcast %658 : vector<8x1xf32> to vector<8x16xf32>
    %660 = arith.divf %656, %659 : vector<8x16xf32>
    %cst_309 = arith.constant dense<0.000000e+00> : vector<8x8xf32>
    %661 = tpu.matmul %660, %648, %cst_309 {dimension_numbers = #tpu.dot_dimension_numbers<[1], [0], [0], [1], [0, 0, 1, 1], [], []>} : vector<8x16xf32>, vector<16x8xf32>, vector<8x8xf32> -> vector<8x8xf32>
    %662 = vector.extract_strided_slice %643 {offsets = [0, 8], sizes = [8, 8], strides = [1, 1]} : vector<8x32xf32> to vector<8x8xf32>
    %663 = vector.extract_strided_slice %644 {offsets = [0, 8], sizes = [16, 8], strides = [1, 1]} : vector<16x32xf32> to vector<16x8xf32>
    %664 = vector.extract_strided_slice %645 {offsets = [0, 8], sizes = [16, 8], strides = [1, 1]} : vector<16x32xf32> to vector<16x8xf32>
    %cst_310 = arith.constant dense<0.000000e+00> : vector<8x16xf32>
    %665 = tpu.matmul %662, %663, %cst_310 {dimension_numbers = #tpu.dot_dimension_numbers<[1], [1], [0], [0], [0, 0, 1, 0], [], []>} : vector<8x8xf32>, vector<16x8xf32>, vector<8x16xf32> -> vector<8x16xf32>
    %cst_311 = arith.constant 0.353553385 : f32
    %666 = vector.broadcast %cst_311 : f32 to vector<8x16xf32>
    %667 = arith.mulf %665, %666 : vector<8x16xf32>
    %cst_312 = arith.constant dense<0xFF800000> : vector<8xf32>
    %668 = vector.multi_reduction <maximumf>, %667, %cst_312 [1] : vector<8x16xf32> to vector<8xf32>
    %669 = vector.shape_cast %668 : vector<8xf32> to vector<8x1xf32>
    %670 = vector.broadcast %669 : vector<8x1xf32> to vector<8x16xf32>
    %671 = arith.subf %667, %670 : vector<8x16xf32>
    %672 = math.exp %671 : vector<8x16xf32>
    %cst_313 = arith.constant dense<0.000000e+00> : vector<8xf32>
    %673 = vector.multi_reduction <add>, %672, %cst_313 [1] : vector<8x16xf32> to vector<8xf32>
    %674 = vector.shape_cast %673 : vector<8xf32> to vector<8x1xf32>
    %675 = vector.broadcast %674 : vector<8x1xf32> to vector<8x16xf32>
    %676 = arith.divf %672, %675 : vector<8x16xf32>
    %cst_314 = arith.constant dense<0.000000e+00> : vector<8x8xf32>
    %677 = tpu.matmul %676, %664, %cst_314 {dimension_numbers = #tpu.dot_dimension_numbers<[1], [0], [0], [1], [0, 0, 1, 1], [], []>} : vector<8x16xf32>, vector<16x8xf32>, vector<8x8xf32> -> vector<8x8xf32>
    %678 = vector.extract_strided_slice %643 {offsets = [0, 16], sizes = [8, 8], strides = [1, 1]} : vector<8x32xf32> to vector<8x8xf32>
    %679 = vector.extract_strided_slice %644 {offsets = [0, 16], sizes = [16, 8], strides = [1, 1]} : vector<16x32xf32> to vector<16x8xf32>
    %680 = vector.extract_strided_slice %645 {offsets = [0, 16], sizes = [16, 8], strides = [1, 1]} : vector<16x32xf32> to vector<16x8xf32>
    %cst_315 = arith.constant dense<0.000000e+00> : vector<8x16xf32>
    %681 = tpu.matmul %678, %679, %cst_315 {dimension_numbers = #tpu.dot_dimension_numbers<[1], [1], [0], [0], [0, 0, 1, 0], [], []>} : vector<8x8xf32>, vector<16x8xf32>, vector<8x16xf32> -> vector<8x16xf32>
    %cst_316 = arith.constant 0.353553385 : f32
    %682 = vector.broadcast %cst_316 : f32 to vector<8x16xf32>
    %683 = arith.mulf %681, %682 : vector<8x16xf32>
    %cst_317 = arith.constant dense<0xFF800000> : vector<8xf32>
    %684 = vector.multi_reduction <maximumf>, %683, %cst_317 [1] : vector<8x16xf32> to vector<8xf32>
    %685 = vector.shape_cast %684 : vector<8xf32> to vector<8x1xf32>
    %686 = vector.broadcast %685 : vector<8x1xf32> to vector<8x16xf32>
    %687 = arith.subf %683, %686 : vector<8x16xf32>
    %688 = math.exp %687 : vector<8x16xf32>
    %cst_318 = arith.constant dense<0.000000e+00> : vector<8xf32>
    %689 = vector.multi_reduction <add>, %688, %cst_318 [1] : vector<8x16xf32> to vector<8xf32>
    %690 = vector.shape_cast %689 : vector<8xf32> to vector<8x1xf32>
    %691 = vector.broadcast %690 : vector<8x1xf32> to vector<8x16xf32>
    %692 = arith.divf %688, %691 : vector<8x16xf32>
    %cst_319 = arith.constant dense<0.000000e+00> : vector<8x8xf32>
    %693 = tpu.matmul %692, %680, %cst_319 {dimension_numbers = #tpu.dot_dimension_numbers<[1], [0], [0], [1], [0, 0, 1, 1], [], []>} : vector<8x16xf32>, vector<16x8xf32>, vector<8x8xf32> -> vector<8x8xf32>
    %694 = vector.extract_strided_slice %643 {offsets = [0, 24], sizes = [8, 8], strides = [1, 1]} : vector<8x32xf32> to vector<8x8xf32>
    %695 = vector.extract_strided_slice %644 {offsets = [0, 24], sizes = [16, 8], strides = [1, 1]} : vector<16x32xf32> to vector<16x8xf32>
    %696 = vector.extract_strided_slice %645 {offsets = [0, 24], sizes = [16, 8], strides = [1, 1]} : vector<16x32xf32> to vector<16x8xf32>
    %cst_320 = arith.constant dense<0.000000e+00> : vector<8x16xf32>
    %697 = tpu.matmul %694, %695, %cst_320 {dimension_numbers = #tpu.dot_dimension_numbers<[1], [1], [0], [0], [0, 0, 1, 0], [], []>} : vector<8x8xf32>, vector<16x8xf32>, vector<8x16xf32> -> vector<8x16xf32>
    %cst_321 = arith.constant 0.353553385 : f32
    %698 = vector.broadcast %cst_321 : f32 to vector<8x16xf32>
    %699 = arith.mulf %697, %698 : vector<8x16xf32>
    %cst_322 = arith.constant dense<0xFF800000> : vector<8xf32>
    %700 = vector.multi_reduction <maximumf>, %699, %cst_322 [1] : vector<8x16xf32> to vector<8xf32>
    %701 = vector.shape_cast %700 : vector<8xf32> to vector<8x1xf32>
    %702 = vector.broadcast %701 : vector<8x1xf32> to vector<8x16xf32>
    %703 = arith.subf %699, %702 : vector<8x16xf32>
    %704 = math.exp %703 : vector<8x16xf32>
    %cst_323 = arith.constant dense<0.000000e+00> : vector<8xf32>
    %705 = vector.multi_reduction <add>, %704, %cst_323 [1] : vector<8x16xf32> to vector<8xf32>
    %706 = vector.shape_cast %705 : vector<8xf32> to vector<8x1xf32>
    %707 = vector.broadcast %706 : vector<8x1xf32> to vector<8x16xf32>
    %708 = arith.divf %704, %707 : vector<8x16xf32>
    %cst_324 = arith.constant dense<0.000000e+00> : vector<8x8xf32>
    %709 = tpu.matmul %708, %696, %cst_324 {dimension_numbers = #tpu.dot_dimension_numbers<[1], [0], [0], [1], [0, 0, 1, 1], [], []>} : vector<8x16xf32>, vector<16x8xf32>, vector<8x8xf32> -> vector<8x8xf32>
    %710 = tpu.concatenate %661, %677, %693, %709 in 1 : vector<8x8xf32>, vector<8x8xf32>, vector<8x8xf32>, vector<8x8xf32> -> vector<8x32xf32>
    %711 = vector.extract_strided_slice %642 {offsets = [8, 0], sizes = [8, 32], strides = [1, 1]} : vector<16x32xf32> to vector<8x32xf32>
    %712 = vector.extract_strided_slice %29 {offsets = [16, 0], sizes = [16, 32], strides = [1, 1]} : vector<32x32xf32> to vector<16x32xf32>
    %713 = vector.extract_strided_slice %36 {offsets = [16, 0], sizes = [16, 32], strides = [1, 1]} : vector<32x32xf32> to vector<16x32xf32>
    %714 = vector.extract_strided_slice %711 {offsets = [0, 0], sizes = [8, 8], strides = [1, 1]} : vector<8x32xf32> to vector<8x8xf32>
    %715 = vector.extract_strided_slice %712 {offsets = [0, 0], sizes = [16, 8], strides = [1, 1]} : vector<16x32xf32> to vector<16x8xf32>
    %716 = vector.extract_strided_slice %713 {offsets = [0, 0], sizes = [16, 8], strides = [1, 1]} : vector<16x32xf32> to vector<16x8xf32>
    %cst_325 = arith.constant dense<0.000000e+00> : vector<8x16xf32>
    %717 = tpu.matmul %714, %715, %cst_325 {dimension_numbers = #tpu.dot_dimension_numbers<[1], [1], [0], [0], [0, 0, 1, 0], [], []>} : vector<8x8xf32>, vector<16x8xf32>, vector<8x16xf32> -> vector<8x16xf32>
    %cst_326 = arith.constant 0.353553385 : f32
    %718 = vector.broadcast %cst_326 : f32 to vector<8x16xf32>
    %719 = arith.mulf %717, %718 : vector<8x16xf32>
    %cst_327 = arith.constant dense<0xFF800000> : vector<8xf32>
    %720 = vector.multi_reduction <maximumf>, %719, %cst_327 [1] : vector<8x16xf32> to vector<8xf32>
    %721 = vector.shape_cast %720 : vector<8xf32> to vector<8x1xf32>
    %722 = vector.broadcast %721 : vector<8x1xf32> to vector<8x16xf32>
    %723 = arith.subf %719, %722 : vector<8x16xf32>
    %724 = math.exp %723 : vector<8x16xf32>
    %cst_328 = arith.constant dense<0.000000e+00> : vector<8xf32>
    %725 = vector.multi_reduction <add>, %724, %cst_328 [1] : vector<8x16xf32> to vector<8xf32>
    %726 = vector.shape_cast %725 : vector<8xf32> to vector<8x1xf32>
    %727 = vector.broadcast %726 : vector<8x1xf32> to vector<8x16xf32>
    %728 = arith.divf %724, %727 : vector<8x16xf32>
    %cst_329 = arith.constant dense<0.000000e+00> : vector<8x8xf32>
    %729 = tpu.matmul %728, %716, %cst_329 {dimension_numbers = #tpu.dot_dimension_numbers<[1], [0], [0], [1], [0, 0, 1, 1], [], []>} : vector<8x16xf32>, vector<16x8xf32>, vector<8x8xf32> -> vector<8x8xf32>
    %730 = vector.extract_strided_slice %711 {offsets = [0, 8], sizes = [8, 8], strides = [1, 1]} : vector<8x32xf32> to vector<8x8xf32>
    %731 = vector.extract_strided_slice %712 {offsets = [0, 8], sizes = [16, 8], strides = [1, 1]} : vector<16x32xf32> to vector<16x8xf32>
    %732 = vector.extract_strided_slice %713 {offsets = [0, 8], sizes = [16, 8], strides = [1, 1]} : vector<16x32xf32> to vector<16x8xf32>
    %cst_330 = arith.constant dense<0.000000e+00> : vector<8x16xf32>
    %733 = tpu.matmul %730, %731, %cst_330 {dimension_numbers = #tpu.dot_dimension_numbers<[1], [1], [0], [0], [0, 0, 1, 0], [], []>} : vector<8x8xf32>, vector<16x8xf32>, vector<8x16xf32> -> vector<8x16xf32>
    %cst_331 = arith.constant 0.353553385 : f32
    %734 = vector.broadcast %cst_331 : f32 to vector<8x16xf32>
    %735 = arith.mulf %733, %734 : vector<8x16xf32>
    %cst_332 = arith.constant dense<0xFF800000> : vector<8xf32>
    %736 = vector.multi_reduction <maximumf>, %735, %cst_332 [1] : vector<8x16xf32> to vector<8xf32>
    %737 = vector.shape_cast %736 : vector<8xf32> to vector<8x1xf32>
    %738 = vector.broadcast %737 : vector<8x1xf32> to vector<8x16xf32>
    %739 = arith.subf %735, %738 : vector<8x16xf32>
    %740 = math.exp %739 : vector<8x16xf32>
    %cst_333 = arith.constant dense<0.000000e+00> : vector<8xf32>
    %741 = vector.multi_reduction <add>, %740, %cst_333 [1] : vector<8x16xf32> to vector<8xf32>
    %742 = vector.shape_cast %741 : vector<8xf32> to vector<8x1xf32>
    %743 = vector.broadcast %742 : vector<8x1xf32> to vector<8x16xf32>
    %744 = arith.divf %740, %743 : vector<8x16xf32>
    %cst_334 = arith.constant dense<0.000000e+00> : vector<8x8xf32>
    %745 = tpu.matmul %744, %732, %cst_334 {dimension_numbers = #tpu.dot_dimension_numbers<[1], [0], [0], [1], [0, 0, 1, 1], [], []>} : vector<8x16xf32>, vector<16x8xf32>, vector<8x8xf32> -> vector<8x8xf32>
    %746 = vector.extract_strided_slice %711 {offsets = [0, 16], sizes = [8, 8], strides = [1, 1]} : vector<8x32xf32> to vector<8x8xf32>
    %747 = vector.extract_strided_slice %712 {offsets = [0, 16], sizes = [16, 8], strides = [1, 1]} : vector<16x32xf32> to vector<16x8xf32>
    %748 = vector.extract_strided_slice %713 {offsets = [0, 16], sizes = [16, 8], strides = [1, 1]} : vector<16x32xf32> to vector<16x8xf32>
    %cst_335 = arith.constant dense<0.000000e+00> : vector<8x16xf32>
    %749 = tpu.matmul %746, %747, %cst_335 {dimension_numbers = #tpu.dot_dimension_numbers<[1], [1], [0], [0], [0, 0, 1, 0], [], []>} : vector<8x8xf32>, vector<16x8xf32>, vector<8x16xf32> -> vector<8x16xf32>
    %cst_336 = arith.constant 0.353553385 : f32
    %750 = vector.broadcast %cst_336 : f32 to vector<8x16xf32>
    %751 = arith.mulf %749, %750 : vector<8x16xf32>
    %cst_337 = arith.constant dense<0xFF800000> : vector<8xf32>
    %752 = vector.multi_reduction <maximumf>, %751, %cst_337 [1] : vector<8x16xf32> to vector<8xf32>
    %753 = vector.shape_cast %752 : vector<8xf32> to vector<8x1xf32>
    %754 = vector.broadcast %753 : vector<8x1xf32> to vector<8x16xf32>
    %755 = arith.subf %751, %754 : vector<8x16xf32>
    %756 = math.exp %755 : vector<8x16xf32>
    %cst_338 = arith.constant dense<0.000000e+00> : vector<8xf32>
    %757 = vector.multi_reduction <add>, %756, %cst_338 [1] : vector<8x16xf32> to vector<8xf32>
    %758 = vector.shape_cast %757 : vector<8xf32> to vector<8x1xf32>
    %759 = vector.broadcast %758 : vector<8x1xf32> to vector<8x16xf32>
    %760 = arith.divf %756, %759 : vector<8x16xf32>
    %cst_339 = arith.constant dense<0.000000e+00> : vector<8x8xf32>
    %761 = tpu.matmul %760, %748, %cst_339 {dimension_numbers = #tpu.dot_dimension_numbers<[1], [0], [0], [1], [0, 0, 1, 1], [], []>} : vector<8x16xf32>, vector<16x8xf32>, vector<8x8xf32> -> vector<8x8xf32>
    %762 = vector.extract_strided_slice %711 {offsets = [0, 24], sizes = [8, 8], strides = [1, 1]} : vector<8x32xf32> to vector<8x8xf32>
    %763 = vector.extract_strided_slice %712 {offsets = [0, 24], sizes = [16, 8], strides = [1, 1]} : vector<16x32xf32> to vector<16x8xf32>
    %764 = vector.extract_strided_slice %713 {offsets = [0, 24], sizes = [16, 8], strides = [1, 1]} : vector<16x32xf32> to vector<16x8xf32>
    %cst_340 = arith.constant dense<0.000000e+00> : vector<8x16xf32>
    %765 = tpu.matmul %762, %763, %cst_340 {dimension_numbers = #tpu.dot_dimension_numbers<[1], [1], [0], [0], [0, 0, 1, 0], [], []>} : vector<8x8xf32>, vector<16x8xf32>, vector<8x16xf32> -> vector<8x16xf32>
    %cst_341 = arith.constant 0.353553385 : f32
    %766 = vector.broadcast %cst_341 : f32 to vector<8x16xf32>
    %767 = arith.mulf %765, %766 : vector<8x16xf32>
    %cst_342 = arith.constant dense<0xFF800000> : vector<8xf32>
    %768 = vector.multi_reduction <maximumf>, %767, %cst_342 [1] : vector<8x16xf32> to vector<8xf32>
    %769 = vector.shape_cast %768 : vector<8xf32> to vector<8x1xf32>
    %770 = vector.broadcast %769 : vector<8x1xf32> to vector<8x16xf32>
    %771 = arith.subf %767, %770 : vector<8x16xf32>
    %772 = math.exp %771 : vector<8x16xf32>
    %cst_343 = arith.constant dense<0.000000e+00> : vector<8xf32>
    %773 = vector.multi_reduction <add>, %772, %cst_343 [1] : vector<8x16xf32> to vector<8xf32>
    %774 = vector.shape_cast %773 : vector<8xf32> to vector<8x1xf32>
    %775 = vector.broadcast %774 : vector<8x1xf32> to vector<8x16xf32>
    %776 = arith.divf %772, %775 : vector<8x16xf32>
    %cst_344 = arith.constant dense<0.000000e+00> : vector<8x8xf32>
    %777 = tpu.matmul %776, %764, %cst_344 {dimension_numbers = #tpu.dot_dimension_numbers<[1], [0], [0], [1], [0, 0, 1, 1], [], []>} : vector<8x16xf32>, vector<16x8xf32>, vector<8x8xf32> -> vector<8x8xf32>
    %778 = tpu.concatenate %729, %745, %761, %777 in 1 : vector<8x8xf32>, vector<8x8xf32>, vector<8x8xf32>, vector<8x8xf32> -> vector<8x32xf32>
    %779 = tpu.concatenate %710, %778 in 0 : vector<8x32xf32>, vector<8x32xf32> -> vector<16x32xf32>
    %c1_345 = arith.constant 1 : index
    %c5_346 = arith.constant 5 : index
    %c0_347 = arith.constant 0 : index
    %c0_348 = arith.constant 0 : index
    %780 = vector.load %arg3[%c1_345, %c5_346, %c0_347, %c0_348] : memref<2x6x32x32xf32, #tpu.memory_space<vmem>>, vector<1x1x32x32xf32>
    %781 = vector.shape_cast %780 : vector<1x1x32x32xf32> to vector<32x32xf32>
    %cst_349 = arith.constant dense<0.000000e+00> : vector<16x32xf32>
    %782 = tpu.matmul %779, %781, %cst_349 {dimension_numbers = #tpu.dot_dimension_numbers<[1], [0], [0], [1], [0, 0, 1, 1], [], []>} : vector<16x32xf32>, vector<32x32xf32>, vector<16x32xf32> -> vector<16x32xf32>
    %c1_350 = arith.constant 1 : index
    %c5_351 = arith.constant 5 : index
    %c0_352 = arith.constant 0 : index
    %c0_353 = arith.constant 0 : index
    %783 = vector.load %arg6[%c1_350, %c5_351, %c0_352, %c0_353] : memref<2x13x1x32xf32, #tpu.memory_space<vmem>>, vector<1x1x1x32xf32>
    %784 = vector.shape_cast %783 : vector<1x1x1x32xf32> to vector<1x32xf32>
    %785 = vector.broadcast %784 : vector<1x32xf32> to vector<16x32xf32>
    %786 = arith.addf %782, %785 : vector<16x32xf32>
    %787 = arith.addf %634, %786 : vector<16x32xf32>
    %c1_354 = arith.constant 1 : index
    %c9_355 = arith.constant 9 : index
    %c0_356 = arith.constant 0 : index
    %c0_357 = arith.constant 0 : index
    %788 = vector.load %arg6[%c1_354, %c9_355, %c0_356, %c0_357] : memref<2x13x1x32xf32, #tpu.memory_space<vmem>>, vector<1x1x1x32xf32>
    %789 = vector.shape_cast %788 : vector<1x1x1x32xf32> to vector<1x32xf32>
    %c1_358 = arith.constant 1 : index
    %c10_359 = arith.constant 10 : index
    %c0_360 = arith.constant 0 : index
    %c0_361 = arith.constant 0 : index
    %790 = vector.load %arg6[%c1_358, %c10_359, %c0_360, %c0_361] : memref<2x13x1x32xf32, #tpu.memory_space<vmem>>, vector<1x1x1x32xf32>
    %791 = vector.shape_cast %790 : vector<1x1x1x32xf32> to vector<1x32xf32>
    %cst_362 = arith.constant dense<0.000000e+00> : vector<16xf32>
    %792 = vector.multi_reduction <add>, %787, %cst_362 [1] : vector<16x32xf32> to vector<16xf32>
    %793 = vector.shape_cast %792 : vector<16xf32> to vector<16x1xf32>
    %cst_363 = arith.constant 3.200000e+01 : f32
    %794 = vector.broadcast %cst_363 : f32 to vector<16x1xf32>
    %795 = arith.divf %793, %794 : vector<16x1xf32>
    %796 = vector.broadcast %795 : vector<16x1xf32> to vector<16x32xf32>
    %797 = arith.subf %787, %796 : vector<16x32xf32>
    %798 = arith.mulf %797, %797 : vector<16x32xf32>
    %cst_364 = arith.constant dense<0.000000e+00> : vector<16xf32>
    %799 = vector.multi_reduction <add>, %798, %cst_364 [1] : vector<16x32xf32> to vector<16xf32>
    %800 = vector.shape_cast %799 : vector<16xf32> to vector<16x1xf32>
    %cst_365 = arith.constant 3.200000e+01 : f32
    %801 = vector.broadcast %cst_365 : f32 to vector<16x1xf32>
    %802 = arith.divf %800, %801 : vector<16x1xf32>
    %803 = vector.broadcast %795 : vector<16x1xf32> to vector<16x32xf32>
    %804 = arith.subf %787, %803 : vector<16x32xf32>
    %cst_366 = arith.constant 9.99999974E-6 : f32
    %805 = vector.broadcast %cst_366 : f32 to vector<16x1xf32>
    %806 = arith.addf %802, %805 : vector<16x1xf32>
    %807 = math.rsqrt %806 : vector<16x1xf32>
    %808 = vector.broadcast %807 : vector<16x1xf32> to vector<16x32xf32>
    %809 = arith.mulf %804, %808 : vector<16x32xf32>
    %810 = vector.broadcast %789 : vector<1x32xf32> to vector<16x32xf32>
    %811 = arith.mulf %809, %810 : vector<16x32xf32>
    %812 = vector.broadcast %791 : vector<1x32xf32> to vector<16x32xf32>
    %813 = arith.addf %811, %812 : vector<16x32xf32>
    %c1_367 = arith.constant 1 : index
    %c1_368 = arith.constant 1 : index
    %c0_369 = arith.constant 0 : index
    %c0_370 = arith.constant 0 : index
    %814 = vector.load %arg2[%c1_367, %c1_368, %c0_369, %c0_370] : memref<2x2x32x64xf32, #tpu.memory_space<vmem>>, vector<1x1x32x64xf32>
    %815 = vector.shape_cast %814 : vector<1x1x32x64xf32> to vector<32x64xf32>
    %cst_371 = arith.constant dense<0.000000e+00> : vector<16x64xf32>
    %816 = tpu.matmul %813, %815, %cst_371 {dimension_numbers = #tpu.dot_dimension_numbers<[1], [0], [0], [1], [0, 0, 1, 1], [], []>} : vector<16x32xf32>, vector<32x64xf32>, vector<16x64xf32> -> vector<16x64xf32>
    %c1_372 = arith.constant 1 : index
    %c1_373 = arith.constant 1 : index
    %c0_374 = arith.constant 0 : index
    %c0_375 = arith.constant 0 : index
    %817 = vector.load %arg5[%c1_372, %c1_373, %c0_374, %c0_375] : memref<2x2x1x64xf32, #tpu.memory_space<vmem>>, vector<1x1x1x64xf32>
    %818 = vector.shape_cast %817 : vector<1x1x1x64xf32> to vector<1x64xf32>
    %819 = vector.broadcast %818 : vector<1x64xf32> to vector<16x64xf32>
    %820 = arith.addf %816, %819 : vector<16x64xf32>
    %cst_376 = arith.constant 0.000000e+00 : f32
    %821 = vector.broadcast %cst_376 : f32 to vector<16x64xf32>
    %822 = arith.maximumf %820, %821 : vector<16x64xf32>
    %c1_377 = arith.constant 1 : index
    %c0_378 = arith.constant 0 : index
    %c0_379 = arith.constant 0 : index
    %823 = vector.load %arg4[%c1_377, %c0_378, %c0_379] : memref<2x64x32xf32, #tpu.memory_space<vmem>>, vector<1x64x32xf32>
    %824 = vector.shape_cast %823 : vector<1x64x32xf32> to vector<64x32xf32>
    %cst_380 = arith.constant dense<0.000000e+00> : vector<16x32xf32>
    %825 = tpu.matmul %822, %824, %cst_380 {dimension_numbers = #tpu.dot_dimension_numbers<[1], [0], [0], [1], [0, 0, 1, 1], [], []>} : vector<16x64xf32>, vector<64x32xf32>, vector<16x32xf32> -> vector<16x32xf32>
    %c1_381 = arith.constant 1 : index
    %c6_382 = arith.constant 6 : index
    %c0_383 = arith.constant 0 : index
    %c0_384 = arith.constant 0 : index
    %826 = vector.load %arg6[%c1_381, %c6_382, %c0_383, %c0_384] : memref<2x13x1x32xf32, #tpu.memory_space<vmem>>, vector<1x1x1x32xf32>
    %827 = vector.shape_cast %826 : vector<1x1x1x32xf32> to vector<1x32xf32>
    %828 = vector.broadcast %827 : vector<1x32xf32> to vector<16x32xf32>
    %829 = arith.addf %825, %828 : vector<16x32xf32>
    %830 = arith.addf %813, %829 : vector<16x32xf32>
    %c1_385 = arith.constant 1 : index
    %c11_386 = arith.constant 11 : index
    %c0_387 = arith.constant 0 : index
    %c0_388 = arith.constant 0 : index
    %831 = vector.load %arg6[%c1_385, %c11_386, %c0_387, %c0_388] : memref<2x13x1x32xf32, #tpu.memory_space<vmem>>, vector<1x1x1x32xf32>
    %832 = vector.shape_cast %831 : vector<1x1x1x32xf32> to vector<1x32xf32>
    %c1_389 = arith.constant 1 : index
    %c12_390 = arith.constant 12 : index
    %c0_391 = arith.constant 0 : index
    %c0_392 = arith.constant 0 : index
    %833 = vector.load %arg6[%c1_389, %c12_390, %c0_391, %c0_392] : memref<2x13x1x32xf32, #tpu.memory_space<vmem>>, vector<1x1x1x32xf32>
    %834 = vector.shape_cast %833 : vector<1x1x1x32xf32> to vector<1x32xf32>
    %cst_393 = arith.constant dense<0.000000e+00> : vector<16xf32>
    %835 = vector.multi_reduction <add>, %830, %cst_393 [1] : vector<16x32xf32> to vector<16xf32>
    %836 = vector.shape_cast %835 : vector<16xf32> to vector<16x1xf32>
    %cst_394 = arith.constant 3.200000e+01 : f32
    %837 = vector.broadcast %cst_394 : f32 to vector<16x1xf32>
    %838 = arith.divf %836, %837 : vector<16x1xf32>
    %839 = vector.broadcast %838 : vector<16x1xf32> to vector<16x32xf32>
    %840 = arith.subf %830, %839 : vector<16x32xf32>
    %841 = arith.mulf %840, %840 : vector<16x32xf32>
    %cst_395 = arith.constant dense<0.000000e+00> : vector<16xf32>
    %842 = vector.multi_reduction <add>, %841, %cst_395 [1] : vector<16x32xf32> to vector<16xf32>
    %843 = vector.shape_cast %842 : vector<16xf32> to vector<16x1xf32>
    %cst_396 = arith.constant 3.200000e+01 : f32
    %844 = vector.broadcast %cst_396 : f32 to vector<16x1xf32>
    %845 = arith.divf %843, %844 : vector<16x1xf32>
    %846 = vector.broadcast %838 : vector<16x1xf32> to vector<16x32xf32>
    %847 = arith.subf %830, %846 : vector<16x32xf32>
    %cst_397 = arith.constant 9.99999974E-6 : f32
    %848 = vector.broadcast %cst_397 : f32 to vector<16x1xf32>
    %849 = arith.addf %845, %848 : vector<16x1xf32>
    %850 = math.rsqrt %849 : vector<16x1xf32>
    %851 = vector.broadcast %850 : vector<16x1xf32> to vector<16x32xf32>
    %852 = arith.mulf %847, %851 : vector<16x32xf32>
    %853 = vector.broadcast %832 : vector<1x32xf32> to vector<16x32xf32>
    %854 = arith.mulf %852, %853 : vector<16x32xf32>
    %855 = vector.broadcast %834 : vector<1x32xf32> to vector<16x32xf32>
    %856 = arith.addf %854, %855 : vector<16x32xf32>
    %c0_398 = arith.constant 0 : index
    %c0_399 = arith.constant 0 : index
    %c0_400 = arith.constant 0 : index
    %857 = vector.load %arg7[%c0_398, %c0_399, %c0_400] : memref<2x1x32xf32, #tpu.memory_space<vmem>>, vector<1x1x32xf32>
    %858 = vector.shape_cast %857 : vector<1x1x32xf32> to vector<1x32xf32>
    %c1_401 = arith.constant 1 : index
    %c0_402 = arith.constant 0 : index
    %c0_403 = arith.constant 0 : index
    %859 = vector.load %arg7[%c1_401, %c0_402, %c0_403] : memref<2x1x32xf32, #tpu.memory_space<vmem>>, vector<1x1x32xf32>
    %860 = vector.shape_cast %859 : vector<1x1x32xf32> to vector<1x32xf32>
    %cst_404 = arith.constant dense<0.000000e+00> : vector<16xf32>
    %861 = vector.multi_reduction <add>, %856, %cst_404 [1] : vector<16x32xf32> to vector<16xf32>
    %862 = vector.shape_cast %861 : vector<16xf32> to vector<16x1xf32>
    %cst_405 = arith.constant 3.200000e+01 : f32
    %863 = vector.broadcast %cst_405 : f32 to vector<16x1xf32>
    %864 = arith.divf %862, %863 : vector<16x1xf32>
    %865 = vector.broadcast %864 : vector<16x1xf32> to vector<16x32xf32>
    %866 = arith.subf %856, %865 : vector<16x32xf32>
    %867 = arith.mulf %866, %866 : vector<16x32xf32>
    %cst_406 = arith.constant dense<0.000000e+00> : vector<16xf32>
    %868 = vector.multi_reduction <add>, %867, %cst_406 [1] : vector<16x32xf32> to vector<16xf32>
    %869 = vector.shape_cast %868 : vector<16xf32> to vector<16x1xf32>
    %cst_407 = arith.constant 3.200000e+01 : f32
    %870 = vector.broadcast %cst_407 : f32 to vector<16x1xf32>
    %871 = arith.divf %869, %870 : vector<16x1xf32>
    %872 = vector.broadcast %864 : vector<16x1xf32> to vector<16x32xf32>
    %873 = arith.subf %856, %872 : vector<16x32xf32>
    %cst_408 = arith.constant 9.99999974E-6 : f32
    %874 = vector.broadcast %cst_408 : f32 to vector<16x1xf32>
    %875 = arith.addf %871, %874 : vector<16x1xf32>
    %876 = math.rsqrt %875 : vector<16x1xf32>
    %877 = vector.broadcast %876 : vector<16x1xf32> to vector<16x32xf32>
    %878 = arith.mulf %873, %877 : vector<16x32xf32>
    %879 = vector.broadcast %858 : vector<1x32xf32> to vector<16x32xf32>
    %880 = arith.mulf %878, %879 : vector<16x32xf32>
    %881 = vector.broadcast %860 : vector<1x32xf32> to vector<16x32xf32>
    %882 = arith.addf %880, %881 : vector<16x32xf32>
    %c0_409 = arith.constant 0 : index
    %c0_410 = arith.constant 0 : index
    %883 = vector.load %arg8[%c0_409, %c0_410] : memref<16x32xf32, #tpu.memory_space<vmem>>, vector<16x32xf32>
    tpu.vector_store %arg8[%c0_409, %c0_410], %882 {strides = array<i32>} : memref<16x32xf32, #tpu.memory_space<vmem>>, vector<16x32xf32>,
    return
  }
}

</mosaic_0001>

<bundles_post_ra>
// kernel: _lambda_.1
= control target key start
LH: loop header
LB: loop body
LE: loop exit
PB: predicated region body
PF: predicated region fallthrough
CT: control target
= control target key end

     0   :  { %13 = vsyncpa [#allocation3], 0  ;;  %s10377_s0 = inlined_call_operand.vmem [shape: f32[2,16,32], index: 0, kind: input, shape index: {}]   ;;  %s10378_s1 = inlined_call_operand.vmem [shape: f32[2,32,32], index: 1, kind: input, shape index: {}]   ;;  %s10379_s2 = inlined_call_operand.hbm [shape: f32[2,2,32,64], index: 2, kind: input, shape index: {}]   ;;  %s10380_s3 = inlined_call_operand.vmem [shape: f32[2,6,32,32], index: 3, kind: input, shape index: {}]   ;;  %s10381_s4 = inlined_call_operand.hbm [shape: f32[2,64,32], index: 4, kind: input, shape index: {}]   ;;  %s10382_s5 = inlined_call_operand.vmem [shape: f32[2,2,1,64], index: 5, kind: input, shape index: {}]   ;;  %s10383_s6 = inlined_call_operand.vmem [shape: f32[2,13,1,32], index: 6, kind: input, shape index: {}]   ;;  %s10384_s7 = inlined_call_operand.vmem [shape: f32[2,1,32], index: 7, kind: input, shape index: {}]   ;;  %s10385_s8 = inlined_call_operand.vmem [shape: f32[16,32], index: 8, kind: output, shape index: {}]  }
   0x1   :  { %14 = vsyncpa [#allocation5], 0  ;;  %s9053_s27 = smov [#allocation2]  }
   0x2   :  { %s24_s28 = sshll.u32 %s9053_s27, 4  ;;  %s25_s28 = int_to_ptr.vmem [resolvable:$true] %s24_s28 }
   0x3   :  { %s9017_s29 = scalar_lea.vmem %s25_s28, 2048  ;;  %p9022_p1 = scmp.lt.s32.totalorder %s25_s28, %s25_s28 }
   0x4   :  { %p9018_p0 = scmp.ne.s32.totalorder %s25_s28, %s9017_s29  ;;  %p9023_p2 = scmp.lt.s32.totalorder %s9017_s29, %s9017_s29 }
   0x6   :  { %p9024_p3 = por %p9023_p2, %p9022_p1 }
   0x8   :  { %p9025_p4 = pnand %p9024_p3, %p9018_p0 }
   0xa   :  { %9028 = shalt.err (!%p9025_p4)
}
   0xb   :  { %s9054_s30 = smov 128   ;;  %s9055_s9 = smov 8  }
   0xc   :  { %30 = dma.hbm_to_vmem [thread:$0]  %s10379_s2, 2048, %s25_s28, [#allocation3], %s9054_s30, %s9054_s30, %s9055_s9  }
   0xd   :  { %s9056_s12 = smov [#allocation4]  }
   0xe   :  { %s38_s13 = sshll.u32 %s9056_s12, 4  ;;  %s39_s13 = int_to_ptr.vmem [resolvable:$true] %s38_s13 }
   0xf   :  { %s9037_s14 = scalar_lea.vmem %s39_s13, 2048  ;;  %p9042_p6 = scmp.lt.s32.totalorder %s39_s13, %s39_s13 }
  0x10   :  { %p9038_p5 = scmp.ne.s32.totalorder %s39_s13, %s9037_s14  ;;  %p9043_p7 = scmp.lt.s32.totalorder %s9037_s14, %s9037_s14 }
  0x12   :  { %p9044_p8 = por %p9043_p7, %p9042_p6 }
  0x14   :  { %p9045_p9 = pnand %p9044_p8, %p9038_p5 }
  0x16   :  { %9048 = shalt.err (!%p9045_p9)
}
  0x17   :  { %44 = dma.hbm_to_vmem [thread:$0]  %s10381_s4, 2048, %s39_s13, [#allocation5], %s9054_s30, %s9054_s30, %s9055_s9  }
  0x18   :  { %9049 = dma.done.wait [#allocation3], 2048  }
  0x19   :  { %9050 = vsyncadd [#allocation3], 4294965248 }
  0x1a   :  { %9051 = dma.done.wait [#allocation5], 2048  }
  0x1b   :  { %9052 = vsyncadd [#allocation5], 4294965248  ;;  %v7702_v0 = vld [vmem:[%s10380_s3 + $0x138] sm:$0xff]  ;;  %v7701_v1 = vld [vmem:[%s10380_s3 + $0x130] sm:$0xff]  ;;  %vm88_vm0 = vcmask 261120   ;;  %v9057_v26 = vmov 0.0  }
  0x1c   :  { %8252 = vmatprep.subr.mxu0 %v7702_v0  ;;  %v9130_v2 = vld [vmem:[%s10378_s1] sm:$0xff]  ;;  %v7700_v4 = vld [vmem:[%s10380_s3 + $0x128] sm:$0xff]  ;;  %v9150_v8 = vld [vmem:[%s10378_s1 + $0x10] sm:$0xff]  ;;  %vm9058_vm1 = vmmov 0   ;;  %s9059_s27 = smov 120   ;;  %s9060_s28 = smov 96  }
  0x1d   :  { %v7675_v3 = vld [vmem:[%s10378_s1 + $0x20] sm:$0xff]  ;;  %8253 = vmatpush3.msra.mxu0 %v7702_v0  ;;  %v9142_v6 = vld [vmem:[%s10378_s1 + $0x8] sm:$0xff]  ;;  %v7677_v9 = vld [vmem:[%s10378_s1 + $0x30] sm:$0xff]  ;;  %s9061_s29 = smov 80   ;;  %s9062_s30 = smov 88   ;;  %vm681_vm2 = vcmask 64512  }
  0x1e   :  { %v71_v5 = vadd.f32 %v7675_v3, %v9130_v2  ;;  %v7676_v7 = vld [vmem:[%s10378_s1 + $0x28] sm:$0xff]  ;;  %8254 = vmatprep.subr.mxu0 %v7701_v1  ;;  %v7699_v10 = vld [vmem:[%s10380_s3 + $0x120] sm:$0xff]  ;;  %v497_v12 = vld [vmem:[#allocation2 + $0x18] sm:$0xff]  ;;  %v9164_v13 = vadd.f32 %v7677_v9, %v9150_v8  ;;  %s9063_s10 = smov 72   ;;  %s9064_s11 = smov 112   ;;  %vm1353_vm3 = vcmask 130048  }
  0x1f   :  { %8255 = vmatpush3.msra.mxu0 %v7701_v1  ;;  %v9160_v11 = vadd.f32 %v7676_v7, %v9142_v6  ;;  %v9169_v14 = vld [vmem:[%s10378_s1 + $0x18] sm:$0xff]  ;;  %v9177_v16 = vld [vmem:[%s10377_s0] sm:$0xff]  ;;  %v9182_v17 = vld [vmem:[%s10377_s0 + $0x10] sm:$0xff]  ;;  %s9065_s12 = smov 104   ;;  %s9066_s18 = smov 16   ;;  %vm1355_vm4 = vcmask 195584  }
  0x20   :  { %8260 = vmatprep.mubr.msk.f32.mxu0 %vm88_vm0, %v71_v5  ;;  %8256 = vmatprep.subr.mxu0 %v7700_v4  ;;  %v7678_v15 = vld [vmem:[%s10378_s1 + $0x38] sm:$0xff]  ;;  %v496_v18 = vld [vmem:[#allocation2 + $0x10] sm:$0xff]  ;;  %v495_v20 = vld [vmem:[#allocation2 + $0x8] sm:$0xff]  ;;  %v492_v21 = vadd.f32 %v9182_v17, %v9177_v16  ;;  %s9067_s19 = smov 24   ;;  %vm3926_vm5 = vcmask 523264  }
  0x21   :  { %8232 = vmatprep.mubr.msk.f32.mxu1 %vm88_vm0, %v71_v5  ;;  %8257 = vmatpush3.msra.mxu0 %v7700_v4  ;;  %v9187_v19 = vadd.f32 %v7678_v15, %v9169_v14  ;;  %v9196_v22 = vld [vmem:[%s10377_s0 + $0x8] sm:$0xff]  ;;  %v9201_v23 = vld [vmem:[%s10377_s0 + $0x18] sm:$0xff]  ;;  %v494_v24 = vld [vmem:[#allocation2] sm:$0xff] }
  0x22   :  { %8258 = vmatprep.subr.mxu0 %v7699_v10  ;;  %v493_v25 = vadd.f32 %v9201_v23, %v9196_v22  ;;  %v7704_v29 = vld [vmem:[%s10383_s6 + $0x10] ss:$0 sm:$0xff]  ;;  %v7719_v35 = vld [vmem:[%s10382_s5] ss:$0 sm:$0xff]  ;;  %v7682_v39 = vld [vmem:[%s10380_s3 + $0x78] sm:$0xff] }
  0x23   :  { %8259 = vmatpush3.msra.mxu0 %v7699_v10  ;;  %8224 = vmatprep.subr.mxu1 %v7682_v39  ;;  %v7681_v40 = vld [vmem:[%s10380_s3 + $0x70] sm:$0xff]  ;;  %v7680_v41 = vld [vmem:[%s10380_s3 + $0x68] sm:$0xff]  ;;  %v7679_v42 = vld [vmem:[%s10380_s3 + $0x60] sm:$0xff] }
  0x24   :  { %8261 = vmatmul.mubr.msk.f32.vlgmr.msra.gmra.mxu0 %vm88_vm0, %v9160_v11  ;;  %8280 = vmatprep.subr.mxu0 %v497_v12  ;;  %v7692_v43 = vld [vmem:[%s10380_s3 + $0x98] sm:$0xff]  ;;  %v7691_v44 = vld [vmem:[%s10380_s3 + $0x90] sm:$0xff]  ;;  %v7690_v45 = vld [vmem:[%s10380_s3 + $0x88] sm:$0xff] }
  0x25   :  { %8281 = vmatpush3.msra.mxu0 %v497_v12  ;;  %8263 = vmatprep.mubr.msk.f32.mxu0 %vm88_vm0, %v9164_v13  ;;  %v7689_v46 = vld [vmem:[%s10380_s3 + $0x80] sm:$0xff]  ;;  %v7712_v47 = vld [vmem:[%s10380_s3 + $0x158] sm:$0xff]  ;;  %v7711_v48 = vld [vmem:[%s10380_s3 + $0x150] sm:$0xff] }
  0x26   :  { %8282 = vmatprep.subr.mxu0 %v496_v18  ;;  %8225 = vmatpush3.msra.mxu1 %v7682_v39  ;;  %v7710_v49 = vld [vmem:[%s10380_s3 + $0x148] sm:$0xff]  ;;  %v7709_v50 = vld [vmem:[%s10380_s3 + $0x140] sm:$0xff]  ;;  %v589_v51 = vld [vmem:[%s10380_s3 + $0x18] sm:$0xff] }
  0x27   :  { %8283 = vmatpush3.msra.mxu0 %v496_v18  ;;  %8226 = vmatprep.subr.mxu1 %v7681_v40  ;;  %v588_v52 = vld [vmem:[%s10380_s3 + $0x10] sm:$0xff]  ;;  %v587_v53 = vld [vmem:[%s10380_s3 + $0x8] sm:$0xff]  ;;  %v586_v54 = vld [vmem:[%s10380_s3] sm:$0xff] }
  0x28   :  { %8264 = vmatmul.mubr.msk.f32.gmra.mxu0 %vm88_vm0, %v9187_v19  ;;  %8284 = vmatprep.subr.mxu0 %v495_v20  ;;  %v9381_v7 = vld [vmem:[%s10383_s6 + $0x3] ss:$0 sm:$0xff] }
  0x29   :  { %8285 = vmatpush3.msra.mxu0 %v495_v20  ;;  %8288 = vmatprep.mubr.msk.f32.mxu0 %vm88_vm0, %v492_v21 }
  0x2a   :  { %8286 = vmatprep.subr.mxu0 %v494_v24  ;;  %8227 = vmatpush3.msra.mxu1 %v7681_v40 }
  0x2b   :  { %8287 = vmatpush3.msra.mxu0 %v494_v24  ;;  %8228 = vmatprep.subr.mxu1 %v7680_v41 }
  0x2c   :  { %8289 = vmatmul.mubr.msk.f32.vlgmr.msra.gmra.mxu0 %vm88_vm0, %v493_v25  ;;  %8302 = vmatprep.subr.mxu0 %v9057_v26  ;;  %v7714_v25 = vld [vmem:[%s10383_s6 + $0x11] ss:$0 sm:$0xff] }
  0x2d   :  { %8304 = vmatprep.mubr.msk.f32.mxu0 %vm9058_vm1, %v9057_v26  ;;  %8229 = vmatpush3.msra.mxu1 %v7680_v41 }
  0x2e   :  { %8230 = vmatprep.subr.mxu1 %v7679_v42 }
  0x2f   :  { %8231 = vmatpush3.msra.mxu1 %v7679_v42 }
  0x30   :  { %8233 = vmatmul.mubr.msk.f32.vlgmr.msra.gmra.mxu1 %vm88_vm0, %v9160_v11  ;;  %8238 = vmatprep.subr.mxu1 %v7692_v43 }
  0x31   :  { %8239 = vmatpush3.msra.mxu1 %v7692_v43  ;;  %8235 = vmatprep.mubr.msk.f32.mxu1 %vm88_vm0, %v9164_v13 }
  0x32   :  { %8240 = vmatprep.subr.mxu1 %v7691_v44 }
  0x33   :  { %8241 = vmatpush3.msra.mxu1 %v7691_v44 }
  0x34   :  { %8236 = vmatmul.mubr.msk.f32.gmra.mxu1 %vm88_vm0, %v9187_v19  ;;  %8242 = vmatprep.subr.mxu1 %v7690_v45 }
  0x35   :  { %8243 = vmatpush3.msra.mxu1 %v7690_v45  ;;  %8246 = vmatprep.mubr.msk.f32.mxu1 %vm88_vm0, %v9130_v2 }
  0x36   :  { %8244 = vmatprep.subr.mxu1 %v7689_v46 }
  0x37   :  { %8245 = vmatpush3.msra.mxu1 %v7689_v46 }
  0x38   :  { %8247 = vmatmul.mubr.msk.f32.vlgmr.msra.gmra.mxu1 %vm88_vm0, %v9142_v6  ;;  %8266 = vmatprep.subr.mxu1 %v7712_v47 }
  0x39   :  { %8267 = vmatpush3.msra.mxu1 %v7712_v47  ;;  %8249 = vmatprep.mubr.msk.f32.mxu1 %vm88_vm0, %v9150_v8 }
  0x3a   :  { %8268 = vmatprep.subr.mxu1 %v7711_v48 }
  0x3b   :  { %8269 = vmatpush3.msra.mxu1 %v7711_v48 }
  0x3c   :  { %8250 = vmatmul.mubr.msk.f32.gmra.mxu1 %vm88_vm0, %v9169_v14  ;;  %8270 = vmatprep.subr.mxu1 %v7710_v49 }
  0x3d   :  { %8271 = vmatpush3.msra.mxu1 %v7710_v49  ;;  %8274 = vmatprep.mubr.msk.f32.mxu1 %vm88_vm0, %v9130_v2 }
  0x3e   :  { %8272 = vmatprep.subr.mxu1 %v7709_v50 }
  0x3f   :  { %8273 = vmatpush3.msra.mxu1 %v7709_v50 }
  0x40   :  { %8275 = vmatmul.mubr.msk.f32.vlgmr.msra.gmra.mxu1 %vm88_vm0, %v9142_v6  ;;  %8291 = vmatprep.subr.mxu1 %v589_v51 }
  0x41   :  { %8292 = vmatpush3.msra.mxu1 %v589_v51  ;;  %8277 = vmatprep.mubr.msk.f32.mxu1 %vm88_vm0, %v9150_v8 }
  0x42   :  { %8293 = vmatprep.subr.mxu1 %v588_v52 }
  0x43   :  { %8294 = vmatpush3.msra.mxu1 %v588_v52 }
  0x44   :  { %8278 = vmatmul.mubr.msk.f32.gmra.mxu1 %vm88_vm0, %v9169_v14  ;;  %8295 = vmatprep.subr.mxu1 %v587_v53  ;;  %v9396_v14 = vld [vmem:[%s10383_s6 + $0x4] ss:$0 sm:$0xff] }
  0x45   :  { %8296 = vmatpush3.msra.mxu1 %v587_v53  ;;  %8299 = vmatprep.mubr.msk.f32.mxu1 %vm88_vm0, %v9177_v16 }
  0x46   :  { %8297 = vmatprep.subr.mxu1 %v586_v54 }
  0x47   :  { %8298 = vmatpush3.msra.mxu1 %v586_v54 }
  0x48   :  { %8300 = vmatmul.mubr.msk.f32.vlgmr.msra.gmra.mxu1 %vm88_vm0, %v9196_v22  ;;  %8307 = vmatprep.subr.mxu1 %v9057_v26 }
  0x49   :  { %8309 = vmatprep.mubr.msk.f32.mxu1 %vm9058_vm1, %v9057_v26 }
  0xe4   :  { %v9210_v27 = vpop.f32.mrf.mxu0 }
  0xe6   :  { %v9214_v28 = vpop.f32.mrf.mxu0 }
  0xe8   :  { %v8265_v30 = vpop.f32.mrf.mxu0 }
  0xe9   :  { %v9219_v31 = vadd.f32 %v8265_v30, %v7704_v29 }
  0xea   :  { %v385_v32 = vpop.f32.mrf.mxu0 }
  0xeb   :  { %v9221_v33 = vadd.f32 %v7704_v29, %v385_v32 }
  0xec   :  { %v8290_v34 = vpop.f32.mrf.mxu0 }
  0xed   :  { %v9240_v38 = vadd.f32 %v8290_v34, %v7719_v35  ;;  %v7722_v34 = vld [vmem:[%s10383_s6] ss:$0 sm:$0xff] }
  0xee   :  { %v577_v36 = vpop.f32.mrf.mxu0 }
  0xef   :  { %v9226_v37 = vadd.f32 %v7719_v35, %v577_v36 }
  0xf0   :  { %v9374_v5 = vpop.f32.mrf.mxu1 }
  0xf1   :  { %841 = vrot.lane.b32.xlu1 %v9226_v37, %s9059_s27  ;;  %679 = vrot.lane.b32.xlu0 %v9226_v37, %s9060_s28 }
  0xf2   :  { %v9376_v6 = vpop.f32.mrf.mxu1 }
  0xf4   :  { %v8237_v8 = vpop.f32.mrf.mxu1 }
  0xf5   :  { %1010 = vrot.lane.b32.xlu1 %v9226_v37, %s9061_s29  ;;  %843 = vrot.lane.b32.xlu0 %v9226_v37, %s9062_s30  ;;  %v9384_v9 = vadd.f32 %v8237_v8, %v9381_v7 }
  0xf6   :  { %v177_v10 = vpop.f32.mrf.mxu1 }
  0xf7   :  { %v9387_v11 = vadd.f32 %v9381_v7, %v177_v10 }
  0xf8   :  { %v9389_v12 = vpop.f32.mrf.mxu1 }
  0xf9   :  { %1176 = vrot.lane.b32.xlu1 %v9226_v37, %s9063_s10  ;;  %1008 = vrot.lane.b32.xlu0 %v9226_v37, %s9064_s11 }
  0xfa   :  { %v9391_v13 = vpop.f32.mrf.mxu1 }
  0xfc   :  { %v8251_v15 = vpop.f32.mrf.mxu1 }
  0xfd   :  { %1358 = vrot.lane.b32.xlu1 %v9240_v38, %s9060_s28  ;;  %1174 = vrot.lane.b32.xlu0 %v9226_v37, %s9065_s12  ;;  %v9399_v18 = vadd.f32 %v8251_v15, %v9396_v14 }
  0xfe   :  { %v287_v19 = vpop.f32.mrf.mxu1 }
  0xff   :  { %v9402_v20 = vadd.f32 %v9396_v14, %v287_v19 }
 0x100   :  { %v9404_v21 = vpop.f32.mrf.mxu1 }
 0x101   :  { %1519 = vrot.lane.b32.xlu1 %v9240_v38, %s9059_s27  ;;  %1521 = vrot.lane.b32.xlu0 %v9240_v38, %s9062_s30 }
 0x102   :  { %v9406_v24 = vpop.f32.mrf.mxu1 }
 0x104   :  { %v8279_v29 = vpop.f32.mrf.mxu1 }
 0x105   :  { %1686 = vrot.lane.b32.xlu1 %v9240_v38, %s9064_s11  ;;  %1688 = vrot.lane.b32.xlu0 %v9240_v38, %s9061_s29  ;;  %v9411_v30 = vadd.f32 %v8279_v29, %v7714_v25 }
 0x106   :  { %v483_v32 = vpop.f32.mrf.mxu1 }
 0x107   :  { %v9416_v35 = vadd.f32 %v7714_v25, %v483_v32 }
 0x108   :  { %v8301_v36 = vpop.f32.mrf.mxu1 }
 0x109   :  { %1852 = vrot.lane.b32.xlu1 %v9240_v38, %s9065_s12  ;;  %1854 = vrot.lane.b32.xlu0 %v9240_v38, %s9063_s10 }
 0x163   :  { %v842_v55 = vpop.permute.xlu1 %841  ;;  %v680_v56 = vpop.permute.xlu0 %679 }
 0x164   :  { %8303 = vmatpush3.xpose.msk.msra.mxu0 %vm681_vm2, %v680_v56 }
 0x165   :  { %8312 = vmatprep.subr.mxu0 %v9057_v26 }
 0x167   :  { %v1011_v57 = vpop.permute.xlu1 %1010  ;;  %8305 = vmatmul.mubr.msk.f32.vlgmr.msra.gmra.mxu0 %vm681_vm2, %v9226_v37  ;;  %v844_v58 = vpop.permute.xlu0 %843  ;;  %v9418_v37 = vadd.f32 %v8301_v36, %v7722_v34 }
 0x168   :  { %8313 = vmatpush3.xpose.msk.msra.mxu0 %vm681_vm2, %v844_v58  ;;  %8314 = vmatprep.mubr.msk.f32.mxu0 %vm9058_vm1, %v9057_v26 }
 0x169   :  { %8322 = vmatprep.subr.mxu0 %v9057_v26 }
 0x16b   :  { %v1177_v59 = vpop.permute.xlu1 %1176  ;;  %8315 = vmatmul.mubr.msk.f32.vlgmr.msra.gmra.mxu0 %vm681_vm2, %v842_v55  ;;  %v1009_v60 = vpop.permute.xlu0 %1008 }
 0x16c   :  { %8323 = vmatpush3.xpose.msk.msra.mxu0 %vm681_vm2, %v1011_v57  ;;  %8324 = vmatprep.mubr.msk.f32.mxu0 %vm9058_vm1, %v9057_v26 }
 0x16d   :  { %8332 = vmatprep.subr.mxu0 %v9057_v26 }
 0x16f   :  { %8325 = vmatmul.mubr.msk.f32.vlgmr.msra.gmra.mxu0 %vm681_vm2, %v1009_v60  ;;  %v1175_v61 = vpop.permute.xlu0 %1174  ;;  %v1359_v62 = vpop.permute.xlu1 %1358 }
 0x170   :  { %8333 = vmatpush3.xpose.msk.msra.mxu0 %vm681_vm2, %v1177_v59  ;;  %8334 = vmatprep.mubr.msk.f32.mxu0 %vm9058_vm1, %v9057_v26 }
 0x171   :  { %8342 = vmatprep.subr.mxu0 %v9057_v26 }
 0x173   :  { %8335 = vmatmul.mubr.msk.f32.vlgmr.msra.gmra.mxu0 %vm681_vm2, %v1175_v61  ;;  %v1522_v63 = vpop.permute.xlu0 %1521  ;;  %v1520_v0 = vpop.permute.xlu1 %1519 }
 0x174   :  { %8343 = vmatpush3.xpose.msk.msra.mxu0 %vm681_vm2, %v1359_v62  ;;  %8344 = vmatprep.mubr.msk.f32.mxu0 %vm9058_vm1, %v9057_v26 }
 0x175   :  { %8352 = vmatprep.subr.mxu0 %v9057_v26 }
 0x177   :  { %8345 = vmatmul.mubr.msk.f32.vlgmr.msra.gmra.mxu0 %vm681_vm2, %v9240_v38  ;;  %v1689_v1 = vpop.permute.xlu0 %1688  ;;  %v1687_v2 = vpop.permute.xlu1 %1686 }
 0x178   :  { %8353 = vmatpush3.xpose.msk.msra.mxu0 %vm681_vm2, %v1522_v63  ;;  %8354 = vmatprep.mubr.msk.f32.mxu0 %vm9058_vm1, %v9057_v26  ;;  %v669_v38 = vpop.f32.mrf.mxu1 }
 0x179   :  { %8362 = vmatprep.subr.mxu0 %v9057_v26  ;;  %v670_v39 = vadd.f32 %v7722_v34, %v669_v38 }
 0x17b   :  { %8355 = vmatmul.mubr.msk.f32.vlgmr.msra.gmra.mxu0 %vm681_vm2, %v1520_v0  ;;  %v1855_v3 = vpop.permute.xlu0 %1854  ;;  %v1853_v4 = vpop.permute.xlu1 %1852  ;;  %8308 = vmatpush3.msra.mxu1 %v670_v39 }
 0x17c   :  { %8363 = vmatpush3.xpose.msk.msra.mxu0 %vm681_vm2, %v1689_v1  ;;  %8364 = vmatprep.mubr.msk.f32.mxu0 %vm9058_vm1, %v9057_v26 }
 0x17d   :  { %8372 = vmatprep.subr.mxu0 %v9057_v26  ;;  %8317 = vmatprep.subr.mxu1 %v9057_v26 }
 0x17f   :  { %8365 = vmatmul.mubr.msk.f32.vlgmr.msra.gmra.mxu0 %vm681_vm2, %v1687_v2 }
 0x180   :  { %8373 = vmatpush3.xpose.msk.msra.mxu0 %vm681_vm2, %v1855_v3  ;;  %8374 = vmatprep.mubr.msk.f32.mxu0 %vm9058_vm1, %v9057_v26 }
 0x183   :  { %8375 = vmatmul.mubr.msk.f32.vlgmr.msra.gmra.mxu0 %vm681_vm2, %v1853_v4 }
 0x227   :  { %v752_v40 = vpop.f32.mrf.mxu0 }
 0x228   :  { %v756_v41 = vmul.f32 0.35355338, %v752_v40 }
 0x229   :  { %v8306_v42 = vpop.f32.mrf.mxu0 }
 0x22a   :  { %v757_v43 = vsel %vm681_vm2, %v756_v41, -inf }
 0x22b   :  { %758 = vmax.xlane.f32.xlu0 %v757_v43  ;;  %v915_v44 = vpop.f32.mrf.mxu0 }
 0x22c   :  { %v919_v45 = vmul.f32 0.35355338, %v915_v44 }
 0x22d   :  { %v8316_v46 = vpop.f32.mrf.mxu0 }
 0x22e   :  { %v920_v47 = vsel %vm681_vm2, %v919_v45, -inf }
 0x22f   :  { %921 = vmax.xlane.f32.xlu1 %v920_v47  ;;  %v1082_v48 = vpop.f32.mrf.mxu0 }
 0x230   :  { %v1086_v49 = vmul.f32 0.35355338, %v1082_v48 }
 0x231   :  { %v8326_v50 = vpop.f32.mrf.mxu0 }
 0x232   :  { %v1087_v51 = vsel %vm681_vm2, %v1086_v49, -inf }
 0x233   :  { %1088 = vmax.xlane.f32.xlu0 %v1087_v51  ;;  %v1248_v52 = vpop.f32.mrf.mxu0 }
 0x234   :  { %v1252_v53 = vmul.f32 0.35355338, %v1248_v52 }
 0x235   :  { %v8336_v54 = vpop.f32.mrf.mxu0 }
 0x236   :  { %v1253_v55 = vsel %vm681_vm2, %v1252_v53, -inf }
 0x237   :  { %1254 = vmax.xlane.f32.xlu0 %v1253_v55  ;;  %v1430_v56 = vpop.f32.mrf.mxu0 }
 0x238   :  { %v9425_v57 = vmul.f32 0.35355338, %v1430_v56 }
 0x239   :  { %v8346_v58 = vpop.f32.mrf.mxu0 }
 0x23a   :  { %v1435_v59 = vsel %vm681_vm2, %v9425_v57, -inf }
 0x23b   :  { %1436 = vmax.xlane.f32.xlu1 %v1435_v59  ;;  %v1593_v60 = vpop.f32.mrf.mxu0 }
 0x23c   :  { %v1597_v61 = vmul.f32 0.35355338, %v1593_v60 }
 0x23d   :  { %v8356_v62 = vpop.f32.mrf.mxu0 }
 0x23e   :  { %v1598_v63 = vsel %vm681_vm2, %v1597_v61, -inf }
 0x23f   :  { %1599 = vmax.xlane.f32.xlu0 %v1598_v63  ;;  %v1760_v0 = vpop.f32.mrf.mxu0 }
 0x240   :  { %v1764_v1 = vmul.f32 0.35355338, %v1760_v0 }
 0x241   :  { %v8366_v2 = vpop.f32.mrf.mxu0 }
 0x242   :  { %v1765_v3 = vsel %vm681_vm2, %v1764_v1, -inf }
 0x243   :  { %1766 = vmax.xlane.f32.xlu1 %v1765_v3  ;;  %v1926_v4 = vpop.f32.mrf.mxu0 }
 0x244   :  { %v1930_v8 = vmul.f32 0.35355338, %v1926_v4 }
 0x245   :  { %v8376_v10 = vpop.f32.mrf.mxu0 }
 0x246   :  { %v1931_v15 = vsel %vm681_vm2, %v1930_v8, -inf }
 0x247   :  { %1932 = vmax.xlane.f32.xlu0 %v1931_v15 }
 0x254   :  { %932 = vrot.lane.b32.xlu1 %v670_v39, %s9059_s27 }
 0x2b4   :  { %v759_v19 = vpop.xlane.xlu0 %758 }
 0x2b5   :  { %v760_v25 = vsub.f32 %v756_v41, %v759_v19 }
 0x2b7   :  { %v761_v29 = vmul.f32 1.442695, %v760_v25 }
 0x2b8   :  { %v922_v32 = vpop.xlane.xlu1 %921 }
 0x2b9   :  { %8849 = vpow2.f32 %v761_v29  ;;  %v923_v34 = vsub.f32 %v919_v45, %v922_v32 }
 0x2bb   :  { %v924_v36 = vmul.f32 1.442695, %v923_v34 }
 0x2bc   :  { %v1089_v44 = vpop.xlane.xlu0 %1088 }
 0x2bd   :  { %8851 = vpow2.f32 %v924_v36  ;;  %v1090_v41 = vsub.f32 %v1086_v49, %v1089_v44 }
 0x2bf   :  { %v1091_v47 = vmul.f32 1.442695, %v1090_v41 }
 0x2c0   :  { %v1255_v46 = vpop.xlane.xlu0 %1254 }
 0x2c1   :  { %v1256_v48 = vsub.f32 %v1252_v53, %v1255_v46  ;;  %8853 = vpow2.f32 %v1091_v47 }
 0x2c3   :  { %v1257_v50 = vmul.f32 1.442695, %v1256_v48 }
 0x2c4   :  { %v1437_v63 = vpop.xlane.xlu1 %1436 }
 0x2c5   :  { %8855 = vpow2.f32 %v1257_v50  ;;  %v1438_v0 = vsub.f32 %v9425_v57, %v1437_v63 }
 0x2c6   :  { %v8850_v38 = vpop.eup %8849 }
 0x2c7   :  { %v763_v40 = vsel %vm681_vm2, %v8850_v38, 0.0  ;;  %v1439_v3 = vmul.f32 1.442695, %v1438_v0 }
 0x2c8   :  { %764 = vadd.xlane.f32.xlu1 %v763_v40  ;;  %v1600_v45 = vpop.xlane.xlu0 %1599 }
 0x2c9   :  { %v1601_v51 = vsub.f32 %v1597_v61, %v1600_v45 }
 0x2ca   :  { %v8852_v42 = vpop.eup %8851 }
 0x2cb   :  { %v926_v43 = vsel %vm681_vm2, %v8852_v42, 0.0  ;;  %v1602_v54 = vmul.f32 1.442695, %v1601_v51 }
 0x2cc   :  { %927 = vadd.xlane.f32.xlu0 %v926_v43  ;;  %v1767_v2 = vpop.xlane.xlu1 %1766 }
 0x2cd   :  { %8857 = vpow2.f32 %v1602_v54  ;;  %v1768_v4 = vsub.f32 %v1764_v1, %v1767_v2 }
 0x2ce   :  { %v8854_v58 = vpop.eup %8853 }
 0x2cf   :  { %v1093_v59 = vsel %vm681_vm2, %v8854_v58, 0.0 }
 0x2d0   :  { %v1933_v52 = vpop.xlane.xlu0 %1932  ;;  %v933_v57 = vpop.permute.xlu1 %932 }
 0x2d1   :  { %v1934_v55 = vsub.f32 %v1930_v8, %v1933_v52  ;;  %v1769_v8 = vmul.f32 1.442695, %v1768_v4 }
 0x2d2   :  { %v8856_v60 = vpop.eup %8855 }
 0x2d3   :  { %v1935_v56 = vmul.f32 1.442695, %v1934_v55 }
 0x2d5   :  { %8859 = vpow2.f32 %v1935_v56 }
 0x2d6   :  { %8861 = vpow2.f32 %v1439_v3 }
 0x2d7   :  { %8863 = vpow2.f32 %v1769_v8 }
 0x2d9   :  { %1264 = vrot.lane.b32.xlu1 %v670_v39, %s9065_s12 }
 0x2da   :  { %v9439_v49 = vpop.eup %8857 }
 0x2db   :  { %v1604_v53 = vsel %vm681_vm2, %v9439_v49, 0.0 }
 0x2e2   :  { %1098 = vrot.lane.b32.xlu0 %v670_v39, %s9064_s11  ;;  %v1259_v39 = vsel %vm681_vm2, %v8856_v60, 0.0  ;;  %v9443_v61 = vpop.eup %8859 }
 0x2e3   :  { %v1937_v62 = vsel %vm681_vm2, %v9443_v61, 0.0  ;;  %v8862_v10 = vpop.eup %8861 }
 0x2e4   :  { %v1441_v15 = vsel %vm681_vm2, %v8862_v10, 0.0  ;;  %v9453_v19 = vpop.eup %8863 }
 0x2e5   :  { %v1771_v25 = vsel %vm681_vm2, %v9453_v19, 0.0 }
 0x2fd   :  { %1094 = vadd.xlane.f32.xlu1 %v1093_v59 }
 0x301   :  { %1260 = vadd.xlane.f32.xlu0 %v1259_v39 }
 0x305   :  { %1605 = vadd.xlane.f32.xlu0 %v1604_v53 }
 0x309   :  { %1938 = vadd.xlane.f32.xlu0 %v1937_v62 }
 0x30e   :  { %1610 = vrot.lane.b32.xlu1 %v9418_v37, %s9059_s27 }
 0x31f   :  { %1776 = vrot.lane.b32.xlu0 %v9418_v37, %s9064_s11 }
 0x332   :  { %1442 = vadd.xlane.f32.xlu1 %v1441_v15 }
 0x336   :  { %1772 = vadd.xlane.f32.xlu1 %v1771_v25  ;;  %v7750_v25 = vld [vmem:[%s10380_s3 + $0x28] sm:$0xff] }
 0x347   :  { %1942 = vrot.lane.b32.xlu1 %v9418_v37, %s9065_s12 }
 0x351   :  { %v765_v1 = vpop.xlane.xlu1 %764 }
 0x352   :  { %8865 = vrcp.f32 %v765_v1 }
 0x355   :  { %v928_v29 = vpop.xlane.xlu0 %927 }
 0x356   :  { %8867 = vrcp.f32 %v928_v29 }
 0x359   :  { %v1099_v43 = vpop.permute.xlu0 %1098 }
 0x35f   :  { %v8866_v32 = vpop.eup %8865 }
 0x360   :  { %v767_v34 = vmul.f32 %v8866_v32, %v8850_v38  ;;  %v1265_v38 = vpop.permute.xlu1 %1264 }
 0x362   :  { %8310 = vmatmul.mubr.msk.f32.vlgmr.msra.gmra.mxu1 %vm681_vm2, %v767_v34 }
 0x363   :  { %v8868_v36 = vpop.eup %8867  ;;  %8318 = vmatpush3.msra.mxu1 %v933_v57  ;;  %8319 = vmatprep.mubr.msk.f32.mxu1 %vm9058_vm1, %v9057_v26  ;;  %v7749_v57 = vld [vmem:[%s10380_s3 + $0x20] sm:$0xff] }
 0x364   :  { %8327 = vmatprep.subr.mxu1 %v9057_v26  ;;  %v930_v40 = vmul.f32 %v8868_v36, %v8852_v42 }
 0x366   :  { %8320 = vmatmul.mubr.msk.f32.vlgmr.msra.gmra.mxu1 %vm681_vm2, %v930_v40 }
 0x367   :  { %8328 = vmatpush3.msra.mxu1 %v1099_v43  ;;  %8329 = vmatprep.mubr.msk.f32.mxu1 %vm9058_vm1, %v9057_v26 }
 0x368   :  { %8337 = vmatprep.subr.mxu1 %v9057_v26 }
 0x386   :  { %v1095_v44 = vpop.xlane.xlu1 %1094 }
 0x387   :  { %8869 = vrcp.f32 %v1095_v44 }
 0x38a   :  { %v1261_v41 = vpop.xlane.xlu0 %1260  ;;  %v1611_v45 = vpop.permute.xlu1 %1610 }
 0x38b   :  { %8871 = vrcp.f32 %v1261_v41 }
 0x38e   :  { %v1606_v50 = vpop.xlane.xlu0 %1605 }
 0x392   :  { %v1939_v54 = vpop.xlane.xlu0 %1938 }
 0x394   :  { %v8870_v46 = vpop.eup %8869 }
 0x395   :  { %v1097_v47 = vmul.f32 %v8870_v46, %v8854_v58 }
 0x397   :  { %8330 = vmatmul.mubr.msk.f32.vlgmr.msra.gmra.mxu1 %vm681_vm2, %v1097_v47 }
 0x398   :  { %v8872_v48 = vpop.eup %8871  ;;  %8338 = vmatpush3.msra.mxu1 %v1265_v38  ;;  %8339 = vmatprep.mubr.msk.f32.mxu1 %vm9058_vm1, %v9057_v26 }
 0x399   :  { %8347 = vmatprep.subr.mxu1 %v9057_v26  ;;  %v1263_v42 = vmul.f32 %v8872_v48, %v8856_v60  ;;  %v1777_v60 = vpop.permute.xlu0 %1776 }
 0x39b   :  { %8340 = vmatmul.mubr.msk.f32.vlgmr.msra.gmra.mxu1 %vm681_vm2, %v1263_v42 }
 0x39c   :  { %8348 = vmatpush3.msra.mxu1 %v9418_v37  ;;  %8349 = vmatprep.mubr.msk.f32.mxu1 %vm9058_vm1, %v9057_v26 }
 0x39d   :  { %8357 = vmatprep.subr.mxu1 %v9057_v26 }
 0x3bb   :  { %v1443_v51 = vpop.xlane.xlu1 %1442 }
 0x3bc   :  { %8873 = vrcp.f32 %v1443_v51 }
 0x3bd   :  { %8875 = vrcp.f32 %v1606_v50 }
 0x3bf   :  { %v1773_v52 = vpop.xlane.xlu1 %1772 }
 0x3c0   :  { %8877 = vrcp.f32 %v1773_v52 }
 0x3c1   :  { %8879 = vrcp.f32 %v1939_v54 }
 0x3c3   :  { %v1943_v62 = vpop.permute.xlu1 %1942 }
 0x3c9   :  { %v8874_v55 = vpop.eup %8873 }
 0x3ca   :  { %v1445_v56 = vmul.f32 %v8874_v55, %v8862_v10  ;;  %v8876_v58 = vpop.eup %8875  ;;  %v9518_v55 = vadd.f32 %v9374_v5, %v9381_v7  ;;  %v7754_v5 = vld [vmem:[%s10383_s6 + $0x1] ss:$0 sm:$0xff] }
 0x3cb   :  { %v1608_v37 = vmul.f32 %v8876_v58, %v9439_v49  ;;  %v9529_v58 = vadd.f32 %v9381_v7, %v9376_v6 }
 0x3cc   :  { %8350 = vmatmul.mubr.msk.f32.vlgmr.msra.gmra.mxu1 %vm681_vm2, %v1445_v56 }
 0x3cd   :  { %8358 = vmatpush3.msra.mxu1 %v1611_v45  ;;  %8359 = vmatprep.mubr.msk.f32.mxu1 %vm9058_vm1, %v9057_v26  ;;  %v8878_v59 = vpop.eup %8877 }
 0x3ce   :  { %8367 = vmatprep.subr.mxu1 %v9057_v26  ;;  %v1775_v39 = vmul.f32 %v8878_v59, %v9453_v19  ;;  %v8880_v53 = vpop.eup %8879  ;;  %v7751_v19 = vld [vmem:[%s10380_s3 + $0x30] sm:$0xff] }
 0x3cf   :  { %v1941_v49 = vmul.f32 %v8880_v53, %v9443_v61  ;;  %v7752_v61 = vld [vmem:[%s10380_s3 + $0x38] sm:$0xff] }
 0x3d0   :  { %8360 = vmatmul.mubr.msk.f32.vlgmr.msra.gmra.mxu1 %vm681_vm2, %v1608_v37  ;;  %8382 = vmatprep.subr.mxu0 %v7752_v61 }
 0x3d1   :  { %8368 = vmatpush3.msra.mxu1 %v1777_v60  ;;  %8369 = vmatprep.mubr.msk.f32.mxu1 %vm9058_vm1, %v9057_v26 }
 0x3d2   :  { %8377 = vmatprep.subr.mxu1 %v9057_v26  ;;  %8383 = vmatpush3.msra.mxu0 %v7752_v61  ;;  %v7763_v61 = vld [vmem:[%s10380_s3 + $0x50] sm:$0xff] }
 0x3d3   :  { %8384 = vmatprep.subr.mxu0 %v7751_v19 }
 0x3d4   :  { %8370 = vmatmul.mubr.msk.f32.vlgmr.msra.gmra.mxu1 %vm681_vm2, %v1775_v39  ;;  %8385 = vmatpush3.msra.mxu0 %v7751_v19  ;;  %v7762_v19 = vld [vmem:[%s10380_s3 + $0x48] sm:$0xff] }
 0x3d5   :  { %8378 = vmatpush3.msra.mxu1 %v1943_v62  ;;  %8379 = vmatprep.mubr.msk.f32.mxu1 %vm9058_vm1, %v9057_v26 }
 0x3d6   :  { %8386 = vmatprep.subr.mxu0 %v7750_v25 }
 0x3d7   :  { %8387 = vmatpush3.msra.mxu0 %v7750_v25  ;;  %v7761_v25 = vld [vmem:[%s10380_s3 + $0x40] sm:$0xff] }
 0x3d8   :  { %8380 = vmatmul.mubr.msk.f32.vlgmr.msra.gmra.mxu1 %vm681_vm2, %v1941_v49  ;;  %8388 = vmatprep.subr.mxu0 %v7749_v57 }
 0x3d9   :  { %8389 = vmatpush3.msra.mxu0 %v7749_v57 }
 0x3da   :  { %8404 = vmatprep.subr.mxu0 %v9057_v26 }
 0x422   :  { %v837_v63 = vpop.f32.mrf.mxu1 }
 0x424   :  { %v8311_v0 = vpop.f32.mrf.mxu1 }
 0x426   :  { %v1004_v2 = vpop.f32.mrf.mxu1 }
 0x427   :  { %1341 = vrot.lane.b32.xlu0 %v1004_v2, %s9055_s9 }
 0x428   :  { %v8321_v3 = vpop.f32.mrf.mxu1 }
 0x457   :  { %v1170_v4 = vpop.f32.mrf.mxu1 }
 0x458   :  { %1345 = vrot.lane.b32.xlu1 %v1170_v4, %s9066_s18 }
 0x459   :  { %v8331_v8 = vpop.f32.mrf.mxu1 }
 0x45b   :  { %v1336_v10 = vpop.f32.mrf.mxu1 }
 0x45c   :  { %1349 = vrot.lane.b32.xlu1 %v1336_v10, %s9067_s19 }
 0x45d   :  { %v8341_v15 = vpop.f32.mrf.mxu1 }
 0x48c   :  { %v1515_v1 = vpop.f32.mrf.mxu1 }
 0x48e   :  { %v8351_v29 = vpop.f32.mrf.mxu1 }
 0x490   :  { %v1682_v32 = vpop.f32.mrf.mxu1 }
 0x491   :  { %2019 = vrot.lane.b32.xlu0 %v1682_v32, %s9055_s9 }
 0x492   :  { %v8361_v34 = vpop.f32.mrf.mxu1 }
 0x494   :  { %v1848_v36 = vpop.f32.mrf.mxu1 }
 0x495   :  { %2023 = vrot.lane.b32.xlu0 %v1848_v36, %s9066_s18 }
 0x496   :  { %v8371_v40 = vpop.f32.mrf.mxu1 }
 0x498   :  { %v2014_v43 = vpop.f32.mrf.mxu1 }
 0x499   :  { %2027 = vrot.lane.b32.xlu1 %v2014_v43, %s9067_s19  ;;  %v1342_v44 = vpop.permute.xlu0 %1341  ;;  %v7759_v43 = vld [vmem:[%s10383_s6 + $0x7] ss:$0 sm:$0xff] }
 0x49a   :  { %v8381_v38 = vpop.f32.mrf.mxu1  ;;  %v1352_v46 = vsel %vm681_vm2, %v837_v63, %v1342_v44  ;;  %v7760_v44 = vld [vmem:[%s10383_s6 + $0x8] ss:$0 sm:$0xff] }
 0x4ca   :  { %v1346_v41 = vpop.permute.xlu1 %1345 }
 0x4cb   :  { %v1354_v47 = vsel %vm1353_vm3, %v1352_v46, %v1346_v41 }
 0x4ce   :  { %v1350_v48 = vpop.permute.xlu1 %1349 }
 0x4cf   :  { %v1356_v42 = vsel %vm1355_vm4, %v1354_v47, %v1350_v48 }
 0x4d0   :  { %8390 = vmatprep.mubr.msk.f32.mxu0 %vm88_vm0, %v1356_v42 }
 0x503   :  { %v2020_v45 = vpop.permute.xlu0 %2019 }
 0x504   :  { %v2030_v51 = vsel %vm681_vm2, %v1515_v1, %v2020_v45 }
 0x507   :  { %v2024_v50 = vpop.permute.xlu0 %2023 }
 0x508   :  { %v2031_v52 = vsel %vm1353_vm3, %v2030_v51, %v2024_v50 }
 0x50b   :  { %v2028_v54 = vpop.permute.xlu1 %2027 }
 0x50c   :  { %v2032_v56 = vsel %vm1355_vm4, %v2031_v52, %v2028_v54  ;;  %v9573_v52 = vadd.f32 %v9389_v12, %v9396_v14  ;;  %v9578_v54 = vadd.f32 %v9396_v14, %v9391_v13 }
 0x50d   :  { %8391 = vmatmul.mubr.msk.f32.vlgmr.msra.gmra.mxu0 %vm88_vm0, %v2032_v56 }
 0x50e   :  { %8405 = vmatpush3.xpose.msk.msra.mxu0 %vm681_vm2, %v9518_v55  ;;  %8408 = vmatprep.mubr.msk.f32.mxu0 %vm9058_vm1, %v9057_v26 }
 0x50f   :  { %8406 = vmatprep.subr.mxu0 %v9057_v26 }
 0x512   :  { %8407 = vmatpush3.xpose.msk.msra.mxu0 %vm681_vm2, %v9529_v58 }
 0x513   :  { %8425 = vmatprep.subr.mxu0 %v9057_v26 }
 0x5cd   :  { %v8392_v37 = vpop.f32.mrf.mxu0 }
 0x5ce   :  { %v2124_v59 = vadd.f32 %v8392_v37, %v7754_v5 }
 0x5cf   :  { %v2118_v60 = vpop.f32.mrf.mxu0 }
 0x5d0   :  { %v2119_v39 = vadd.f32 %v7754_v5, %v2118_v60  ;;  %v2128_v53 = vadd.f32 %v2124_v59, %v9196_v22 }
 0x5d2   :  { %v2136_v62 = vsel %vm88_vm0, %v2128_v53, 0.0  ;;  %v2127_v6 = vadd.f32 %v2119_v39, %v9177_v16  ;;  %v7764_v16 = vld [vmem:[%s10380_s3 + $0x58] sm:$0xff] }
 0x5d3   :  { %2137 = vadd.xlane.f32.xlu1 %v2136_v62  ;;  %8393 = vmatprep.subr.mxu1 %v7764_v16 }
 0x5d4   :  { %v2133_v7 = vsel %vm88_vm0, %v2127_v6, 0.0  ;;  %8394 = vmatpush3.msra.mxu1 %v7764_v16 }
 0x5d5   :  { %2134 = vadd.xlane.f32.xlu0 %v2133_v7  ;;  %8395 = vmatprep.subr.mxu1 %v7763_v61 }
 0x5d6   :  { %8396 = vmatpush3.msra.mxu1 %v7763_v61 }
 0x5d7   :  { %8397 = vmatprep.subr.mxu1 %v7762_v19 }
 0x5d8   :  { %8398 = vmatpush3.msra.mxu1 %v7762_v19 }
 0x5d9   :  { %8399 = vmatprep.subr.mxu1 %v7761_v25 }
 0x5da   :  { %8400 = vmatpush3.msra.mxu1 %v7761_v25 }
 0x5db   :  { %8411 = vmatprep.subr.mxu1 %v9057_v26 }
 0x65c   :  { %v2138_v49 = vpop.xlane.xlu1 %2137 }
 0x65d   :  { %v2141_v63 = vmul.f32 0.03125, %v2138_v49 }
 0x65e   :  { %v2135_v0 = vpop.xlane.xlu0 %2134 }
 0x65f   :  { %v2140_v2 = vmul.f32 0.03125, %v2135_v0  ;;  %v2143_v3 = vsub.f32 %v2128_v53, %v2141_v63 }
 0x661   :  { %v2142_v4 = vsub.f32 %v2127_v6, %v2140_v2  ;;  %v2145_v15 = vmul.f32 %v2143_v3, %v2143_v3 }
 0x663   :  { %v2144_v8 = vmul.f32 %v2142_v4, %v2142_v4  ;;  %v2149_v22 = vsel %vm88_vm0, %v2145_v15, 0.0 }
 0x665   :  { %v2146_v10 = vsel %vm88_vm0, %v2144_v8, 0.0 }
 0x666   :  { %2147 = vadd.xlane.f32.xlu0 %v2146_v10 }
 0x66a   :  { %2150 = vadd.xlane.f32.xlu0 %v2149_v22 }
 0x6ef   :  { %v2148_v57 = vpop.xlane.xlu0 %2147 }
 0x6f0   :  { %v2152_v1 = vmul.f32 0.03125, %v2148_v57 }
 0x6f2   :  { %v2154_v29 = vadd.f32 1e-05, %v2152_v1 }
 0x6f3   :  { %v2151_v32 = vpop.xlane.xlu0 %2150 }
 0x6f4   :  { %8881 = vrsqrt.f32 %v2154_v29  ;;  %v2153_v34 = vmul.f32 0.03125, %v2151_v32 }
 0x6f6   :  { %v2155_v36 = vadd.f32 1e-05, %v2153_v34 }
 0x6f8   :  { %8883 = vrsqrt.f32 %v2155_v36 }
 0x701   :  { %v8882_v40 = vpop.eup %8881 }
 0x702   :  { %v2158_v38 = vmul.f32 %v8882_v40, %v2142_v4 }
 0x704   :  { %v2166_v41 = vmul.f32 %v7759_v43, %v2158_v38 }
 0x705   :  { %v8884_v46 = vpop.eup %8883 }
 0x706   :  { %v2159_v47 = vmul.f32 %v8884_v46, %v2143_v3  ;;  %v9562_v48 = vadd.f32 %v7760_v44, %v2166_v41 }
 0x708   :  { %v2167_v42 = vmul.f32 %v7759_v43, %v2159_v47  ;;  %v2176_v45 = vadd.f32 %v9182_v17, %v9562_v48  ;;  %v7766_v17 = vld [vmem:[%s10383_s6 + $0x2] ss:$0 sm:$0xff] }
 0x70a   :  { %v9566_v50 = vadd.f32 %v7760_v44, %v2167_v42  ;;  %8401 = vmatprep.mubr.msk.f32.mxu1 %vm88_vm0, %v2176_v45 }
 0x70c   :  { %v2177_v51 = vadd.f32 %v9201_v23, %v9566_v50 }
 0x70e   :  { %8402 = vmatmul.mubr.msk.f32.vlgmr.msra.gmra.mxu1 %vm88_vm0, %v2177_v51 }
 0x70f   :  { %8412 = vmatpush3.msra.mxu1 %v9573_v52  ;;  %8415 = vmatprep.mubr.msk.f32.mxu1 %vm9058_vm1, %v9057_v26 }
 0x710   :  { %8413 = vmatprep.subr.mxu1 %v9057_v26 }
 0x711   :  { %8414 = vmatpush3.msra.mxu1 %v9578_v54 }
 0x712   :  { %8418 = vmatprep.subr.mxu1 %v9057_v26 }
 0x7ce   :  { %v8403_v23 = vpop.f32.mrf.mxu1 }
 0x7cf   :  { %v9589_v12 = vadd.f32 %v8403_v23, %v7766_v17 }
 0x7d0   :  { %v2263_v13 = vpop.f32.mrf.mxu1 }
 0x7d1   :  { %v9591_v14 = vadd.f32 %v7766_v17, %v2263_v13 }
 0x7d3   :  { %8409 = vmatmul.mubr.msk.f32.vlgmr.msra.gmra.mxu0 %vm681_vm2, %v9591_v14 }
 0x7d4   :  { %8429 = vmatprep.mubr.msk.f32.mxu0 %vm9058_vm1, %v9057_v26 }
 0x893   :  { %v2347_v56 = vpop.f32.mrf.mxu0 }
 0x894   :  { %v2351_v5 = vmul.f32 0.35355338, %v2347_v56 }
 0x895   :  { %v8410_v37 = vpop.f32.mrf.mxu0 }
 0x896   :  { %v2352_v59 = vsel %vm1353_vm3, %v2351_v5, -inf }
 0x897   :  { %2353 = vmax.xlane.f32.xlu1 %v2352_v59 }
 0x8a8   :  { %2440 = vrot.lane.b32.xlu1 %v9518_v55, %s9059_s27 }
 0x8ac   :  { %2436 = vrot.lane.b32.xlu1 %v9591_v14, %s9059_s27 }
 0x920   :  { %v2354_v60 = vpop.xlane.xlu1 %2353 }
 0x921   :  { %v2355_v39 = vsub.f32 %v2351_v5, %v2354_v60 }
 0x923   :  { %v2356_v53 = vmul.f32 1.442695, %v2355_v39 }
 0x924   :  { %v2441_v0 = vpop.permute.xlu1 %2440 }
 0x925   :  { %8885 = vpow2.f32 %v2356_v53 }
 0x928   :  { %v2437_v3 = vpop.permute.xlu1 %2436 }
 0x932   :  { %v8886_v62 = vpop.eup %8885 }
 0x933   :  { %v2358_v6 = vsel %vm1353_vm3, %v8886_v62, 0.0 }
 0x934   :  { %2359 = vadd.xlane.f32.xlu0 %v2358_v6 }
 0x94a   :  { %2438 = vrot.lane.b32.xlu0 %v9529_v58, %s9059_s27 }
 0x9bd   :  { %v2360_v7 = vpop.xlane.xlu0 %2359 }
 0x9be   :  { %8887 = vrcp.f32 %v2360_v7 }
 0x9c1   :  { %v2439_v2 = vpop.permute.xlu0 %2438 }
 0x9cb   :  { %v8888_v49 = vpop.eup %8887 }
 0x9cc   :  { %v2362_v63 = vmul.f32 %v8888_v49, %v8886_v62 }
 0x9ce   :  { %8416 = vmatmul.mubr.msk.f32.vlgmr.msra.gmra.mxu1 %vm1353_vm3, %v2362_v63 }
 0x9cf   :  { %8419 = vmatpush3.xpose.msk.msra.mxu1 %vm681_vm2, %v2441_v0  ;;  %8422 = vmatprep.mubr.msk.f32.mxu1 %vm9058_vm1, %v9057_v26 }
 0x9d0   :  { %8420 = vmatprep.subr.mxu1 %v9057_v26 }
 0x9d3   :  { %8421 = vmatpush3.xpose.msk.msra.mxu1 %vm681_vm2, %v2439_v2 }
 0x9d4   :  { %8439 = vmatprep.subr.mxu1 %v9057_v26 }
 0x9d6   :  { %8423 = vmatmul.mubr.msk.f32.vlgmr.msra.gmra.mxu1 %vm681_vm2, %v2437_v3 }
 0x9d7   :  { %8443 = vmatprep.mubr.msk.f32.mxu1 %vm9058_vm1, %v9057_v26 }
 0xa8e   :  { %v9615_v4 = vpop.f32.mrf.mxu1 }
 0xa90   :  { %v8417_v8 = vpop.f32.mrf.mxu1 }
 0xa96   :  { %v2514_v10 = vpop.f32.mrf.mxu1 }
 0xa97   :  { %v2518_v15 = vmul.f32 0.35355338, %v2514_v10 }
 0xa98   :  { %v8424_v22 = vpop.f32.mrf.mxu1 }
 0xa99   :  { %v2519_v16 = vsel %vm1353_vm3, %v2518_v15, -inf }
 0xa9a   :  { %2520 = vmax.xlane.f32.xlu1 %v2519_v16 }
 0xaab   :  { %2532 = vrot.lane.b32.xlu1 %v9578_v54, %s9059_s27 }
 0xaaf   :  { %2615 = vrot.lane.b32.xlu1 %v9518_v55, %s9064_s11 }
 0xab3   :  { %2611 = vrot.lane.b32.xlu1 %v9591_v14, %s9064_s11 }
 0xab7   :  { %2705 = vrot.lane.b32.xlu1 %v9578_v54, %s9064_s11 }
 0xb23   :  { %v2521_v61 = vpop.xlane.xlu1 %2520 }
 0xb24   :  { %v2522_v19 = vsub.f32 %v2518_v15, %v2521_v61 }
 0xb26   :  { %v2523_v25 = vmul.f32 1.442695, %v2522_v19 }
 0xb27   :  { %v2533_v34 = vpop.permute.xlu1 %2532 }
 0xb28   :  { %8889 = vpow2.f32 %v2523_v25 }
 0xb2b   :  { %v2616_v43 = vpop.permute.xlu1 %2615 }
 0xb2f   :  { %v2612_v44 = vpop.permute.xlu1 %2611 }
 0xb33   :  { %v2706_v5 = vpop.permute.xlu1 %2705 }
 0xb35   :  { %v8890_v57 = vpop.eup %8889 }
 0xb36   :  { %v2525_v1 = vsel %vm1353_vm3, %v8890_v57, 0.0 }
 0xb37   :  { %2526 = vadd.xlane.f32.xlu0 %v2525_v1 }
 0xb4d   :  { %2534 = vrot.lane.b32.xlu0 %v9573_v52, %s9059_s27 }
 0xb51   :  { %2613 = vrot.lane.b32.xlu0 %v9529_v58, %s9064_s11 }
 0xbc0   :  { %v2527_v29 = vpop.xlane.xlu0 %2526 }
 0xbc1   :  { %8891 = vrcp.f32 %v2527_v29 }
 0xbc4   :  { %v2535_v32 = vpop.permute.xlu0 %2534 }
 0xbc5   :  { %8426 = vmatpush3.msra.mxu0 %v2535_v32 }
 0xbc6   :  { %8427 = vmatprep.subr.mxu0 %v9057_v26 }
 0xbc7   :  { %8428 = vmatpush3.msra.mxu0 %v2533_v34 }
 0xbc8   :  { %8432 = vmatprep.subr.mxu0 %v9057_v26  ;;  %v2614_v38 = vpop.permute.xlu0 %2613 }
 0xbce   :  { %v8892_v36 = vpop.eup %8891 }
 0xbcf   :  { %v2529_v40 = vmul.f32 %v8892_v36, %v8890_v57 }
 0xbd1   :  { %8430 = vmatmul.mubr.msk.f32.vlgmr.msra.gmra.mxu0 %vm1353_vm3, %v2529_v40 }
 0xbd2   :  { %8433 = vmatpush3.xpose.msk.msra.mxu0 %vm681_vm2, %v2616_v43  ;;  %8436 = vmatprep.mubr.msk.f32.mxu0 %vm9058_vm1, %v9057_v26 }
 0xbd3   :  { %8434 = vmatprep.subr.mxu0 %v9057_v26 }
 0xbd6   :  { %8435 = vmatpush3.xpose.msk.msra.mxu0 %vm681_vm2, %v2614_v38 }
 0xbd7   :  { %8453 = vmatprep.subr.mxu0 %v9057_v26 }
 0xbd9   :  { %8437 = vmatmul.mubr.msk.f32.vlgmr.msra.gmra.mxu0 %vm681_vm2, %v2612_v44 }
 0xbda   :  { %8457 = vmatprep.mubr.msk.f32.mxu0 %vm9058_vm1, %v9057_v26 }
 0xc91   :  { %v9643_v41 = vpop.f32.mrf.mxu0 }
 0xc93   :  { %v8431_v46 = vpop.f32.mrf.mxu0 }
 0xc99   :  { %v2689_v47 = vpop.f32.mrf.mxu0 }
 0xc9a   :  { %v2693_v42 = vmul.f32 0.35355338, %v2689_v47 }
 0xc9b   :  { %v8438_v45 = vpop.f32.mrf.mxu0 }
 0xc9c   :  { %v2694_v51 = vsel %vm1353_vm3, %v2693_v42, -inf }
 0xc9d   :  { %2695 = vmax.xlane.f32.xlu0 %v2694_v51 }
 0xcb3   :  { %2707 = vrot.lane.b32.xlu0 %v9573_v52, %s9064_s11 }
 0xcb7   :  { %2788 = vrot.lane.b32.xlu0 %v9518_v55, %s9065_s12 }
 0xcbb   :  { %2784 = vrot.lane.b32.xlu0 %v9591_v14, %s9065_s12 }
 0xd26   :  { %v2696_v17 = vpop.xlane.xlu0 %2695 }
 0xd27   :  { %v2697_v23 = vsub.f32 %v2693_v42, %v2696_v17 }
 0xd29   :  { %v2698_v13 = vmul.f32 1.442695, %v2697_v23 }
 0xd2a   :  { %v2708_v56 = vpop.permute.xlu0 %2707 }
 0xd2b   :  { %8893 = vpow2.f32 %v2698_v13  ;;  %8440 = vmatpush3.msra.mxu1 %v2708_v56 }
 0xd2c   :  { %8441 = vmatprep.subr.mxu1 %v9057_v26 }
 0xd2d   :  { %8442 = vmatpush3.msra.mxu1 %v2706_v5 }
 0xd2e   :  { %8446 = vmatprep.subr.mxu1 %v9057_v26  ;;  %v2789_v39 = vpop.permute.xlu0 %2788 }
 0xd38   :  { %v8894_v37 = vpop.eup %8893 }
 0xd39   :  { %v2700_v59 = vsel %vm1353_vm3, %v8894_v37, 0.0 }
 0xd3a   :  { %2701 = vadd.xlane.f32.xlu1 %v2700_v59 }
 0xd4b   :  { %2786 = vrot.lane.b32.xlu1 %v9529_v58, %s9065_s12  ;;  %v2785_v58 = vpop.permute.xlu0 %2784 }
 0xdc3   :  { %v2702_v55 = vpop.xlane.xlu1 %2701 }
 0xdc4   :  { %8895 = vrcp.f32 %v2702_v55 }
 0xdc7   :  { %v2787_v53 = vpop.permute.xlu1 %2786 }
 0xdd1   :  { %v8896_v14 = vpop.eup %8895 }
 0xdd2   :  { %v2704_v60 = vmul.f32 %v8896_v14, %v8894_v37 }
 0xdd4   :  { %8444 = vmatmul.mubr.msk.f32.vlgmr.msra.gmra.mxu1 %vm1353_vm3, %v2704_v60 }
 0xdd5   :  { %8447 = vmatpush3.xpose.msk.msra.mxu1 %vm681_vm2, %v2789_v39  ;;  %8450 = vmatprep.mubr.msk.f32.mxu1 %vm9058_vm1, %v9057_v26 }
 0xdd6   :  { %8448 = vmatprep.subr.mxu1 %v9057_v26 }
 0xdd9   :  { %8449 = vmatpush3.xpose.msk.msra.mxu1 %vm681_vm2, %v2787_v53 }
 0xdda   :  { %8467 = vmatprep.subr.mxu1 %v9057_v26 }
 0xddc   :  { %8451 = vmatmul.mubr.msk.f32.vlgmr.msra.gmra.mxu1 %vm681_vm2, %v2785_v58 }
 0xddd   :  { %8468 = vmatpush3.msra.mxu1 %v9399_v18  ;;  %8471 = vmatprep.mubr.msk.f32.mxu1 %vm9058_vm1, %v9057_v26 }
 0xdde   :  { %8469 = vmatprep.subr.mxu1 %v9057_v26 }
 0xddf   :  { %8470 = vmatpush3.msra.mxu1 %v9402_v20 }
 0xde0   :  { %8474 = vmatprep.subr.mxu1 %v9057_v26 }
 0xe94   :  { %v9671_v62 = vpop.f32.mrf.mxu1 }
 0xe96   :  { %v8445_v6 = vpop.f32.mrf.mxu1 }
 0xe9c   :  { %v2862_v7 = vpop.f32.mrf.mxu1 }
 0xe9d   :  { %v2866_v49 = vmul.f32 0.35355338, %v2862_v7 }
 0xe9e   :  { %v8452_v63 = vpop.f32.mrf.mxu1 }
 0xe9f   :  { %v2867_v0 = vsel %vm1353_vm3, %v2866_v49, -inf }
 0xea0   :  { %2868 = vmax.xlane.f32.xlu1 %v2867_v0 }
 0xeb1   :  { %2878 = vrot.lane.b32.xlu1 %v9578_v54, %s9065_s12 }
 0xf29   :  { %v2869_v2 = vpop.xlane.xlu1 %2868 }
 0xf2a   :  { %v2870_v3 = vsub.f32 %v2866_v49, %v2869_v2 }
 0xf2c   :  { %v2871_v8 = vmul.f32 1.442695, %v2870_v3 }
 0xf2d   :  { %v2879_v61 = vpop.permute.xlu1 %2878 }
 0xf2e   :  { %8897 = vpow2.f32 %v2871_v8 }
 0xf3b   :  { %v8898_v10 = vpop.eup %8897 }
 0xf3c   :  { %v2873_v15 = vsel %vm1353_vm3, %v8898_v10, 0.0 }
 0xf3d   :  { %2874 = vadd.xlane.f32.xlu0 %v2873_v15 }
 0xf53   :  { %2880 = vrot.lane.b32.xlu0 %v9573_v52, %s9065_s12 }
 0xfc6   :  { %v2875_v22 = vpop.xlane.xlu0 %2874 }
 0xfc7   :  { %8899 = vrcp.f32 %v2875_v22 }
 0xfca   :  { %v2881_v16 = vpop.permute.xlu0 %2880 }
 0xfcb   :  { %8454 = vmatpush3.msra.mxu0 %v2881_v16 }
 0xfcc   :  { %8455 = vmatprep.subr.mxu0 %v9057_v26 }
 0xfcd   :  { %8456 = vmatpush3.msra.mxu0 %v2879_v61 }
 0xfce   :  { %8460 = vmatprep.subr.mxu0 %v9057_v26 }
 0xfd4   :  { %v8900_v54 = vpop.eup %8899 }
 0xfd5   :  { %v2877_v19 = vmul.f32 %v8900_v54, %v8898_v10 }
 0xfd7   :  { %8458 = vmatmul.mubr.msk.f32.vlgmr.msra.gmra.mxu0 %vm1353_vm3, %v2877_v19 }
 0xfd8   :  { %8461 = vmatpush3.xpose.msk.msra.mxu0 %vm681_vm2, %v9384_v9  ;;  %8464 = vmatprep.mubr.msk.f32.mxu0 %vm9058_vm1, %v9057_v26 }
 0xfd9   :  { %8462 = vmatprep.subr.mxu0 %v9057_v26 }
 0xfdc   :  { %8463 = vmatpush3.xpose.msk.msra.mxu0 %vm681_vm2, %v9387_v11 }
 0xfdd   :  { %8481 = vmatprep.subr.mxu0 %v9057_v26 }
 0xfdf   :  { %8465 = vmatmul.mubr.msk.f32.vlgmr.msra.gmra.mxu0 %vm681_vm2, %v9589_v12 }
 0xfe0   :  { %8485 = vmatprep.mubr.msk.f32.mxu0 %vm9058_vm1, %v9057_v26 }
0x1097   :  { %v9694_v52 = vpop.f32.mrf.mxu0 }
0x1099   :  { %v8459_v25 = vpop.f32.mrf.mxu0 }
0x109f   :  { %v3047_v57 = vpop.f32.mrf.mxu0 }
0x10a0   :  { %v3051_v1 = vmul.f32 0.35355338, %v3047_v57 }
0x10a1   :  { %v8466_v29 = vpop.f32.mrf.mxu0 }
0x10a2   :  { %v3052_v32 = vsel %vm1353_vm3, %v3051_v1, -inf }
0x10a3   :  { %3053 = vmax.xlane.f32.xlu1 %v3052_v32 }
0x10b4   :  { %3138 = vrot.lane.b32.xlu1 %v9387_v11, %s9059_s27 }
0x10b8   :  { %3136 = vrot.lane.b32.xlu1 %v9589_v12, %s9059_s27 }
0x10bc   :  { %3232 = vrot.lane.b32.xlu1 %v9402_v20, %s9059_s27 }
0x112c   :  { %v3054_v34 = vpop.xlane.xlu1 %3053 }
0x112d   :  { %v3055_v36 = vsub.f32 %v3051_v1, %v3054_v34 }
0x112f   :  { %v3056_v40 = vmul.f32 1.442695, %v3055_v36 }
0x1130   :  { %v3139_v45 = vpop.permute.xlu1 %3138 }
0x1131   :  { %8901 = vpow2.f32 %v3056_v40 }
0x1134   :  { %v3137_v51 = vpop.permute.xlu1 %3136 }
0x1138   :  { %v3233_v39 = vpop.permute.xlu1 %3232 }
0x113e   :  { %v8902_v43 = vpop.eup %8901 }
0x113f   :  { %v3058_v38 = vsel %vm1353_vm3, %v8902_v43, 0.0 }
0x1140   :  { %3059 = vadd.xlane.f32.xlu0 %v3058_v38 }
0x1156   :  { %3140 = vrot.lane.b32.xlu0 %v9384_v9, %s9059_s27 }
0x11c9   :  { %v3060_v44 = vpop.xlane.xlu0 %3059 }
0x11ca   :  { %8903 = vrcp.f32 %v3060_v44 }
0x11cd   :  { %v3141_v42 = vpop.permute.xlu0 %3140 }
0x11d7   :  { %v8904_v46 = vpop.eup %8903 }
0x11d8   :  { %v3062_v47 = vmul.f32 %v8904_v46, %v8902_v43 }
0x11da   :  { %8472 = vmatmul.mubr.msk.f32.vlgmr.msra.gmra.mxu1 %vm1353_vm3, %v3062_v47 }
0x11db   :  { %8475 = vmatpush3.xpose.msk.msra.mxu1 %vm681_vm2, %v3141_v42  ;;  %8478 = vmatprep.mubr.msk.f32.mxu1 %vm9058_vm1, %v9057_v26 }
0x11dc   :  { %8476 = vmatprep.subr.mxu1 %v9057_v26 }
0x11df   :  { %8477 = vmatpush3.xpose.msk.msra.mxu1 %vm681_vm2, %v3139_v45 }
0x11e0   :  { %8495 = vmatprep.subr.mxu1 %v9057_v26 }
0x11e2   :  { %8479 = vmatmul.mubr.msk.f32.vlgmr.msra.gmra.mxu1 %vm681_vm2, %v3137_v51 }
0x11e3   :  { %8499 = vmatprep.mubr.msk.f32.mxu1 %vm9058_vm1, %v9057_v26 }
0x129a   :  { %v9716_v17 = vpop.f32.mrf.mxu1 }
0x129c   :  { %v8473_v23 = vpop.f32.mrf.mxu1 }
0x12a2   :  { %v3214_v13 = vpop.f32.mrf.mxu1 }
0x12a3   :  { %v3218_v56 = vmul.f32 0.35355338, %v3214_v13 }
0x12a4   :  { %v8480_v5 = vpop.f32.mrf.mxu1 }
0x12a5   :  { %v3219_v37 = vsel %vm1353_vm3, %v3218_v56, -inf }
0x12a6   :  { %3220 = vmax.xlane.f32.xlu0 %v3219_v37 }
0x12bc   :  { %3234 = vrot.lane.b32.xlu0 %v9399_v18, %s9059_s27 }
0x12c0   :  { %3315 = vrot.lane.b32.xlu0 %v9384_v9, %s9064_s11 }
0x12c4   :  { %3311 = vrot.lane.b32.xlu0 %v9589_v12, %s9064_s11 }
0x132f   :  { %v3221_v59 = vpop.xlane.xlu0 %3220 }
0x1330   :  { %v3222_v55 = vsub.f32 %v3218_v56, %v3221_v59 }
0x1332   :  { %v3223_v14 = vmul.f32 1.442695, %v3222_v55 }
0x1333   :  { %v3235_v60 = vpop.permute.xlu0 %3234 }
0x1334   :  { %8905 = vpow2.f32 %v3223_v14  ;;  %8482 = vmatpush3.msra.mxu0 %v3235_v60 }
0x1335   :  { %8483 = vmatprep.subr.mxu0 %v9057_v26 }
0x1336   :  { %8484 = vmatpush3.msra.mxu0 %v3233_v39 }
0x1337   :  { %8488 = vmatprep.subr.mxu0 %v9057_v26  ;;  %v3316_v63 = vpop.permute.xlu0 %3315 }
0x133b   :  { %v3312_v2 = vpop.permute.xlu0 %3311 }
0x1341   :  { %v8906_v53 = vpop.eup %8905 }
0x1342   :  { %v3225_v58 = vsel %vm1353_vm3, %v8906_v53, 0.0 }
0x1343   :  { %3226 = vadd.xlane.f32.xlu1 %v3225_v58 }
0x1354   :  { %3313 = vrot.lane.b32.xlu1 %v9387_v11, %s9064_s11 }
0x13cc   :  { %v3227_v6 = vpop.xlane.xlu1 %3226 }
0x13cd   :  { %8907 = vrcp.f32 %v3227_v6 }
0x13d0   :  { %v3314_v0 = vpop.permute.xlu1 %3313 }
0x13da   :  { %v8908_v7 = vpop.eup %8907 }
0x13db   :  { %v3229_v49 = vmul.f32 %v8908_v7, %v8906_v53  ;;  %v7801_v53 = vld [vmem:[%s10380_s3 + $0xa0] sm:$0xff] }
0x13dd   :  { %8486 = vmatmul.mubr.msk.f32.vlgmr.msra.gmra.mxu0 %vm1353_vm3, %v3229_v49 }
0x13de   :  { %8489 = vmatpush3.xpose.msk.msra.mxu0 %vm681_vm2, %v3316_v63  ;;  %8492 = vmatprep.mubr.msk.f32.mxu0 %vm9058_vm1, %v9057_v26 }
0x13df   :  { %8490 = vmatprep.subr.mxu0 %v9057_v26 }
0x13e2   :  { %8491 = vmatpush3.xpose.msk.msra.mxu0 %vm681_vm2, %v3314_v0 }
0x13e3   :  { %8509 = vmatprep.subr.mxu0 %v9057_v26 }
0x13e5   :  { %8493 = vmatmul.mubr.msk.f32.vlgmr.msra.gmra.mxu0 %vm681_vm2, %v3312_v2 }
0x13e6   :  { %8513 = vmatprep.mubr.msk.f32.mxu0 %vm9058_vm1, %v9057_v26 }
0x149d   :  { %v3307_v3 = vpop.f32.mrf.mxu0 }
0x149f   :  { %v8487_v8 = vpop.f32.mrf.mxu0 }
0x14a0   :  { %v7806_v8 = vld [vmem:[%s10383_s6 + $0x5] ss:$0 sm:$0xff] }
0x14a5   :  { %v3389_v10 = vpop.f32.mrf.mxu0 }
0x14a6   :  { %v3393_v15 = vmul.f32 0.35355338, %v3389_v10 }
0x14a7   :  { %v8494_v22 = vpop.f32.mrf.mxu0 }
0x14a8   :  { %v3394_v16 = vsel %vm1353_vm3, %v3393_v15, -inf }
0x14a9   :  { %3395 = vmax.xlane.f32.xlu1 %v3394_v16 }
0x14ba   :  { %3405 = vrot.lane.b32.xlu1 %v9402_v20, %s9064_s11 }
0x14be   :  { %3488 = vrot.lane.b32.xlu1 %v9384_v9, %s9065_s12 }
0x14c2   :  { %3484 = vrot.lane.b32.xlu1 %v9589_v12, %s9065_s12 }
0x1532   :  { %v3396_v61 = vpop.xlane.xlu1 %3395 }
0x1533   :  { %v3397_v54 = vsub.f32 %v3393_v15, %v3396_v61 }
0x1535   :  { %v3398_v19 = vmul.f32 1.442695, %v3397_v54 }
0x1536   :  { %v3406_v29 = vpop.permute.xlu1 %3405 }
0x1537   :  { %8909 = vpow2.f32 %v3398_v19 }
0x153a   :  { %v3489_v34 = vpop.permute.xlu1 %3488 }
0x153e   :  { %v3485_v36 = vpop.permute.xlu1 %3484 }
0x1544   :  { %v8910_v25 = vpop.eup %8909 }
0x1545   :  { %v3400_v57 = vsel %vm1353_vm3, %v8910_v25, 0.0 }
0x1546   :  { %3401 = vadd.xlane.f32.xlu0 %v3400_v57 }
0x155c   :  { %3407 = vrot.lane.b32.xlu0 %v9399_v18, %s9064_s11 }
0x1560   :  { %3486 = vrot.lane.b32.xlu0 %v9387_v11, %s9065_s12 }
0x15cf   :  { %v3402_v1 = vpop.xlane.xlu0 %3401 }
0x15d0   :  { %8911 = vrcp.f32 %v3402_v1 }
0x15d3   :  { %v3408_v9 = vpop.permute.xlu0 %3407 }
0x15d4   :  { %8496 = vmatpush3.msra.mxu1 %v3408_v9 }
0x15d5   :  { %8497 = vmatprep.subr.mxu1 %v9057_v26 }
0x15d6   :  { %8498 = vmatpush3.msra.mxu1 %v3406_v29 }
0x15d7   :  { %8502 = vmatprep.subr.mxu1 %v9057_v26  ;;  %v3487_v11 = vpop.permute.xlu0 %3486 }
0x15dd   :  { %v8912_v12 = vpop.eup %8911 }
0x15de   :  { %v3404_v32 = vmul.f32 %v8912_v12, %v8910_v25 }
0x15e0   :  { %8500 = vmatmul.mubr.msk.f32.vlgmr.msra.gmra.mxu1 %vm1353_vm3, %v3404_v32 }
0x15e1   :  { %8503 = vmatpush3.xpose.msk.msra.mxu1 %vm681_vm2, %v3489_v34  ;;  %8506 = vmatprep.mubr.msk.f32.mxu1 %vm9058_vm1, %v9057_v26 }
0x15e2   :  { %8504 = vmatprep.subr.mxu1 %v9057_v26 }
0x15e5   :  { %8505 = vmatpush3.xpose.msk.msra.mxu1 %vm681_vm2, %v3487_v11 }
0x15e8   :  { %8507 = vmatmul.mubr.msk.f32.vlgmr.msra.gmra.mxu1 %vm681_vm2, %v3485_v36  ;;  %v3817_v36 = vld [vmem:[#allocation2 + $0x30] sm:$0xff] }
0x16a0   :  { %v3480_v40 = vpop.f32.mrf.mxu1 }
0x16a2   :  { %v8501_v43 = vpop.f32.mrf.mxu1 }
0x16a3   :  { %v3815_v43 = vld [vmem:[#allocation2 + $0x20] sm:$0xff] }
0x16a8   :  { %v3562_v38 = vpop.f32.mrf.mxu1 }
0x16a9   :  { %v3566_v44 = vmul.f32 0.35355338, %v3562_v38  ;;  %v3917_v38 = vld [vmem:[#allocation4 + $0x38] sm:$0xff] }
0x16aa   :  { %v8508_v46 = vpop.f32.mrf.mxu1 }
0x16ab   :  { %v3567_v47 = vsel %vm1353_vm3, %v3566_v44, -inf  ;;  %v3915_v46 = vld [vmem:[#allocation4 + $0x28] sm:$0xff] }
0x16ac   :  { %3568 = vmax.xlane.f32.xlu0 %v3567_v47  ;;  %v3914_v47 = vld [vmem:[#allocation4 + $0x20] sm:$0xff] }
0x16c2   :  { %3580 = vrot.lane.b32.xlu0 %v9399_v18, %s9065_s12 }
0x16c6   :  { %2958 = vrot.lane.b32.xlu0 %v9643_v41, %s9055_s9 }
0x16ca   :  { %3658 = vrot.lane.b32.xlu0 %v3307_v3, %s9055_s9 }
0x16ce   :  { %3662 = vrot.lane.b32.xlu0 %v3480_v40, %s9066_s18  ;;  %v3816_v40 = vld [vmem:[#allocation2 + $0x28] sm:$0xff] }
0x1735   :  { %v3569_v42 = vpop.xlane.xlu0 %3568 }
0x1736   :  { %v3570_v45 = vsub.f32 %v3566_v44, %v3569_v42  ;;  %v3916_v44 = vld [vmem:[#allocation4 + $0x30] sm:$0xff] }
0x1738   :  { %v3571_v51 = vmul.f32 1.442695, %v3570_v45 }
0x1739   :  { %v3581_v23 = vpop.permute.xlu0 %3580 }
0x173a   :  { %8913 = vpow2.f32 %v3571_v51  ;;  %8510 = vmatpush3.msra.mxu0 %v3581_v23 }
0x173b   :  { %8511 = vmatprep.subr.mxu0 %v9057_v26 }
0x173d   :  { %v2959_v37 = vpop.permute.xlu0 %2958 }
0x173e   :  { %v2969_v14 = vsel %vm681_vm2, %v9615_v4, %v2959_v37  ;;  %v7802_v4 = vld [vmem:[%s10380_s3 + $0xa8] sm:$0xff] }
0x173f   :  { %v7812_v37 = vld [vmem:[%s10383_s6 + $0xa] ss:$0 sm:$0xff] }
0x1741   :  { %v3659_v7 = vpop.permute.xlu0 %3658 }
0x1742   :  { %v3669_v63 = vsel %vm681_vm2, %v9716_v17, %v3659_v7 }
0x1745   :  { %v3663_v49 = vpop.permute.xlu0 %3662 }
0x1746   :  { %v3670_v0 = vsel %vm1353_vm3, %v3669_v63, %v3663_v49 }
0x1747   :  { %v8914_v13 = vpop.eup %8913 }
0x1748   :  { %v3573_v56 = vsel %vm1353_vm3, %v8914_v13, 0.0 }
0x1749   :  { %3574 = vadd.xlane.f32.xlu1 %v3573_v56 }
0x175a   :  { %3578 = vrot.lane.b32.xlu1 %v9402_v20, %s9065_s12 }
0x175e   :  { %2962 = vrot.lane.b32.xlu1 %v9671_v62, %s9066_s18  ;;  %v7804_v62 = vld [vmem:[%s10380_s3 + $0xb8] sm:$0xff] }
0x1762   :  { %2966 = vrot.lane.b32.xlu1 %v9694_v52, %s9067_s19  ;;  %v7803_v52 = vld [vmem:[%s10380_s3 + $0xb0] sm:$0xff] }
0x17d2   :  { %v3575_v18 = vpop.xlane.xlu1 %3574 }
0x17d3   :  { %8915 = vrcp.f32 %v3575_v18 }
0x17d6   :  { %v3579_v41 = vpop.permute.xlu1 %3578 }
0x17d7   :  { %8512 = vmatpush3.msra.mxu0 %v3579_v41  ;;  %v7811_v41 = vld [vmem:[%s10383_s6 + $0x9] ss:$0 sm:$0xff] }
0x17d8   :  { %8516 = vmatprep.subr.mxu0 %v7804_v62 }
0x17da   :  { %v2963_v5 = vpop.permute.xlu1 %2962 }
0x17db   :  { %v2970_v20 = vsel %vm1353_vm3, %v2969_v14, %v2963_v5 }
0x17de   :  { %v2967_v55 = vpop.permute.xlu1 %2966 }
0x17df   :  { %v2971_v39 = vsel %vm1355_vm4, %v2970_v20, %v2967_v55 }
0x17e0   :  { %v8916_v59 = vpop.eup %8915 }
0x17e1   :  { %v3577_v60 = vmul.f32 %v8916_v59, %v8914_v13 }
0x17e3   :  { %8514 = vmatmul.mubr.msk.f32.vlgmr.msra.gmra.mxu0 %vm1353_vm3, %v3577_v60 }
0x17e4   :  { %8524 = vmatprep.mubr.msk.f32.mxu0 %vm88_vm0, %v2971_v39  ;;  %8517 = vmatpush3.msra.mxu0 %v7804_v62  ;;  %v3913_v62 = vld [vmem:[#allocation4 + $0x18] sm:$0xff] }
0x17e5   :  { %8518 = vmatprep.subr.mxu0 %v7803_v52 }
0x17e6   :  { %8519 = vmatpush3.msra.mxu0 %v7803_v52  ;;  %v3912_v52 = vld [vmem:[#allocation4 + $0x10] sm:$0xff] }
0x17e7   :  { %8520 = vmatprep.subr.mxu0 %v7802_v4 }
0x17e8   :  { %8521 = vmatpush3.msra.mxu0 %v7802_v4  ;;  %v3911_v4 = vld [vmem:[#allocation4 + $0x8] sm:$0xff] }
0x17e9   :  { %8522 = vmatprep.subr.mxu0 %v7801_v53 }
0x17ea   :  { %8523 = vmatpush3.msra.mxu0 %v7801_v53  ;;  %v3910_v53 = vld [vmem:[#allocation4] sm:$0xff] }
0x17eb   :  { %8538 = vmatprep.subr.mxu0 %v3917_v38 }
0x18a3   :  { %v3653_v58 = vpop.f32.mrf.mxu0 }
0x18a4   :  { %3666 = vrot.lane.b32.xlu1 %v3653_v58, %s9067_s19  ;;  %v7814_v58 = vld [vmem:[%s10382_s5 + $0x1] ss:$0 sm:$0xff] }
0x18a5   :  { %v8515_v6 = vpop.f32.mrf.mxu0 }
0x1916   :  { %v3667_v2 = vpop.permute.xlu1 %3666 }
0x1917   :  { %v3671_v3 = vsel %vm1355_vm4, %v3670_v0, %v3667_v2 }
0x1918   :  { %8525 = vmatmul.mubr.msk.f32.vlgmr.msra.gmra.mxu0 %vm88_vm0, %v3671_v3  ;;  %v7818_v3 = vld [vmem:[%s10383_s6 + $0x6] ss:$0 sm:$0xff] }
0x1919   :  { %8539 = vmatpush3.msra.mxu0 %v3917_v38 }
0x191a   :  { %8540 = vmatprep.subr.mxu0 %v3916_v44 }
0x191b   :  { %8541 = vmatpush3.msra.mxu0 %v3916_v44 }
0x191c   :  { %8542 = vmatprep.subr.mxu0 %v3915_v46 }
0x191d   :  { %8543 = vmatpush3.msra.mxu0 %v3915_v46 }
0x191e   :  { %8544 = vmatprep.subr.mxu0 %v3914_v47 }
0x191f   :  { %8545 = vmatpush3.msra.mxu0 %v3914_v47 }
0x1920   :  { %8546 = vmatprep.subr.mxu0 %v3913_v62 }
0x1921   :  { %8547 = vmatpush3.msra.mxu0 %v3913_v62  ;;  %v7831_v62 = vld [vmem:[%s10380_s3 + $0xd0] sm:$0xff] }
0x1922   :  { %8548 = vmatprep.subr.mxu0 %v3912_v52 }
0x1923   :  { %8549 = vmatpush3.msra.mxu0 %v3912_v52  ;;  %v7830_v52 = vld [vmem:[%s10380_s3 + $0xc8] sm:$0xff] }
0x1924   :  { %8550 = vmatprep.subr.mxu0 %v3911_v4 }
0x1925   :  { %8551 = vmatpush3.msra.mxu0 %v3911_v4  ;;  %v7829_v4 = vld [vmem:[%s10380_s3 + $0xc0] sm:$0xff] }
0x1926   :  { %8552 = vmatprep.subr.mxu0 %v3910_v53 }
0x1927   :  { %8553 = vmatpush3.msra.mxu0 %v3910_v53 }
0x1928   :  { %8579 = vmatprep.subr.mxu0 %v9057_v26 }
0x19d8   :  { %v8526_v10 = vpop.f32.mrf.mxu0 }
0x19d9   :  { %v3763_v15 = vadd.f32 %v8526_v10, %v7806_v8 }
0x19da   :  { %v3757_v22 = vpop.f32.mrf.mxu0 }
0x19db   :  { %v3767_v16 = vadd.f32 %v3763_v15, %v9566_v50  ;;  %v3758_v61 = vadd.f32 %v7806_v8, %v3757_v22 }
0x19dd   :  { %v3766_v54 = vadd.f32 %v3758_v61, %v9562_v48  ;;  %v3775_v17 = vsel %vm88_vm0, %v3767_v16, 0.0  ;;  %v3818_v48 = vld [vmem:[#allocation2 + $0x38] sm:$0xff] }
0x19de   :  { %3776 = vadd.xlane.f32.xlu1 %v3775_v17  ;;  %8527 = vmatprep.subr.mxu1 %v3818_v48 }
0x19df   :  { %v3772_v19 = vsel %vm88_vm0, %v3766_v54, 0.0  ;;  %8528 = vmatpush3.msra.mxu1 %v3818_v48  ;;  %v4061_v48 = vld [vmem:[#allocation2 + $0x50] sm:$0xff] }
0x19e0   :  { %3773 = vadd.xlane.f32.xlu0 %v3772_v19  ;;  %8529 = vmatprep.subr.mxu1 %v3817_v36 }
0x19e1   :  { %8530 = vmatpush3.msra.mxu1 %v3817_v36  ;;  %v4060_v36 = vld [vmem:[#allocation2 + $0x48] sm:$0xff] }
0x19e2   :  { %8531 = vmatprep.subr.mxu1 %v3816_v40 }
0x19e3   :  { %8532 = vmatpush3.msra.mxu1 %v3816_v40  ;;  %v4059_v40 = vld [vmem:[#allocation2 + $0x40] sm:$0xff] }
0x19e4   :  { %8533 = vmatprep.subr.mxu1 %v3815_v43 }
0x19e5   :  { %8534 = vmatpush3.msra.mxu1 %v3815_v43  ;;  %v7832_v43 = vld [vmem:[%s10380_s3 + $0xd8] sm:$0xff] }
0x1a67   :  { %v3777_v25 = vpop.xlane.xlu1 %3776 }
0x1a68   :  { %v3779_v57 = vmul.f32 0.03125, %v3777_v25 }
0x1a69   :  { %v3774_v1 = vpop.xlane.xlu0 %3773 }
0x1a6a   :  { %v3778_v9 = vmul.f32 0.03125, %v3774_v1  ;;  %v3781_v29 = vsub.f32 %v3767_v16, %v3779_v57 }
0x1a6c   :  { %v3780_v12 = vsub.f32 %v3766_v54, %v3778_v9  ;;  %v3783_v11 = vmul.f32 %v3781_v29, %v3781_v29 }
0x1a6e   :  { %v3782_v32 = vmul.f32 %v3780_v12, %v3780_v12  ;;  %v3787_v50 = vsel %vm88_vm0, %v3783_v11, 0.0 }
0x1a70   :  { %v3784_v34 = vsel %vm88_vm0, %v3782_v32, 0.0 }
0x1a71   :  { %3785 = vadd.xlane.f32.xlu0 %v3784_v34 }
0x1a75   :  { %3788 = vadd.xlane.f32.xlu0 %v3787_v50  ;;  %v4062_v50 = vld [vmem:[#allocation2 + $0x58] sm:$0xff] }
0x1a76   :  { %8557 = vmatprep.subr.mxu1 %v4062_v50 }
0x1afa   :  { %v3786_v42 = vpop.xlane.xlu0 %3785 }
0x1afb   :  { %v3790_v45 = vmul.f32 0.03125, %v3786_v42 }
0x1afd   :  { %v3792_v51 = vadd.f32 1e-05, %v3790_v45 }
0x1afe   :  { %v3789_v23 = vpop.xlane.xlu0 %3788 }
0x1aff   :  { %8917 = vrsqrt.f32 %v3792_v51  ;;  %v3791_v13 = vmul.f32 0.03125, %v3789_v23  ;;  %v7823_v23 = vld [vmem:[%s10383_s6 + $0xb] ss:$0 sm:$0xff] }
0x1b01   :  { %v3793_v56 = vadd.f32 1e-05, %v3791_v13 }
0x1b03   :  { %8919 = vrsqrt.f32 %v3793_v56 }
0x1b0c   :  { %v8918_v18 = vpop.eup %8917 }
0x1b0d   :  { %v3796_v5 = vmul.f32 %v8918_v18, %v3780_v12  ;;  %v7824_v18 = vld [vmem:[%s10383_s6 + $0xc] ss:$0 sm:$0xff] }
0x1b0f   :  { %v3804_v59 = vmul.f32 %v7811_v41, %v3796_v5 }
0x1b10   :  { %v8920_v55 = vpop.eup %8919 }
0x1b11   :  { %v3797_v14 = vmul.f32 %v8920_v55, %v3781_v29  ;;  %v3812_v60 = vadd.f32 %v7812_v37, %v3804_v59 }
0x1b13   :  { %v3805_v20 = vmul.f32 %v7811_v41, %v3797_v14  ;;  %8535 = vmatprep.mubr.msk.f32.mxu1 %vm88_vm0, %v3812_v60  ;;  %v9848_v14 = vld [vmem:[%s10377_s0 + $0x10] sm:$0xff] }
0x1b15   :  { %v3813_v39 = vadd.f32 %v7812_v37, %v3805_v20  ;;  %v9855_v20 = vld [vmem:[%s10377_s0 + $0x18] sm:$0xff] }
0x1b17   :  { %8536 = vmatmul.mubr.msk.f32.vlgmr.msra.gmra.mxu1 %vm88_vm0, %v3813_v39 }
0x1b18   :  { %8558 = vmatpush3.msra.mxu1 %v4062_v50 }
0x1b19   :  { %8559 = vmatprep.subr.mxu1 %v4061_v48 }
0x1b1a   :  { %8560 = vmatpush3.msra.mxu1 %v4061_v48 }
0x1b1b   :  { %8561 = vmatprep.subr.mxu1 %v4060_v36 }
0x1b1c   :  { %8562 = vmatpush3.msra.mxu1 %v4060_v36 }
0x1b1d   :  { %8563 = vmatprep.subr.mxu1 %v4059_v40 }
0x1b1e   :  { %8564 = vmatpush3.msra.mxu1 %v4059_v40 }
0x1b1f   :  { %8568 = vmatprep.subr.mxu1 %v7832_v43 }
0x1bd7   :  { %v8537_v6 = vpop.f32.mrf.mxu1 }
0x1bd8   :  { %v3905_v7 = vadd.f32 %v8537_v6, %v7814_v58 }
0x1bd9   :  { %v3899_v49 = vpop.f32.mrf.mxu1 }
0x1bda   :  { %v3900_v63 = vadd.f32 %v7814_v58, %v3899_v49  ;;  %v3909_v2 = vmax.f32 %v3905_v7, 0.0  ;;  %v7826_v58 = vld [vmem:[%s10382_s5 + $0x2] ss:$0 sm:$0xff]  ;;  %v7834_v49 = vld [vmem:[%s10383_s6 + $0xd] ss:$0 sm:$0xff] }
0x1bdc   :  { %v3908_v0 = vmax.f32 %v3900_v63, 0.0 }
0x1bde   :  { %8554 = vmatprep.mubr.msk.f32.mxu0 %vm3926_vm5, %v3908_v0 }
0x1bdf   :  { %8555 = vmatmul.mubr.msk.f32.vlgmr.msra.gmra.mxu0 %vm3926_vm5, %v3909_v2 }
0x1be0   :  { %8581 = vmatprep.mubr.msk.f32.mxu0 %vm9058_vm1, %v9057_v26 }
0x1c9f   :  { %v8556_v8 = vpop.f32.mrf.mxu0 }
0x1ca0   :  { %v4005_v10 = vadd.f32 %v8556_v8, %v7818_v3 }
0x1ca1   :  { %v3999_v15 = vpop.f32.mrf.mxu0 }
0x1ca2   :  { %v4009_v22 = vadd.f32 %v4005_v10, %v3813_v39  ;;  %v4000_v16 = vadd.f32 %v7818_v3, %v3999_v15 }
0x1ca4   :  { %v4008_v61 = vadd.f32 %v4000_v16, %v3812_v60  ;;  %v4017_v54 = vsel %vm88_vm0, %v4009_v22, 0.0 }
0x1ca5   :  { %4018 = vadd.xlane.f32.xlu0 %v4017_v54 }
0x1ca6   :  { %v4014_v17 = vsel %vm88_vm0, %v4008_v61, 0.0 }
0x1ca7   :  { %4015 = vadd.xlane.f32.xlu1 %v4014_v17 }
0x1d2e   :  { %v4019_v19 = vpop.xlane.xlu0 %4018 }
0x1d2f   :  { %v4021_v25 = vmul.f32 0.03125, %v4019_v19 }
0x1d30   :  { %v4016_v57 = vpop.xlane.xlu1 %4015 }
0x1d31   :  { %v4023_v1 = vsub.f32 %v4009_v22, %v4021_v25  ;;  %v4020_v9 = vmul.f32 0.03125, %v4016_v57 }
0x1d33   :  { %v4022_v29 = vsub.f32 %v4008_v61, %v4020_v9  ;;  %v4025_v12 = vmul.f32 %v4023_v1, %v4023_v1 }
0x1d35   :  { %v4029_v32 = vsel %vm88_vm0, %v4025_v12, 0.0  ;;  %v4024_v34 = vmul.f32 %v4022_v29, %v4022_v29 }
0x1d36   :  { %4030 = vadd.xlane.f32.xlu0 %v4029_v32 }
0x1d37   :  { %v4026_v11 = vsel %vm88_vm0, %v4024_v34, 0.0 }
0x1d38   :  { %4027 = vadd.xlane.f32.xlu1 %v4026_v11 }
0x1dbf   :  { %v4031_v38 = vpop.xlane.xlu0 %4030 }
0x1dc0   :  { %v4033_v44 = vmul.f32 0.03125, %v4031_v38 }
0x1dc1   :  { %v4028_v46 = vpop.xlane.xlu1 %4027 }
0x1dc2   :  { %v4035_v47 = vadd.f32 1e-05, %v4033_v44  ;;  %v4032_v42 = vmul.f32 0.03125, %v4028_v46 }
0x1dc4   :  { %8921 = vrsqrt.f32 %v4035_v47  ;;  %v4034_v45 = vadd.f32 1e-05, %v4032_v42 }
0x1dc6   :  { %8923 = vrsqrt.f32 %v4034_v45 }
0x1dd1   :  { %v8922_v51 = vpop.eup %8921 }
0x1dd2   :  { %v4039_v13 = vmul.f32 %v8922_v51, %v4023_v1 }
0x1dd3   :  { %v8924_v56 = vpop.eup %8923 }
0x1dd4   :  { %v4038_v41 = vmul.f32 %v8924_v56, %v4022_v29  ;;  %v4047_v5 = vmul.f32 %v7823_v23, %v4039_v13 }
0x1dd6   :  { %v4046_v37 = vmul.f32 %v7823_v23, %v4038_v41  ;;  %v9841_v59 = vadd.f32 %v7824_v18, %v4047_v5 }
0x1dd8   :  { %v9843_v55 = vadd.f32 %v7824_v18, %v4046_v37  ;;  %v4057_v39 = vadd.f32 %v9855_v20, %v9841_v59 }
0x1dda   :  { %v4056_v60 = vadd.f32 %v9848_v14, %v9843_v55 }
0x1ddc   :  { %8565 = vmatprep.mubr.msk.f32.mxu1 %vm88_vm0, %v4056_v60 }
0x1ddd   :  { %8566 = vmatmul.mubr.msk.f32.vlgmr.msra.gmra.mxu1 %vm88_vm0, %v4057_v39 }
0x1dde   :  { %8569 = vmatpush3.msra.mxu1 %v7832_v43  ;;  %8576 = vmatprep.mubr.msk.f32.mxu1 %vm88_vm0, %v9843_v55 }
0x1ddf   :  { %8570 = vmatprep.subr.mxu1 %v7831_v62 }
0x1de0   :  { %8571 = vmatpush3.msra.mxu1 %v7831_v62 }
0x1de1   :  { %8572 = vmatprep.subr.mxu1 %v7830_v52 }
0x1de2   :  { %8573 = vmatpush3.msra.mxu1 %v7830_v52 }
0x1de3   :  { %8574 = vmatprep.subr.mxu1 %v7829_v4 }
0x1de4   :  { %8575 = vmatpush3.msra.mxu1 %v7829_v4 }
0x1de5   :  { %8577 = vmatmul.mubr.msk.f32.vlgmr.msra.gmra.mxu1 %vm88_vm0, %v9841_v59  ;;  %8584 = vmatprep.subr.mxu1 %v9057_v26 }
0x1de6   :  { %8586 = vmatprep.mubr.msk.f32.mxu1 %vm9058_vm1, %v9057_v26 }
0x1e9d   :  { %v8567_v53 = vpop.f32.mrf.mxu1 }
0x1e9e   :  { %v4149_v8 = vadd.f32 %v8567_v53, %v7826_v58 }
0x1e9f   :  { %v4143_v6 = vpop.f32.mrf.mxu1 }
0x1ea0   :  { %v4144_v7 = vadd.f32 %v7826_v58, %v4143_v6 }
0x1ea2   :  { %4410 = vrot.lane.b32.xlu0 %v4144_v7, %s9062_s30  ;;  %4247 = vrot.lane.b32.xlu1 %v4144_v7, %s9060_s28 }
0x1ea5   :  { %v8578_v63 = vpop.f32.mrf.mxu1 }
0x1ea6   :  { %v9885_v0 = vadd.f32 %v8578_v63, %v7834_v49  ;;  %4575 = vrot.lane.b32.xlu0 %v4144_v7, %s9064_s11  ;;  %4408 = vrot.lane.b32.xlu1 %v4144_v7, %s9059_s27 }
0x1ea7   :  { %v4237_v2 = vpop.f32.mrf.mxu1 }
0x1ea8   :  { %v9889_v3 = vadd.f32 %v7834_v49, %v4237_v2 }
0x1eaa   :  { %8585 = vmatpush3.msra.mxu1 %v9889_v3  ;;  %4741 = vrot.lane.b32.xlu0 %v4144_v7, %s9065_s12 }
0x1eab   :  { %4577 = vrot.lane.b32.xlu1 %v4144_v7, %s9061_s29  ;;  %8594 = vmatprep.subr.mxu1 %v9057_v26 }
0x1eae   :  { %5086 = vrot.lane.b32.xlu0 %v4149_v8, %s9062_s30 }
0x1eaf   :  { %4743 = vrot.lane.b32.xlu1 %v4144_v7, %s9063_s10 }
0x1eb2   :  { %5253 = vrot.lane.b32.xlu0 %v4149_v8, %s9061_s29 }
0x1eb3   :  { %4923 = vrot.lane.b32.xlu1 %v4149_v8, %s9060_s28 }
0x1eb6   :  { %5419 = vrot.lane.b32.xlu0 %v4149_v8, %s9063_s10 }
0x1eb7   :  { %5084 = vrot.lane.b32.xlu1 %v4149_v8, %s9059_s27 }
0x1ebb   :  { %5251 = vrot.lane.b32.xlu1 %v4149_v8, %s9064_s11 }
0x1ebf   :  { %5417 = vrot.lane.b32.xlu1 %v4149_v8, %s9065_s12 }
0x1f14   :  { %v4411_v10 = vpop.permute.xlu0 %4410  ;;  %v4248_v15 = vpop.permute.xlu1 %4247 }
0x1f15   :  { %8580 = vmatpush3.xpose.msk.msra.mxu0 %vm681_vm2, %v4248_v15 }
0x1f16   :  { %8589 = vmatprep.subr.mxu0 %v9057_v26 }
0x1f18   :  { %8582 = vmatmul.mubr.msk.f32.vlgmr.msra.gmra.mxu0 %vm681_vm2, %v4144_v7  ;;  %v4409_v22 = vpop.permute.xlu1 %4408  ;;  %v4576_v16 = vpop.permute.xlu0 %4575 }
0x1f19   :  { %8590 = vmatpush3.xpose.msk.msra.mxu0 %vm681_vm2, %v4411_v10  ;;  %8591 = vmatprep.mubr.msk.f32.mxu0 %vm9058_vm1, %v9057_v26 }
0x1f1a   :  { %8599 = vmatprep.subr.mxu0 %v9057_v26 }
0x1f1c   :  { %8592 = vmatmul.mubr.msk.f32.vlgmr.msra.gmra.mxu0 %vm681_vm2, %v4409_v22  ;;  %v4742_v54 = vpop.permute.xlu0 %4741 }
0x1f1d   :  { %v4578_v61 = vpop.permute.xlu1 %4577  ;;  %8601 = vmatprep.mubr.msk.f32.mxu0 %vm9058_vm1, %v9057_v26 }
0x1f1e   :  { %8600 = vmatpush3.xpose.msk.msra.mxu0 %vm681_vm2, %v4578_v61 }
0x1f1f   :  { %8609 = vmatprep.subr.mxu0 %v9057_v26 }
0x1f20   :  { %v5087_v19 = vpop.permute.xlu0 %5086 }
0x1f21   :  { %8602 = vmatmul.mubr.msk.f32.vlgmr.msra.gmra.mxu0 %vm681_vm2, %v4576_v16  ;;  %v4744_v17 = vpop.permute.xlu1 %4743 }
0x1f22   :  { %8610 = vmatpush3.xpose.msk.msra.mxu0 %vm681_vm2, %v4744_v17  ;;  %8611 = vmatprep.mubr.msk.f32.mxu0 %vm9058_vm1, %v9057_v26 }
0x1f23   :  { %8619 = vmatprep.subr.mxu0 %v9057_v26 }
0x1f24   :  { %v5254_v1 = vpop.permute.xlu0 %5253 }
0x1f25   :  { %8612 = vmatmul.mubr.msk.f32.vlgmr.msra.gmra.mxu0 %vm681_vm2, %v4742_v54  ;;  %v4924_v25 = vpop.permute.xlu1 %4923 }
0x1f26   :  { %8620 = vmatpush3.xpose.msk.msra.mxu0 %vm681_vm2, %v4924_v25  ;;  %8621 = vmatprep.mubr.msk.f32.mxu0 %vm9058_vm1, %v9057_v26 }
0x1f27   :  { %8629 = vmatprep.subr.mxu0 %v9057_v26 }
0x1f28   :  { %v5420_v29 = vpop.permute.xlu0 %5419 }
0x1f29   :  { %8622 = vmatmul.mubr.msk.f32.vlgmr.msra.gmra.mxu0 %vm681_vm2, %v4149_v8  ;;  %v5085_v57 = vpop.permute.xlu1 %5084 }
0x1f2a   :  { %8630 = vmatpush3.xpose.msk.msra.mxu0 %vm681_vm2, %v5087_v19  ;;  %8631 = vmatprep.mubr.msk.f32.mxu0 %vm9058_vm1, %v9057_v26 }
0x1f2b   :  { %8639 = vmatprep.subr.mxu0 %v9057_v26 }
0x1f2d   :  { %8632 = vmatmul.mubr.msk.f32.vlgmr.msra.gmra.mxu0 %vm681_vm2, %v5085_v57  ;;  %v5252_v9 = vpop.permute.xlu1 %5251 }
0x1f2e   :  { %8640 = vmatpush3.xpose.msk.msra.mxu0 %vm681_vm2, %v5254_v1  ;;  %8641 = vmatprep.mubr.msk.f32.mxu0 %vm9058_vm1, %v9057_v26 }
0x1f2f   :  { %8649 = vmatprep.subr.mxu0 %v9057_v26 }
0x1f31   :  { %8642 = vmatmul.mubr.msk.f32.vlgmr.msra.gmra.mxu0 %vm681_vm2, %v5252_v9  ;;  %v5418_v12 = vpop.permute.xlu1 %5417 }
0x1f32   :  { %8650 = vmatpush3.xpose.msk.msra.mxu0 %vm681_vm2, %v5420_v29  ;;  %8651 = vmatprep.mubr.msk.f32.mxu0 %vm9058_vm1, %v9057_v26 }
0x1f35   :  { %8652 = vmatmul.mubr.msk.f32.vlgmr.msra.gmra.mxu0 %vm681_vm2, %v5418_v12 }
0x1fd8   :  { %v4319_v32 = vpop.f32.mrf.mxu0 }
0x1fd9   :  { %v4323_v34 = vmul.f32 0.35355338, %v4319_v32 }
0x1fda   :  { %v8583_v11 = vpop.f32.mrf.mxu0 }
0x1fdb   :  { %v4324_v50 = vsel %vm681_vm2, %v4323_v34, -inf }
0x1fdc   :  { %4325 = vmax.xlane.f32.xlu0 %v4324_v50  ;;  %v4482_v48 = vpop.f32.mrf.mxu0 }
0x1fdd   :  { %v4486_v36 = vmul.f32 0.35355338, %v4482_v48 }
0x1fde   :  { %v8593_v40 = vpop.f32.mrf.mxu0 }
0x1fdf   :  { %v4487_v43 = vsel %vm681_vm2, %v4486_v36, -inf }
0x1fe0   :  { %4488 = vmax.xlane.f32.xlu1 %v4487_v43 }
0x1fe1   :  { %v4649_v38 = vpop.f32.mrf.mxu0 }
0x1fe2   :  { %v4653_v44 = vmul.f32 0.35355338, %v4649_v38 }
0x1fe3   :  { %v8603_v46 = vpop.f32.mrf.mxu0 }
0x1fe4   :  { %v4654_v47 = vsel %vm681_vm2, %v4653_v44, -inf }
0x1fe5   :  { %4655 = vmax.xlane.f32.xlu0 %v4654_v47  ;;  %v4815_v42 = vpop.f32.mrf.mxu0 }
0x1fe6   :  { %v4819_v45 = vmul.f32 0.35355338, %v4815_v42 }
0x1fe7   :  { %v8613_v51 = vpop.f32.mrf.mxu0 }
0x1fe8   :  { %v4820_v23 = vsel %vm681_vm2, %v4819_v45, -inf }
0x1fe9   :  { %4821 = vmax.xlane.f32.xlu0 %v4820_v23  ;;  %v4995_v13 = vpop.f32.mrf.mxu0 }
0x1fea   :  { %v9944_v56 = vmul.f32 0.35355338, %v4995_v13 }
0x1feb   :  { %v8623_v18 = vpop.f32.mrf.mxu0 }
0x1fec   :  { %v5000_v41 = vsel %vm681_vm2, %v9944_v56, -inf }
0x1fed   :  { %5001 = vmax.xlane.f32.xlu1 %v5000_v41  ;;  %v5158_v5 = vpop.f32.mrf.mxu0 }
0x1fee   :  { %v5162_v37 = vmul.f32 0.35355338, %v5158_v5 }
0x1fef   :  { %v8633_v60 = vpop.f32.mrf.mxu0 }
0x1ff0   :  { %v5163_v39 = vsel %vm681_vm2, %v5162_v37, -inf }
0x1ff1   :  { %5164 = vmax.xlane.f32.xlu0 %v5163_v39  ;;  %v5325_v62 = vpop.f32.mrf.mxu0 }
0x1ff2   :  { %v5329_v52 = vmul.f32 0.35355338, %v5325_v62 }
0x1ff3   :  { %v8643_v4 = vpop.f32.mrf.mxu0 }
0x1ff4   :  { %v5330_v53 = vsel %vm681_vm2, %v5329_v52, -inf }
0x1ff5   :  { %5331 = vmax.xlane.f32.xlu1 %v5330_v53  ;;  %v5491_v58 = vpop.f32.mrf.mxu0 }
0x1ff6   :  { %v5495_v6 = vmul.f32 0.35355338, %v5491_v58 }
0x1ff7   :  { %v8653_v7 = vpop.f32.mrf.mxu0 }
0x1ff8   :  { %v5496_v49 = vsel %vm681_vm2, %v5495_v6, -inf }
0x1ff9   :  { %5497 = vmax.xlane.f32.xlu0 %v5496_v49 }
0x2006   :  { %4499 = vrot.lane.b32.xlu1 %v9889_v3, %s9059_s27 }
0x2065   :  { %v4326_v63 = vpop.xlane.xlu0 %4325 }
0x2066   :  { %v4327_v2 = vsub.f32 %v4323_v34, %v4326_v63 }
0x2068   :  { %v4328_v8 = vmul.f32 1.442695, %v4327_v2 }
0x2069   :  { %v4489_v10 = vpop.xlane.xlu1 %4488 }
0x206a   :  { %8925 = vpow2.f32 %v4328_v8  ;;  %v4490_v15 = vsub.f32 %v4486_v36, %v4489_v10 }
0x206c   :  { %v4491_v22 = vmul.f32 1.442695, %v4490_v15 }
0x206e   :  { %8927 = vpow2.f32 %v4491_v22  ;;  %v4656_v19 = vpop.xlane.xlu0 %4655 }
0x206f   :  { %v4657_v25 = vsub.f32 %v4653_v44, %v4656_v19 }
0x2071   :  { %v4658_v1 = vmul.f32 1.442695, %v4657_v25 }
0x2072   :  { %v4822_v57 = vpop.xlane.xlu0 %4821 }
0x2073   :  { %v4823_v9 = vsub.f32 %v4819_v45, %v4822_v57  ;;  %8929 = vpow2.f32 %v4658_v1 }
0x2075   :  { %v4824_v12 = vmul.f32 1.442695, %v4823_v9 }
0x2076   :  { %v5002_v42 = vpop.xlane.xlu1 %5001 }
0x2077   :  { %v8926_v16 = vpop.eup %8925  ;;  %8931 = vpow2.f32 %v4824_v12  ;;  %v5003_v45 = vsub.f32 %v9944_v56, %v5002_v42  ;;  %v7861_v42 = vld [vmem:[%s10380_s3 + $0xe0] sm:$0xff] }
0x2078   :  { %v4330_v61 = vsel %vm681_vm2, %v8926_v16, 0.0 }
0x2079   :  { %4331 = vadd.xlane.f32.xlu1 %v4330_v61  ;;  %v5004_v23 = vmul.f32 1.442695, %v5003_v45 }
0x207a   :  { %v5165_v29 = vpop.xlane.xlu0 %5164 }
0x207b   :  { %v8928_v54 = vpop.eup %8927  ;;  %v5166_v32 = vsub.f32 %v5162_v37, %v5165_v29 }
0x207c   :  { %v4493_v17 = vsel %vm681_vm2, %v8928_v54, 0.0 }
0x207d   :  { %4494 = vadd.xlane.f32.xlu0 %v4493_v17  ;;  %v5167_v11 = vmul.f32 1.442695, %v5166_v32 }
0x207e   :  { %v5332_v51 = vpop.xlane.xlu1 %5331 }
0x207f   :  { %8933 = vpow2.f32 %v5167_v11  ;;  %v5333_v13 = vsub.f32 %v5329_v52, %v5332_v51 }
0x2080   :  { %v8930_v36 = vpop.eup %8929 }
0x2081   :  { %v4660_v40 = vsel %vm681_vm2, %v8930_v36, 0.0  ;;  %v5334_v18 = vmul.f32 1.442695, %v5333_v13 }
0x2082   :  { %v5498_v34 = vpop.xlane.xlu0 %5497  ;;  %v4500_v56 = vpop.permute.xlu1 %4499 }
0x2083   :  { %v5499_v50 = vsub.f32 %v5495_v6, %v5498_v34 }
0x2084   :  { %v8932_v43 = vpop.eup %8931 }
0x2085   :  { %v5500_v48 = vmul.f32 1.442695, %v5499_v50 }
0x2087   :  { %8935 = vpow2.f32 %v5500_v48 }
0x2088   :  { %8937 = vpow2.f32 %v5004_v23 }
0x2089   :  { %8939 = vpow2.f32 %v5334_v18 }
0x208a   :  { %4831 = vrot.lane.b32.xlu1 %v9889_v3, %s9065_s12 }
0x208c   :  { %v9961_v38 = vpop.eup %8933 }
0x208d   :  { %v5169_v44 = vsel %vm681_vm2, %v9961_v38, 0.0 }
0x2093   :  { %4665 = vrot.lane.b32.xlu0 %v9889_v3, %s9064_s11  ;;  %v4826_v3 = vsel %vm681_vm2, %v8932_v43, 0.0 }
0x2094   :  { %v9965_v46 = vpop.eup %8935 }
0x2095   :  { %v5502_v47 = vsel %vm681_vm2, %v9965_v46, 0.0  ;;  %v8938_v41 = vpop.eup %8937 }
0x2096   :  { %v5006_v5 = vsel %vm681_vm2, %v8938_v41, 0.0  ;;  %v9975_v37 = vpop.eup %8939 }
0x2097   :  { %v5336_v60 = vsel %vm681_vm2, %v9975_v37, 0.0 }
0x20ae   :  { %4661 = vadd.xlane.f32.xlu1 %v4660_v40 }
0x20b2   :  { %4827 = vadd.xlane.f32.xlu0 %v4826_v3 }
0x20b6   :  { %5170 = vadd.xlane.f32.xlu0 %v5169_v44  ;;  %v7864_v44 = vld [vmem:[%s10380_s3 + $0xf8] sm:$0xff] }
0x20b7   :  { %8659 = vmatprep.subr.mxu0 %v7864_v44 }
0x20b8   :  { %8660 = vmatpush3.msra.mxu0 %v7864_v44 }
0x20ba   :  { %5503 = vadd.xlane.f32.xlu0 %v5502_v47  ;;  %v7862_v47 = vld [vmem:[%s10380_s3 + $0xe8] sm:$0xff] }
0x20bf   :  { %5175 = vrot.lane.b32.xlu1 %v9885_v0, %s9059_s27 }
0x20d0   :  { %5341 = vrot.lane.b32.xlu0 %v9885_v0, %s9064_s11 }
0x20e3   :  { %5007 = vadd.xlane.f32.xlu1 %v5006_v5 }
0x20e7   :  { %5337 = vadd.xlane.f32.xlu1 %v5336_v60 }
0x20f8   :  { %5507 = vrot.lane.b32.xlu1 %v9885_v0, %s9065_s12 }
0x2102   :  { %v4332_v39 = vpop.xlane.xlu1 %4331 }
0x2103   :  { %8941 = vrcp.f32 %v4332_v39 }
0x2106   :  { %v4495_v62 = vpop.xlane.xlu0 %4494  ;;  %v4832_v7 = vpop.permute.xlu1 %4831 }
0x2107   :  { %8943 = vrcp.f32 %v4495_v62 }
0x210a   :  { %v4666_v6 = vpop.permute.xlu0 %4665 }
0x2110   :  { %v8942_v52 = vpop.eup %8941 }
0x2111   :  { %v4334_v4 = vmul.f32 %v8942_v52, %v8926_v16 }
0x2113   :  { %8587 = vmatmul.mubr.msk.f32.vlgmr.msra.gmra.mxu1 %vm681_vm2, %v4334_v4 }
0x2114   :  { %v8944_v53 = vpop.eup %8943  ;;  %8595 = vmatpush3.msra.mxu1 %v4500_v56  ;;  %8596 = vmatprep.mubr.msk.f32.mxu1 %vm9058_vm1, %v9057_v26 }
0x2115   :  { %8604 = vmatprep.subr.mxu1 %v9057_v26  ;;  %v4497_v58 = vmul.f32 %v8944_v53, %v8928_v54 }
0x2117   :  { %8597 = vmatmul.mubr.msk.f32.vlgmr.msra.gmra.mxu1 %vm681_vm2, %v4497_v58 }
0x2118   :  { %8605 = vmatpush3.msra.mxu1 %v4666_v6  ;;  %8606 = vmatprep.mubr.msk.f32.mxu1 %vm9058_vm1, %v9057_v26 }
0x2119   :  { %8614 = vmatprep.subr.mxu1 %v9057_v26 }
0x2137   :  { %v4662_v49 = vpop.xlane.xlu1 %4661 }
0x2138   :  { %8945 = vrcp.f32 %v4662_v49 }
0x213b   :  { %v4828_v63 = vpop.xlane.xlu0 %4827  ;;  %v5176_v22 = vpop.permute.xlu1 %5175 }
0x213c   :  { %8947 = vrcp.f32 %v4828_v63  ;;  %v9007_v63 = vld [vmem:[%s10383_s6 + $0x10] ss:$0 sm:$0xff] }
0x213f   :  { %v5171_v16 = vpop.xlane.xlu0 %5170 }
0x2143   :  { %v5504_v17 = vpop.xlane.xlu0 %5503 }
0x2145   :  { %v8946_v2 = vpop.eup %8945 }
0x2146   :  { %v4664_v8 = vmul.f32 %v8946_v2, %v8930_v36  ;;  %v10042_v2 = vadd.f32 %v9007_v63, %v9210_v27  ;;  %v7866_v27 = vld [vmem:[%s10383_s6 + $0xe] ss:$0 sm:$0xff] }
0x2147   :  { %v5342_v9 = vpop.permute.xlu0 %5341 }
0x2148   :  { %8607 = vmatmul.mubr.msk.f32.vlgmr.msra.gmra.mxu1 %vm681_vm2, %v4664_v8 }
0x2149   :  { %v8948_v10 = vpop.eup %8947  ;;  %8615 = vmatpush3.msra.mxu1 %v4832_v7  ;;  %8616 = vmatprep.mubr.msk.f32.mxu1 %vm9058_vm1, %v9057_v26 }
0x214a   :  { %8624 = vmatprep.subr.mxu1 %v9057_v26  ;;  %v4830_v15 = vmul.f32 %v8948_v10, %v8932_v43  ;;  %v10052_v10 = vadd.f32 %v9007_v63, %v9214_v28 }
0x214c   :  { %8617 = vmatmul.mubr.msk.f32.vlgmr.msra.gmra.mxu1 %vm681_vm2, %v4830_v15 }
0x214d   :  { %8625 = vmatpush3.msra.mxu1 %v9885_v0  ;;  %8626 = vmatprep.mubr.msk.f32.mxu1 %vm9058_vm1, %v9057_v26 }
0x214e   :  { %8634 = vmatprep.subr.mxu1 %v9057_v26 }
0x216c   :  { %v5008_v61 = vpop.xlane.xlu1 %5007 }
0x216d   :  { %8949 = vrcp.f32 %v5008_v61 }
0x216e   :  { %8951 = vrcp.f32 %v5171_v16 }
0x2170   :  { %v5338_v54 = vpop.xlane.xlu1 %5337 }
0x2171   :  { %8953 = vrcp.f32 %v5338_v54 }
0x2172   :  { %8955 = vrcp.f32 %v5504_v17 }
0x2174   :  { %v5508_v32 = vpop.permute.xlu1 %5507 }
0x217a   :  { %v8950_v19 = vpop.eup %8949 }
0x217b   :  { %v5010_v25 = vmul.f32 %v8950_v19, %v8938_v41  ;;  %v8952_v57 = vpop.eup %8951 }
0x217c   :  { %v5173_v0 = vmul.f32 %v8952_v57, %v9961_v38 }
0x217d   :  { %8627 = vmatmul.mubr.msk.f32.vlgmr.msra.gmra.mxu1 %vm681_vm2, %v5010_v25 }
0x217e   :  { %8635 = vmatpush3.msra.mxu1 %v5176_v22  ;;  %8636 = vmatprep.mubr.msk.f32.mxu1 %vm9058_vm1, %v9057_v26  ;;  %v8954_v1 = vpop.eup %8953 }
0x217f   :  { %8644 = vmatprep.subr.mxu1 %v9057_v26  ;;  %v5340_v29 = vmul.f32 %v8954_v1, %v9975_v37  ;;  %v8956_v12 = vpop.eup %8955 }
0x2180   :  { %v5506_v34 = vmul.f32 %v8956_v12, %v9965_v46  ;;  %v7863_v46 = vld [vmem:[%s10380_s3 + $0xf0] sm:$0xff] }
0x2181   :  { %8637 = vmatmul.mubr.msk.f32.vlgmr.msra.gmra.mxu1 %vm681_vm2, %v5173_v0  ;;  %8661 = vmatprep.subr.mxu0 %v7863_v46 }
0x2182   :  { %8645 = vmatpush3.msra.mxu1 %v5342_v9  ;;  %8646 = vmatprep.mubr.msk.f32.mxu1 %vm9058_vm1, %v9057_v26 }
0x2183   :  { %8654 = vmatprep.subr.mxu1 %v9057_v26  ;;  %8662 = vmatpush3.msra.mxu0 %v7863_v46 }
0x2184   :  { %8663 = vmatprep.subr.mxu0 %v7862_v47 }
0x2185   :  { %8647 = vmatmul.mubr.msk.f32.vlgmr.msra.gmra.mxu1 %vm681_vm2, %v5340_v29  ;;  %8664 = vmatpush3.msra.mxu0 %v7862_v47  ;;  %v7871_v47 = vld [vmem:[%s10383_s6 + $0x14] ss:$0 sm:$0xff] }
0x2186   :  { %8655 = vmatpush3.msra.mxu1 %v5508_v32  ;;  %8656 = vmatprep.mubr.msk.f32.mxu1 %vm9058_vm1, %v9057_v26 }
0x2187   :  { %8665 = vmatprep.subr.mxu0 %v7861_v42 }
0x2188   :  { %8666 = vmatpush3.msra.mxu0 %v7861_v42 }
0x2189   :  { %8657 = vmatmul.mubr.msk.f32.vlgmr.msra.gmra.mxu1 %vm681_vm2, %v5506_v34  ;;  %8681 = vmatprep.subr.mxu0 %v9057_v26 }
0x21d3   :  { %v4404_v11 = vpop.f32.mrf.mxu1 }
0x21d5   :  { %v8588_v50 = vpop.f32.mrf.mxu1 }
0x21d6   :  { %v7874_v50 = vld [vmem:[%s10380_s3 + $0x108] sm:$0xff] }
0x21d7   :  { %v4571_v48 = vpop.f32.mrf.mxu1 }
0x21d8   :  { %4908 = vrot.lane.b32.xlu0 %v4571_v48, %s9055_s9  ;;  %v7873_v48 = vld [vmem:[%s10380_s3 + $0x100] sm:$0xff] }
0x21d9   :  { %v8598_v36 = vpop.f32.mrf.mxu1 }
0x2208   :  { %v4737_v40 = vpop.f32.mrf.mxu1 }
0x2209   :  { %4912 = vrot.lane.b32.xlu1 %v4737_v40, %s9066_s18 }
0x220a   :  { %v8608_v43 = vpop.f32.mrf.mxu1 }
0x220c   :  { %v4903_v3 = vpop.f32.mrf.mxu1 }
0x220d   :  { %4916 = vrot.lane.b32.xlu1 %v4903_v3, %s9067_s19 }
0x220e   :  { %v8618_v38 = vpop.f32.mrf.mxu1 }
0x223d   :  { %v5080_v45 = vpop.f32.mrf.mxu1 }
0x223f   :  { %v8628_v51 = vpop.f32.mrf.mxu1 }
0x2241   :  { %v5247_v23 = vpop.f32.mrf.mxu1 }
0x2242   :  { %5584 = vrot.lane.b32.xlu0 %v5247_v23, %s9055_s9 }
0x2243   :  { %v8638_v13 = vpop.f32.mrf.mxu1 }
0x2245   :  { %v5413_v18 = vpop.f32.mrf.mxu1 }
0x2246   :  { %5588 = vrot.lane.b32.xlu0 %v5413_v18, %s9066_s18 }
0x2247   :  { %v8648_v41 = vpop.f32.mrf.mxu1 }
0x2249   :  { %v5579_v5 = vpop.f32.mrf.mxu1 }
0x224a   :  { %5592 = vrot.lane.b32.xlu1 %v5579_v5, %s9067_s19  ;;  %v4909_v60 = vpop.permute.xlu0 %4908 }
0x224b   :  { %v8658_v37 = vpop.f32.mrf.mxu1  ;;  %v4919_v39 = vsel %vm681_vm2, %v4404_v11, %v4909_v60  ;;  %v7875_v11 = vld [vmem:[%s10380_s3 + $0x110] sm:$0xff] }
0x227b   :  { %v4913_v56 = vpop.permute.xlu1 %4912 }
0x227c   :  { %v4920_v62 = vsel %vm1353_vm3, %v4919_v39, %v4913_v56  ;;  %v9008_v56 = vld [vmem:[%s10383_s6 + $0x11] ss:$0 sm:$0xff] }
0x227d   :  { %v10098_v39 = vadd.f32 %v9008_v56, %v9404_v21  ;;  %v7878_v21 = vld [vmem:[%s10383_s6 + $0xf] ss:$0 sm:$0xff] }
0x227f   :  { %v4917_v52 = vpop.permute.xlu1 %4916 }
0x2280   :  { %v4921_v4 = vsel %vm1355_vm4, %v4920_v62, %v4917_v52  ;;  %v10102_v62 = vadd.f32 %v9008_v56, %v9406_v24 }
0x2281   :  { %8667 = vmatprep.mubr.msk.f32.mxu0 %vm88_vm0, %v4921_v4 }
0x22b4   :  { %v5585_v53 = vpop.permute.xlu0 %5584 }
0x22b5   :  { %v5595_v6 = vsel %vm681_vm2, %v5080_v45, %v5585_v53  ;;  %v7872_v45 = vld [vmem:[%s10383_s6 + $0x15] ss:$0 sm:$0xff] }
0x22b8   :  { %v5589_v58 = vpop.permute.xlu0 %5588 }
0x22b9   :  { %v5596_v7 = vsel %vm1353_vm3, %v5595_v6, %v5589_v58 }
0x22bc   :  { %v5593_v49 = vpop.permute.xlu1 %5592 }
0x22bd   :  { %v5597_v8 = vsel %vm1355_vm4, %v5596_v7, %v5593_v49 }
0x22be   :  { %8668 = vmatmul.mubr.msk.f32.vlgmr.msra.gmra.mxu0 %vm88_vm0, %v5597_v8 }
0x22bf   :  { %8682 = vmatpush3.xpose.msk.msra.mxu0 %vm681_vm2, %v10042_v2  ;;  %8685 = vmatprep.mubr.msk.f32.mxu0 %vm9058_vm1, %v9057_v26 }
0x22c0   :  { %8683 = vmatprep.subr.mxu0 %v9057_v26 }
0x22c3   :  { %8684 = vmatpush3.xpose.msk.msra.mxu0 %vm681_vm2, %v10052_v10 }
0x22c4   :  { %8702 = vmatprep.subr.mxu0 %v9057_v26 }
0x237e   :  { %v8669_v15 = vpop.f32.mrf.mxu0 }
0x237f   :  { %v5689_v22 = vadd.f32 %v8669_v15, %v7866_v27 }
0x2380   :  { %v5683_v16 = vpop.f32.mrf.mxu0 }
0x2381   :  { %v5693_v61 = vadd.f32 %v5689_v22, %v9841_v59  ;;  %v5684_v54 = vadd.f32 %v7866_v27, %v5683_v16 }
0x2383   :  { %v5692_v17 = vadd.f32 %v5684_v54, %v9843_v55  ;;  %v5701_v28 = vsel %vm88_vm0, %v5693_v61, 0.0  ;;  %v7876_v55 = vld [vmem:[%s10380_s3 + $0x118] sm:$0xff] }
0x2384   :  { %5702 = vadd.xlane.f32.xlu1 %v5701_v28  ;;  %8670 = vmatprep.subr.mxu1 %v7876_v55 }
0x2385   :  { %v5698_v19 = vsel %vm88_vm0, %v5692_v17, 0.0  ;;  %8671 = vmatpush3.msra.mxu1 %v7876_v55 }
0x2386   :  { %5699 = vadd.xlane.f32.xlu0 %v5698_v19  ;;  %8672 = vmatprep.subr.mxu1 %v7875_v11 }
0x2387   :  { %8673 = vmatpush3.msra.mxu1 %v7875_v11 }
0x2388   :  { %8674 = vmatprep.subr.mxu1 %v7874_v50 }
0x2389   :  { %8675 = vmatpush3.msra.mxu1 %v7874_v50 }
0x238a   :  { %8676 = vmatprep.subr.mxu1 %v7873_v48 }
0x238b   :  { %8677 = vmatpush3.msra.mxu1 %v7873_v48 }
0x238c   :  { %8688 = vmatprep.subr.mxu1 %v9057_v26 }
0x240d   :  { %v5703_v25 = vpop.xlane.xlu1 %5702 }
0x240e   :  { %v5705_v57 = vmul.f32 0.03125, %v5703_v25 }
0x240f   :  { %v5700_v0 = vpop.xlane.xlu0 %5699 }
0x2410   :  { %v5704_v1 = vmul.f32 0.03125, %v5700_v0  ;;  %v5707_v9 = vsub.f32 %v5693_v61, %v5705_v57 }
0x2412   :  { %v5706_v29 = vsub.f32 %v5692_v17, %v5704_v1  ;;  %v5709_v34 = vmul.f32 %v5707_v9, %v5707_v9 }
0x2414   :  { %v5708_v12 = vmul.f32 %v5706_v29, %v5706_v29  ;;  %v5713_v59 = vsel %vm88_vm0, %v5709_v34, 0.0 }
0x2416   :  { %v5710_v32 = vsel %vm88_vm0, %v5708_v12, 0.0 }
0x2417   :  { %5711 = vadd.xlane.f32.xlu0 %v5710_v32 }
0x241b   :  { %5714 = vadd.xlane.f32.xlu0 %v5713_v59 }
0x24a0   :  { %v5712_v36 = vpop.xlane.xlu0 %5711 }
0x24a1   :  { %v5716_v40 = vmul.f32 0.03125, %v5712_v36 }
0x24a3   :  { %v5718_v43 = vadd.f32 1e-05, %v5716_v40 }
0x24a4   :  { %v5715_v3 = vpop.xlane.xlu0 %5714 }
0x24a5   :  { %8957 = vrsqrt.f32 %v5718_v43  ;;  %v5717_v38 = vmul.f32 0.03125, %v5715_v3 }
0x24a7   :  { %v5719_v44 = vadd.f32 1e-05, %v5717_v38 }
0x24a9   :  { %8959 = vrsqrt.f32 %v5719_v44 }
0x24b2   :  { %v8958_v46 = vpop.eup %8957 }
0x24b3   :  { %v5722_v42 = vmul.f32 %v8958_v46, %v5706_v29 }
0x24b5   :  { %v5730_v51 = vmul.f32 %v7871_v47, %v5722_v42 }
0x24b6   :  { %v8960_v23 = vpop.eup %8959 }
0x24b7   :  { %v5723_v13 = vmul.f32 %v8960_v23, %v5707_v9  ;;  %v10085_v18 = vadd.f32 %v7872_v45, %v5730_v51 }
0x24b9   :  { %v5731_v41 = vmul.f32 %v7871_v47, %v5723_v13  ;;  %v5740_v5 = vadd.f32 %v9848_v14, %v10085_v18 }
0x24bb   :  { %v10089_v37 = vadd.f32 %v7872_v45, %v5731_v41  ;;  %8678 = vmatprep.mubr.msk.f32.mxu1 %vm88_vm0, %v5740_v5 }
0x24bd   :  { %v5741_v60 = vadd.f32 %v9855_v20, %v10089_v37 }
0x24bf   :  { %8679 = vmatmul.mubr.msk.f32.vlgmr.msra.gmra.mxu1 %vm88_vm0, %v5741_v60 }
0x24c0   :  { %8689 = vmatpush3.msra.mxu1 %v10098_v39  ;;  %8692 = vmatprep.mubr.msk.f32.mxu1 %vm9058_vm1, %v9057_v26 }
0x24c1   :  { %8690 = vmatprep.subr.mxu1 %v9057_v26 }
0x24c2   :  { %8691 = vmatpush3.msra.mxu1 %v10102_v62 }
0x24c3   :  { %8695 = vmatprep.subr.mxu1 %v9057_v26 }
0x257f   :  { %v8680_v14 = vpop.f32.mrf.mxu1 }
0x2580   :  { %v10113_v20 = vadd.f32 %v8680_v14, %v7878_v21 }
0x2581   :  { %v5827_v24 = vpop.f32.mrf.mxu1 }
0x2582   :  { %v10115_v52 = vadd.f32 %v7878_v21, %v5827_v24 }
0x2584   :  { %8686 = vmatmul.mubr.msk.f32.vlgmr.msra.gmra.mxu0 %vm681_vm2, %v10115_v52 }
0x2585   :  { %8706 = vmatprep.mubr.msk.f32.mxu0 %vm9058_vm1, %v9057_v26 }
0x2644   :  { %v5911_v4 = vpop.f32.mrf.mxu0 }
0x2645   :  { %v5915_v53 = vmul.f32 0.35355338, %v5911_v4 }
0x2646   :  { %v8687_v58 = vpop.f32.mrf.mxu0 }
0x2647   :  { %v5916_v6 = vsel %vm1353_vm3, %v5915_v53, -inf }
0x2648   :  { %5917 = vmax.xlane.f32.xlu1 %v5916_v6 }
0x2659   :  { %6004 = vrot.lane.b32.xlu1 %v10042_v2, %s9059_s27 }
0x265d   :  { %6000 = vrot.lane.b32.xlu1 %v10115_v52, %s9059_s27 }
0x26d1   :  { %v5918_v7 = vpop.xlane.xlu1 %5917 }
0x26d2   :  { %v5919_v49 = vsub.f32 %v5915_v53, %v5918_v7 }
0x26d4   :  { %v5920_v63 = vmul.f32 1.442695, %v5919_v49 }
0x26d5   :  { %v6005_v61 = vpop.permute.xlu1 %6004 }
0x26d6   :  { %8961 = vpow2.f32 %v5920_v63 }
0x26d9   :  { %v6001_v17 = vpop.permute.xlu1 %6000 }
0x26e3   :  { %v8962_v8 = vpop.eup %8961 }
0x26e4   :  { %v5922_v27 = vsel %vm1353_vm3, %v8962_v8, 0.0 }
0x26e5   :  { %5923 = vadd.xlane.f32.xlu0 %v5922_v27 }
0x26fb   :  { %6002 = vrot.lane.b32.xlu0 %v10052_v10, %s9059_s27 }
0x276e   :  { %v5924_v15 = vpop.xlane.xlu0 %5923 }
0x276f   :  { %8963 = vrcp.f32 %v5924_v15 }
0x2772   :  { %v6003_v54 = vpop.permute.xlu0 %6002 }
0x277c   :  { %v8964_v22 = vpop.eup %8963 }
0x277d   :  { %v5926_v16 = vmul.f32 %v8964_v22, %v8962_v8 }
0x277f   :  { %8693 = vmatmul.mubr.msk.f32.vlgmr.msra.gmra.mxu1 %vm1353_vm3, %v5926_v16 }
0x2780   :  { %8696 = vmatpush3.xpose.msk.msra.mxu1 %vm681_vm2, %v6005_v61  ;;  %8699 = vmatprep.mubr.msk.f32.mxu1 %vm9058_vm1, %v9057_v26 }
0x2781   :  { %8697 = vmatprep.subr.mxu1 %v9057_v26 }
0x2784   :  { %8698 = vmatpush3.xpose.msk.msra.mxu1 %vm681_vm2, %v6003_v54 }
0x2785   :  { %8716 = vmatprep.subr.mxu1 %v9057_v26 }
0x2787   :  { %8700 = vmatmul.mubr.msk.f32.vlgmr.msra.gmra.mxu1 %vm681_vm2, %v6001_v17 }
0x2788   :  { %8720 = vmatprep.mubr.msk.f32.mxu1 %vm9058_vm1, %v9057_v26 }
0x283f   :  { %v10139_v28 = vpop.f32.mrf.mxu1 }
0x2841   :  { %v8694_v19 = vpop.f32.mrf.mxu1 }
0x2847   :  { %v6078_v25 = vpop.f32.mrf.mxu1 }
0x2848   :  { %v6082_v57 = vmul.f32 0.35355338, %v6078_v25 }
0x2849   :  { %v8701_v0 = vpop.f32.mrf.mxu1 }
0x284a   :  { %v6083_v1 = vsel %vm1353_vm3, %v6082_v57, -inf }
0x284b   :  { %6084 = vmax.xlane.f32.xlu1 %v6083_v1 }
0x285c   :  { %6096 = vrot.lane.b32.xlu1 %v10102_v62, %s9059_s27 }
0x2860   :  { %6179 = vrot.lane.b32.xlu1 %v10042_v2, %s9064_s11 }
0x2864   :  { %6175 = vrot.lane.b32.xlu1 %v10115_v52, %s9064_s11 }
0x2868   :  { %6269 = vrot.lane.b32.xlu1 %v10102_v62, %s9064_s11 }
0x28d4   :  { %v6085_v9 = vpop.xlane.xlu1 %6084 }
0x28d5   :  { %v6086_v29 = vsub.f32 %v6082_v57, %v6085_v9 }
0x28d7   :  { %v6087_v12 = vmul.f32 1.442695, %v6086_v29 }
0x28d8   :  { %v6097_v11 = vpop.permute.xlu1 %6096 }
0x28d9   :  { %8965 = vpow2.f32 %v6087_v12 }
0x28dc   :  { %v6180_v36 = vpop.permute.xlu1 %6179 }
0x28e0   :  { %v6176_v43 = vpop.permute.xlu1 %6175 }
0x28e4   :  { %v6270_v41 = vpop.permute.xlu1 %6269 }
0x28e6   :  { %v8966_v32 = vpop.eup %8965 }
0x28e7   :  { %v6089_v34 = vsel %vm1353_vm3, %v8966_v32, 0.0 }
0x28e8   :  { %6090 = vadd.xlane.f32.xlu0 %v6089_v34 }
0x28fe   :  { %6098 = vrot.lane.b32.xlu0 %v10098_v39, %s9059_s27 }
0x2902   :  { %6177 = vrot.lane.b32.xlu0 %v10052_v10, %s9064_s11 }
0x2971   :  { %v6091_v59 = vpop.xlane.xlu0 %6090 }
0x2972   :  { %8967 = vrcp.f32 %v6091_v59 }
0x2975   :  { %v6099_v55 = vpop.permute.xlu0 %6098 }
0x2976   :  { %8703 = vmatpush3.msra.mxu0 %v6099_v55 }
0x2977   :  { %8704 = vmatprep.subr.mxu0 %v9057_v26 }
0x2978   :  { %8705 = vmatpush3.msra.mxu0 %v6097_v11 }
0x2979   :  { %8709 = vmatprep.subr.mxu0 %v9057_v26  ;;  %v6178_v40 = vpop.permute.xlu0 %6177 }
0x297f   :  { %v8968_v50 = vpop.eup %8967 }
0x2980   :  { %v6093_v48 = vmul.f32 %v8968_v50, %v8966_v32 }
0x2982   :  { %8707 = vmatmul.mubr.msk.f32.vlgmr.msra.gmra.mxu0 %vm1353_vm3, %v6093_v48 }
0x2983   :  { %8710 = vmatpush3.xpose.msk.msra.mxu0 %vm681_vm2, %v6180_v36  ;;  %8713 = vmatprep.mubr.msk.f32.mxu0 %vm9058_vm1, %v9057_v26 }
0x2984   :  { %8711 = vmatprep.subr.mxu0 %v9057_v26 }
0x2987   :  { %8712 = vmatpush3.xpose.msk.msra.mxu0 %vm681_vm2, %v6178_v40 }
0x2988   :  { %8730 = vmatprep.subr.mxu0 %v9057_v26 }
0x298a   :  { %8714 = vmatmul.mubr.msk.f32.vlgmr.msra.gmra.mxu0 %vm681_vm2, %v6176_v43 }
0x298b   :  { %8734 = vmatprep.mubr.msk.f32.mxu0 %vm9058_vm1, %v9057_v26 }
0x2a42   :  { %v10167_v3 = vpop.f32.mrf.mxu0 }
0x2a44   :  { %v8708_v38 = vpop.f32.mrf.mxu0 }
0x2a4a   :  { %v6253_v44 = vpop.f32.mrf.mxu0 }
0x2a4b   :  { %v6257_v46 = vmul.f32 0.35355338, %v6253_v44 }
0x2a4c   :  { %v8715_v47 = vpop.f32.mrf.mxu0 }
0x2a4d   :  { %v6258_v42 = vsel %vm1353_vm3, %v6257_v46, -inf }
0x2a4e   :  { %6259 = vmax.xlane.f32.xlu0 %v6258_v42 }
0x2a64   :  { %6271 = vrot.lane.b32.xlu0 %v10098_v39, %s9064_s11 }
0x2a68   :  { %6352 = vrot.lane.b32.xlu0 %v10042_v2, %s9065_s12 }
0x2a6c   :  { %6348 = vrot.lane.b32.xlu0 %v10115_v52, %s9065_s12 }
0x2ad7   :  { %v6260_v45 = vpop.xlane.xlu0 %6259 }
0x2ad8   :  { %v6261_v51 = vsub.f32 %v6257_v46, %v6260_v45 }
0x2ada   :  { %v6262_v23 = vmul.f32 1.442695, %v6261_v51 }
0x2adb   :  { %v6272_v13 = vpop.permute.xlu0 %6271 }
0x2adc   :  { %8969 = vpow2.f32 %v6262_v23  ;;  %8717 = vmatpush3.msra.mxu1 %v6272_v13 }
0x2add   :  { %8718 = vmatprep.subr.mxu1 %v9057_v26 }
0x2ade   :  { %8719 = vmatpush3.msra.mxu1 %v6270_v41 }
0x2adf   :  { %8723 = vmatprep.subr.mxu1 %v9057_v26  ;;  %v6353_v14 = vpop.permute.xlu0 %6352 }
0x2ae9   :  { %v8970_v5 = vpop.eup %8969 }
0x2aea   :  { %v6264_v60 = vsel %vm1353_vm3, %v8970_v5, 0.0 }
0x2aeb   :  { %6265 = vadd.xlane.f32.xlu1 %v6264_v60 }
0x2afc   :  { %6350 = vrot.lane.b32.xlu1 %v10052_v10, %s9065_s12  ;;  %v6349_v10 = vpop.permute.xlu0 %6348 }
0x2b74   :  { %v6266_v2 = vpop.xlane.xlu1 %6265 }
0x2b75   :  { %8971 = vrcp.f32 %v6266_v2 }
0x2b78   :  { %v6351_v24 = vpop.permute.xlu1 %6350 }
0x2b82   :  { %v8972_v56 = vpop.eup %8971 }
0x2b83   :  { %v6268_v21 = vmul.f32 %v8972_v56, %v8970_v5 }
0x2b85   :  { %8721 = vmatmul.mubr.msk.f32.vlgmr.msra.gmra.mxu1 %vm1353_vm3, %v6268_v21 }
0x2b86   :  { %8724 = vmatpush3.xpose.msk.msra.mxu1 %vm681_vm2, %v6353_v14  ;;  %8727 = vmatprep.mubr.msk.f32.mxu1 %vm9058_vm1, %v9057_v26 }
0x2b87   :  { %8725 = vmatprep.subr.mxu1 %v9057_v26 }
0x2b8a   :  { %8726 = vmatpush3.xpose.msk.msra.mxu1 %vm681_vm2, %v6351_v24 }
0x2b8b   :  { %8744 = vmatprep.subr.mxu1 %v9057_v26 }
0x2b8d   :  { %8728 = vmatmul.mubr.msk.f32.vlgmr.msra.gmra.mxu1 %vm681_vm2, %v6349_v10 }
0x2b8e   :  { %8745 = vmatpush3.msra.mxu1 %v9411_v30  ;;  %8748 = vmatprep.mubr.msk.f32.mxu1 %vm9058_vm1, %v9057_v26 }
0x2b8f   :  { %8746 = vmatprep.subr.mxu1 %v9057_v26 }
0x2b90   :  { %8747 = vmatpush3.msra.mxu1 %v9416_v35 }
0x2b91   :  { %8751 = vmatprep.subr.mxu1 %v9057_v26 }
0x2c45   :  { %v10195_v52 = vpop.f32.mrf.mxu1 }
0x2c47   :  { %v8722_v4 = vpop.f32.mrf.mxu1 }
0x2c4d   :  { %v6426_v53 = vpop.f32.mrf.mxu1 }
0x2c4e   :  { %v6430_v58 = vmul.f32 0.35355338, %v6426_v53 }
0x2c4f   :  { %v8729_v6 = vpop.f32.mrf.mxu1 }
0x2c50   :  { %v6431_v7 = vsel %vm1353_vm3, %v6430_v58, -inf }
0x2c51   :  { %6432 = vmax.xlane.f32.xlu1 %v6431_v7 }
0x2c62   :  { %6442 = vrot.lane.b32.xlu1 %v10102_v62, %s9065_s12 }
0x2cda   :  { %v6433_v49 = vpop.xlane.xlu1 %6432 }
0x2cdb   :  { %v6434_v63 = vsub.f32 %v6430_v58, %v6433_v49 }
0x2cdd   :  { %v6435_v8 = vmul.f32 1.442695, %v6434_v63 }
0x2cde   :  { %v6443_v61 = vpop.permute.xlu1 %6442 }
0x2cdf   :  { %8973 = vpow2.f32 %v6435_v8 }
0x2cec   :  { %v8974_v27 = vpop.eup %8973 }
0x2ced   :  { %v6437_v15 = vsel %vm1353_vm3, %v8974_v27, 0.0 }
0x2cee   :  { %6438 = vadd.xlane.f32.xlu0 %v6437_v15 }
0x2d04   :  { %6444 = vrot.lane.b32.xlu0 %v10098_v39, %s9065_s12 }
0x2d77   :  { %v6439_v22 = vpop.xlane.xlu0 %6438 }
0x2d78   :  { %8975 = vrcp.f32 %v6439_v22 }
0x2d7b   :  { %v6445_v16 = vpop.permute.xlu0 %6444 }
0x2d7c   :  { %8731 = vmatpush3.msra.mxu0 %v6445_v16 }
0x2d7d   :  { %8732 = vmatprep.subr.mxu0 %v9057_v26 }
0x2d7e   :  { %8733 = vmatpush3.msra.mxu0 %v6443_v61 }
0x2d7f   :  { %8737 = vmatprep.subr.mxu0 %v9057_v26 }
0x2d85   :  { %v8976_v62 = vpop.eup %8975 }
0x2d86   :  { %v6441_v54 = vmul.f32 %v8976_v62, %v8974_v27 }
0x2d88   :  { %8735 = vmatmul.mubr.msk.f32.vlgmr.msra.gmra.mxu0 %vm1353_vm3, %v6441_v54 }
0x2d89   :  { %8738 = vmatpush3.xpose.msk.msra.mxu0 %vm681_vm2, %v9219_v31  ;;  %8741 = vmatprep.mubr.msk.f32.mxu0 %vm9058_vm1, %v9057_v26 }
0x2d8a   :  { %8739 = vmatprep.subr.mxu0 %v9057_v26 }
0x2d8d   :  { %8740 = vmatpush3.xpose.msk.msra.mxu0 %vm681_vm2, %v9221_v33 }
0x2d8e   :  { %8758 = vmatprep.subr.mxu0 %v9057_v26 }
0x2d90   :  { %8742 = vmatmul.mubr.msk.f32.vlgmr.msra.gmra.mxu0 %vm681_vm2, %v10113_v20 }
0x2d91   :  { %8762 = vmatprep.mubr.msk.f32.mxu0 %vm9058_vm1, %v9057_v26 }
0x2e48   :  { %v10218_v39 = vpop.f32.mrf.mxu0 }
0x2e4a   :  { %v8736_v17 = vpop.f32.mrf.mxu0 }
0x2e50   :  { %v6611_v19 = vpop.f32.mrf.mxu0 }
0x2e51   :  { %v6615_v25 = vmul.f32 0.35355338, %v6611_v19 }
0x2e52   :  { %v8743_v57 = vpop.f32.mrf.mxu0 }
0x2e53   :  { %v6616_v0 = vsel %vm1353_vm3, %v6615_v25, -inf }
0x2e54   :  { %6617 = vmax.xlane.f32.xlu1 %v6616_v0 }
0x2e65   :  { %6702 = vrot.lane.b32.xlu1 %v9221_v33, %s9059_s27 }
0x2e69   :  { %6700 = vrot.lane.b32.xlu1 %v10113_v20, %s9059_s27 }
0x2e6d   :  { %6796 = vrot.lane.b32.xlu1 %v9416_v35, %s9059_s27 }
0x2edd   :  { %v6618_v1 = vpop.xlane.xlu1 %6617 }
0x2ede   :  { %v6619_v9 = vsub.f32 %v6615_v25, %v6618_v1 }
0x2ee0   :  { %v6620_v29 = vmul.f32 1.442695, %v6619_v9 }
0x2ee1   :  { %v6703_v50 = vpop.permute.xlu1 %6702 }
0x2ee2   :  { %8977 = vpow2.f32 %v6620_v29 }
0x2ee5   :  { %v6701_v48 = vpop.permute.xlu1 %6700 }
0x2ee9   :  { %v6797_v23 = vpop.permute.xlu1 %6796 }
0x2eef   :  { %v8978_v12 = vpop.eup %8977 }
0x2ef0   :  { %v6622_v32 = vsel %vm1353_vm3, %v8978_v12, 0.0 }
0x2ef1   :  { %6623 = vadd.xlane.f32.xlu0 %v6622_v32 }
0x2f07   :  { %6704 = vrot.lane.b32.xlu0 %v9219_v31, %s9059_s27 }
0x2f7a   :  { %v6624_v34 = vpop.xlane.xlu0 %6623 }
0x2f7b   :  { %8979 = vrcp.f32 %v6624_v34 }
0x2f7e   :  { %v6705_v11 = vpop.permute.xlu0 %6704 }
0x2f88   :  { %v8980_v59 = vpop.eup %8979 }
0x2f89   :  { %v6626_v55 = vmul.f32 %v8980_v59, %v8978_v12 }
0x2f8b   :  { %8749 = vmatmul.mubr.msk.f32.vlgmr.msra.gmra.mxu1 %vm1353_vm3, %v6626_v55 }
0x2f8c   :  { %8752 = vmatpush3.xpose.msk.msra.mxu1 %vm681_vm2, %v6705_v11  ;;  %8755 = vmatprep.mubr.msk.f32.mxu1 %vm9058_vm1, %v9057_v26 }
0x2f8d   :  { %8753 = vmatprep.subr.mxu1 %v9057_v26 }
0x2f90   :  { %8754 = vmatpush3.xpose.msk.msra.mxu1 %vm681_vm2, %v6703_v50 }
0x2f91   :  { %8772 = vmatprep.subr.mxu1 %v9057_v26 }
0x2f93   :  { %8756 = vmatmul.mubr.msk.f32.vlgmr.msra.gmra.mxu1 %vm681_vm2, %v6701_v48 }
0x2f94   :  { %8776 = vmatprep.mubr.msk.f32.mxu1 %vm9058_vm1, %v9057_v26 }
0x304b   :  { %v10240_v36 = vpop.f32.mrf.mxu1 }
0x304d   :  { %v8750_v40 = vpop.f32.mrf.mxu1 }
0x3053   :  { %v6778_v43 = vpop.f32.mrf.mxu1 }
0x3054   :  { %v6782_v38 = vmul.f32 0.35355338, %v6778_v43  ;;  %v7913_v43 = vld [vmem:[%s10380_s3 + $0x160] sm:$0xff] }
0x3055   :  { %v8757_v44 = vpop.f32.mrf.mxu1 }
0x3056   :  { %v6783_v46 = vsel %vm1353_vm3, %v6782_v38, -inf }
0x3057   :  { %6784 = vmax.xlane.f32.xlu0 %v6783_v46 }
0x306d   :  { %6798 = vrot.lane.b32.xlu0 %v9411_v30, %s9059_s27 }
0x3071   :  { %6879 = vrot.lane.b32.xlu0 %v9219_v31, %s9064_s11 }
0x3075   :  { %6875 = vrot.lane.b32.xlu0 %v10113_v20, %s9064_s11 }
0x30e0   :  { %v6785_v47 = vpop.xlane.xlu0 %6784 }
0x30e1   :  { %v6786_v42 = vsub.f32 %v6782_v38, %v6785_v47 }
0x30e3   :  { %v6787_v45 = vmul.f32 1.442695, %v6786_v42 }
0x30e4   :  { %v6799_v51 = vpop.permute.xlu0 %6798 }
0x30e5   :  { %8981 = vpow2.f32 %v6787_v45  ;;  %8759 = vmatpush3.msra.mxu0 %v6799_v51 }
0x30e6   :  { %8760 = vmatprep.subr.mxu0 %v9057_v26 }
0x30e7   :  { %8761 = vmatpush3.msra.mxu0 %v6797_v23 }
0x30e8   :  { %8765 = vmatprep.subr.mxu0 %v9057_v26  ;;  %v6880_v56 = vpop.permute.xlu0 %6879 }
0x30ec   :  { %v6876_v14 = vpop.permute.xlu0 %6875 }
0x30f2   :  { %v8982_v13 = vpop.eup %8981 }
0x30f3   :  { %v6789_v41 = vsel %vm1353_vm3, %v8982_v13, 0.0 }
0x30f4   :  { %6790 = vadd.xlane.f32.xlu1 %v6789_v41 }
0x3105   :  { %6877 = vrot.lane.b32.xlu1 %v9221_v33, %s9064_s11 }
0x317d   :  { %v6791_v5 = vpop.xlane.xlu1 %6790 }
0x317e   :  { %8983 = vrcp.f32 %v6791_v5 }
0x3181   :  { %v6878_v21 = vpop.permute.xlu1 %6877 }
0x318b   :  { %v8984_v60 = vpop.eup %8983 }
0x318c   :  { %v6793_v2 = vmul.f32 %v8984_v60, %v8982_v13  ;;  %v7918_v13 = vld [vmem:[%s10383_s6 + $0x12] ss:$0 sm:$0xff] }
0x318e   :  { %8763 = vmatmul.mubr.msk.f32.vlgmr.msra.gmra.mxu0 %vm1353_vm3, %v6793_v2 }
0x318f   :  { %8766 = vmatpush3.xpose.msk.msra.mxu0 %vm681_vm2, %v6880_v56  ;;  %8769 = vmatprep.mubr.msk.f32.mxu0 %vm9058_vm1, %v9057_v26 }
0x3190   :  { %8767 = vmatprep.subr.mxu0 %v9057_v26 }
0x3193   :  { %8768 = vmatpush3.xpose.msk.msra.mxu0 %vm681_vm2, %v6878_v21 }
0x3194   :  { %8786 = vmatprep.subr.mxu0 %v9057_v26 }
0x3196   :  { %8770 = vmatmul.mubr.msk.f32.vlgmr.msra.gmra.mxu0 %vm681_vm2, %v6876_v14 }
0x3197   :  { %8790 = vmatprep.mubr.msk.f32.mxu0 %vm9058_vm1, %v9057_v26 }
0x324e   :  { %v6871_v24 = vpop.f32.mrf.mxu0 }
0x3250   :  { %v8764_v10 = vpop.f32.mrf.mxu0 }
0x3256   :  { %v6953_v4 = vpop.f32.mrf.mxu0 }
0x3257   :  { %v6957_v53 = vmul.f32 0.35355338, %v6953_v4 }
0x3258   :  { %v8771_v58 = vpop.f32.mrf.mxu0 }
0x3259   :  { %v6958_v6 = vsel %vm1353_vm3, %v6957_v53, -inf }
0x325a   :  { %6959 = vmax.xlane.f32.xlu1 %v6958_v6 }
0x326b   :  { %6969 = vrot.lane.b32.xlu1 %v9416_v35, %s9064_s11 }
0x326f   :  { %7052 = vrot.lane.b32.xlu1 %v9219_v31, %s9065_s12 }
0x3273   :  { %7048 = vrot.lane.b32.xlu1 %v10113_v20, %s9065_s12 }
0x32e3   :  { %v6960_v7 = vpop.xlane.xlu1 %6959 }
0x32e4   :  { %v6961_v49 = vsub.f32 %v6957_v53, %v6960_v7 }
0x32e6   :  { %v6962_v63 = vmul.f32 1.442695, %v6961_v49 }
0x32e7   :  { %v6970_v22 = vpop.permute.xlu1 %6969 }
0x32e8   :  { %8985 = vpow2.f32 %v6962_v63 }
0x32eb   :  { %v7053_v61 = vpop.permute.xlu1 %7052 }
0x32ef   :  { %v7049_v62 = vpop.permute.xlu1 %7048 }
0x32f5   :  { %v8986_v8 = vpop.eup %8985 }
0x32f6   :  { %v6964_v27 = vsel %vm1353_vm3, %v8986_v8, 0.0 }
0x32f7   :  { %6965 = vadd.xlane.f32.xlu0 %v6964_v27  ;;  %v7380_v27 = vld [vmem:[#allocation2 + $0x68] sm:$0xff] }
0x330d   :  { %6971 = vrot.lane.b32.xlu0 %v9411_v30, %s9064_s11 }
0x3311   :  { %7050 = vrot.lane.b32.xlu0 %v9221_v33, %s9065_s12 }
0x3380   :  { %v6966_v15 = vpop.xlane.xlu0 %6965 }
0x3381   :  { %8987 = vrcp.f32 %v6966_v15  ;;  %v7379_v15 = vld [vmem:[#allocation2 + $0x60] sm:$0xff] }
0x3384   :  { %v6972_v31 = vpop.permute.xlu0 %6971 }
0x3385   :  { %8773 = vmatpush3.msra.mxu1 %v6972_v31  ;;  %v7482_v31 = vld [vmem:[#allocation4 + $0x78] sm:$0xff] }
0x3386   :  { %8774 = vmatprep.subr.mxu1 %v9057_v26 }
0x3387   :  { %8775 = vmatpush3.msra.mxu1 %v6970_v22  ;;  %v7481_v22 = vld [vmem:[#allocation4 + $0x70] sm:$0xff] }
0x3388   :  { %8779 = vmatprep.subr.mxu1 %v9057_v26  ;;  %v7051_v33 = vpop.permute.xlu0 %7050 }
0x338e   :  { %v8988_v20 = vpop.eup %8987 }
0x338f   :  { %v6968_v16 = vmul.f32 %v8988_v20, %v8986_v8  ;;  %v7381_v8 = vld [vmem:[#allocation2 + $0x70] sm:$0xff]  ;;  %v7480_v20 = vld [vmem:[#allocation4 + $0x68] sm:$0xff] }
0x3391   :  { %8777 = vmatmul.mubr.msk.f32.vlgmr.msra.gmra.mxu1 %vm1353_vm3, %v6968_v16  ;;  %v7479_v16 = vld [vmem:[#allocation4 + $0x60] sm:$0xff] }
0x3392   :  { %8780 = vmatpush3.xpose.msk.msra.mxu1 %vm681_vm2, %v7053_v61  ;;  %8783 = vmatprep.mubr.msk.f32.mxu1 %vm9058_vm1, %v9057_v26 }
0x3393   :  { %8781 = vmatprep.subr.mxu1 %v9057_v26 }
0x3396   :  { %8782 = vmatpush3.xpose.msk.msra.mxu1 %vm681_vm2, %v7051_v33 }
0x3399   :  { %8784 = vmatmul.mubr.msk.f32.vlgmr.msra.gmra.mxu1 %vm681_vm2, %v7049_v62 }
0x3451   :  { %v7044_v54 = vpop.f32.mrf.mxu1 }
0x3453   :  { %v8778_v17 = vpop.f32.mrf.mxu1 }
0x3459   :  { %v7126_v19 = vpop.f32.mrf.mxu1 }
0x345a   :  { %v7130_v25 = vmul.f32 0.35355338, %v7126_v19 }
0x345b   :  { %v8785_v57 = vpop.f32.mrf.mxu1 }
0x345c   :  { %v7131_v0 = vsel %vm1353_vm3, %v7130_v25, -inf  ;;  %v7923_v57 = vld [vmem:[%s10383_s6 + $0x16] ss:$0 sm:$0xff] }
0x345d   :  { %7132 = vmax.xlane.f32.xlu0 %v7131_v0 }
0x3473   :  { %7144 = vrot.lane.b32.xlu0 %v9411_v30, %s9065_s12 }
0x3477   :  { %6522 = vrot.lane.b32.xlu0 %v10167_v3, %s9055_s9 }
0x347b   :  { %7222 = vrot.lane.b32.xlu0 %v6871_v24, %s9055_s9 }
0x347f   :  { %7226 = vrot.lane.b32.xlu0 %v7044_v54, %s9066_s18 }
0x34e6   :  { %v7133_v1 = vpop.xlane.xlu0 %7132 }
0x34e7   :  { %v7134_v9 = vsub.f32 %v7130_v25, %v7133_v1  ;;  %v7924_v1 = vld [vmem:[%s10383_s6 + $0x17] ss:$0 sm:$0xff] }
0x34e9   :  { %v7135_v29 = vmul.f32 1.442695, %v7134_v9 }
0x34ea   :  { %v7145_v12 = vpop.permute.xlu0 %7144 }
0x34eb   :  { %8989 = vpow2.f32 %v7135_v29  ;;  %8787 = vmatpush3.msra.mxu0 %v7145_v12 }
0x34ec   :  { %8788 = vmatprep.subr.mxu0 %v9057_v26 }
0x34ee   :  { %v6523_v55 = vpop.permute.xlu0 %6522 }
0x34ef   :  { %v6533_v50 = vsel %vm681_vm2, %v10139_v28, %v6523_v55  ;;  %v7914_v28 = vld [vmem:[%s10380_s3 + $0x168] sm:$0xff] }
0x34f0   :  { %v7476_v55 = vld [vmem:[#allocation4 + $0x48] sm:$0xff] }
0x34f2   :  { %v7223_v46 = vpop.permute.xlu0 %7222 }
0x34f3   :  { %v7233_v42 = vsel %vm681_vm2, %v10240_v36, %v7223_v46 }
0x34f6   :  { %v7227_v47 = vpop.permute.xlu0 %7226 }
0x34f7   :  { %v7234_v45 = vsel %vm1353_vm3, %v7233_v42, %v7227_v47 }
0x34f8   :  { %v8990_v32 = vpop.eup %8989 }
0x34f9   :  { %v7137_v34 = vsel %vm1353_vm3, %v8990_v32, 0.0 }
0x34fa   :  { %7138 = vadd.xlane.f32.xlu1 %v7137_v34 }
0x350b   :  { %7142 = vrot.lane.b32.xlu1 %v9416_v35, %s9065_s12 }
0x350f   :  { %6526 = vrot.lane.b32.xlu1 %v10195_v52, %s9066_s18  ;;  %v7916_v52 = vld [vmem:[%s10380_s3 + $0x178] sm:$0xff] }
0x3513   :  { %6530 = vrot.lane.b32.xlu1 %v10218_v39, %s9067_s19  ;;  %v7915_v39 = vld [vmem:[%s10380_s3 + $0x170] sm:$0xff] }
0x3583   :  { %v7139_v30 = vpop.xlane.xlu1 %7138 }
0x3584   :  { %8991 = vrcp.f32 %v7139_v30 }
0x3587   :  { %v7143_v3 = vpop.permute.xlu1 %7142 }
0x3588   :  { %8789 = vmatpush3.msra.mxu0 %v7143_v3  ;;  %v7478_v3 = vld [vmem:[#allocation4 + $0x58] sm:$0xff] }
0x3589   :  { %8793 = vmatprep.subr.mxu0 %v7916_v52 }
0x358b   :  { %v6527_v59 = vpop.permute.xlu1 %6526 }
0x358c   :  { %v6534_v35 = vsel %vm1353_vm3, %v6533_v50, %v6527_v59  ;;  %v7477_v59 = vld [vmem:[#allocation4 + $0x50] sm:$0xff] }
0x358f   :  { %v6531_v11 = vpop.permute.xlu1 %6530 }
0x3590   :  { %v6535_v40 = vsel %vm1355_vm4, %v6534_v35, %v6531_v11  ;;  %v7926_v11 = vld [vmem:[%s10382_s5 + $0x3] ss:$0 sm:$0xff] }
0x3591   :  { %v8992_v26 = vpop.eup %8991 }
0x3592   :  { %v7141_v48 = vmul.f32 %v8992_v26, %v8990_v32  ;;  %v7475_v26 = vld [vmem:[#allocation4 + $0x40] sm:$0xff] }
0x3594   :  { %8791 = vmatmul.mubr.msk.f32.vlgmr.msra.gmra.mxu0 %vm1353_vm3, %v7141_v48 }
0x3595   :  { %8801 = vmatprep.mubr.msk.f32.mxu0 %vm88_vm0, %v6535_v40  ;;  %8794 = vmatpush3.msra.mxu0 %v7916_v52 }
0x3596   :  { %8795 = vmatprep.subr.mxu0 %v7915_v39 }
0x3597   :  { %8796 = vmatpush3.msra.mxu0 %v7915_v39 }
0x3598   :  { %8797 = vmatprep.subr.mxu0 %v7914_v28 }
0x3599   :  { %8798 = vmatpush3.msra.mxu0 %v7914_v28  ;;  %v7930_v28 = vld [vmem:[%s10383_s6 + $0x13] ss:$0 sm:$0xff] }
0x359a   :  { %8799 = vmatprep.subr.mxu0 %v7913_v43 }
0x359b   :  { %8800 = vmatpush3.msra.mxu0 %v7913_v43 }
0x359c   :  { %8815 = vmatprep.subr.mxu0 %v7482_v31 }
0x3654   :  { %v7217_v38 = vpop.f32.mrf.mxu0 }
0x3655   :  { %7230 = vrot.lane.b32.xlu1 %v7217_v38, %s9067_s19 }
0x3656   :  { %v8792_v44 = vpop.f32.mrf.mxu0 }
0x36c7   :  { %v7231_v51 = vpop.permute.xlu1 %7230 }
0x36c8   :  { %v7235_v23 = vsel %vm1355_vm4, %v7234_v45, %v7231_v51 }
0x36c9   :  { %8802 = vmatmul.mubr.msk.f32.vlgmr.msra.gmra.mxu0 %vm88_vm0, %v7235_v23 }
0x36ca   :  { %8816 = vmatpush3.msra.mxu0 %v7482_v31 }
0x36cb   :  { %8817 = vmatprep.subr.mxu0 %v7481_v22 }
0x36cc   :  { %8818 = vmatpush3.msra.mxu0 %v7481_v22 }
0x36cd   :  { %8819 = vmatprep.subr.mxu0 %v7480_v20 }
0x36ce   :  { %8820 = vmatpush3.msra.mxu0 %v7480_v20 }
0x36cf   :  { %8821 = vmatprep.subr.mxu0 %v7479_v16 }
0x36d0   :  { %8822 = vmatpush3.msra.mxu0 %v7479_v16 }
0x36d1   :  { %8823 = vmatprep.subr.mxu0 %v7478_v3 }
0x36d2   :  { %8824 = vmatpush3.msra.mxu0 %v7478_v3 }
0x36d3   :  { %8825 = vmatprep.subr.mxu0 %v7477_v59 }
0x36d4   :  { %8826 = vmatpush3.msra.mxu0 %v7477_v59  ;;  %v7938_v59 = vld [vmem:[%s10384_s7] ss:$0 sm:$0xff] }
0x36d5   :  { %8827 = vmatprep.subr.mxu0 %v7476_v55 }
0x36d6   :  { %8828 = vmatpush3.msra.mxu0 %v7476_v55 }
0x36d7   :  { %8829 = vmatprep.subr.mxu0 %v7475_v26 }
0x36d8   :  { %8830 = vmatpush3.msra.mxu0 %v7475_v26 }
0x3789   :  { %v8803_v41 = vpop.f32.mrf.mxu0 }
0x378a   :  { %v7327_v5 = vadd.f32 %v8803_v41, %v7918_v13 }
0x378b   :  { %v7321_v60 = vpop.f32.mrf.mxu0 }
0x378c   :  { %v7331_v2 = vadd.f32 %v7327_v5, %v10089_v37  ;;  %v7322_v56 = vadd.f32 %v7918_v13, %v7321_v60 }
0x378e   :  { %v7330_v21 = vadd.f32 %v7322_v56, %v10085_v18  ;;  %v7339_v36 = vsel %vm88_vm0, %v7331_v2, 0.0  ;;  %v7382_v18 = vld [vmem:[#allocation2 + $0x78] sm:$0xff] }
0x378f   :  { %7340 = vadd.xlane.f32.xlu1 %v7339_v36  ;;  %8804 = vmatprep.subr.mxu1 %v7382_v18 }
0x3790   :  { %v7336_v14 = vsel %vm88_vm0, %v7330_v21, 0.0  ;;  %8805 = vmatpush3.msra.mxu1 %v7382_v18  ;;  %v7936_v18 = vld [vmem:[%s10383_s6 + $0x19] ss:$0 sm:$0xff] }
0x3791   :  { %7337 = vadd.xlane.f32.xlu0 %v7336_v14  ;;  %8806 = vmatprep.subr.mxu1 %v7381_v8 }
0x3792   :  { %8807 = vmatpush3.msra.mxu1 %v7381_v8 }
0x3793   :  { %8808 = vmatprep.subr.mxu1 %v7380_v27 }
0x3794   :  { %8809 = vmatpush3.msra.mxu1 %v7380_v27 }
0x3795   :  { %8810 = vmatprep.subr.mxu1 %v7379_v15 }
0x3796   :  { %8811 = vmatpush3.msra.mxu1 %v7379_v15 }
0x3818   :  { %v7341_v24 = vpop.xlane.xlu1 %7340 }
0x3819   :  { %v7343_v10 = vmul.f32 0.03125, %v7341_v24 }
0x381a   :  { %v7338_v4 = vpop.xlane.xlu0 %7337 }
0x381b   :  { %v7342_v53 = vmul.f32 0.03125, %v7338_v4  ;;  %v7345_v58 = vsub.f32 %v7331_v2, %v7343_v10 }
0x381d   :  { %v7344_v6 = vsub.f32 %v7330_v21, %v7342_v53  ;;  %v7347_v63 = vmul.f32 %v7345_v58, %v7345_v58 }
0x381f   :  { %v7346_v7 = vmul.f32 %v7344_v6, %v7344_v6  ;;  %v7351_v37 = vsel %vm88_vm0, %v7347_v63, 0.0 }
0x3821   :  { %v7348_v49 = vsel %vm88_vm0, %v7346_v7, 0.0 }
0x3822   :  { %7349 = vadd.xlane.f32.xlu0 %v7348_v49  ;;  %v7935_v49 = vld [vmem:[%s10383_s6 + $0x18] ss:$0 sm:$0xff] }
0x3826   :  { %7352 = vadd.xlane.f32.xlu0 %v7351_v37 }
0x38ab   :  { %v7350_v61 = vpop.xlane.xlu0 %7349 }
0x38ac   :  { %v7354_v33 = vmul.f32 0.03125, %v7350_v61 }
0x38ae   :  { %v7356_v62 = vadd.f32 1e-05, %v7354_v33 }
0x38af   :  { %v7353_v54 = vpop.xlane.xlu0 %7352 }
0x38b0   :  { %8993 = vrsqrt.f32 %v7356_v62  ;;  %v7355_v17 = vmul.f32 0.03125, %v7353_v54 }
0x38b2   :  { %v7357_v19 = vadd.f32 1e-05, %v7355_v17 }
0x38b4   :  { %8995 = vrsqrt.f32 %v7357_v19 }
0x38bd   :  { %v8994_v25 = vpop.eup %8993 }
0x38be   :  { %v7360_v0 = vmul.f32 %v8994_v25, %v7344_v6 }
0x38c0   :  { %v7368_v9 = vmul.f32 %v7923_v57, %v7360_v0 }
0x38c1   :  { %v8996_v29 = vpop.eup %8995 }
0x38c2   :  { %v7361_v12 = vmul.f32 %v8996_v29, %v7345_v58  ;;  %v7376_v32 = vadd.f32 %v7924_v1, %v7368_v9 }
0x38c4   :  { %v7369_v34 = vmul.f32 %v7923_v57, %v7361_v12  ;;  %8812 = vmatprep.mubr.msk.f32.mxu1 %vm88_vm0, %v7376_v32 }
0x38c6   :  { %v7377_v30 = vadd.f32 %v7924_v1, %v7369_v34 }
0x38c8   :  { %8813 = vmatmul.mubr.msk.f32.vlgmr.msra.gmra.mxu1 %vm88_vm0, %v7377_v30 }
0x3988   :  { %v8814_v50 = vpop.f32.mrf.mxu1 }
0x3989   :  { %v7469_v48 = vadd.f32 %v8814_v50, %v7926_v11 }
0x398a   :  { %v7463_v35 = vpop.f32.mrf.mxu1 }
0x398b   :  { %v7464_v40 = vadd.f32 %v7926_v11, %v7463_v35  ;;  %v7473_v39 = vmax.f32 %v7469_v48, 0.0  ;;  %v7939_v11 = vld [vmem:[%s10384_s7 + $0x1] ss:$0 sm:$0xff] }
0x398d   :  { %v7472_v52 = vmax.f32 %v7464_v40, 0.0 }
0x398f   :  { %8831 = vmatprep.mubr.msk.f32.mxu0 %vm3926_vm5, %v7472_v52 }
0x3990   :  { %8832 = vmatmul.mubr.msk.f32.vlgmr.msra.gmra.mxu0 %vm3926_vm5, %v7473_v39 }
0x3a50   :  { %v8833_v43 = vpop.f32.mrf.mxu0 }
0x3a51   :  { %v7569_v38 = vadd.f32 %v8833_v43, %v7930_v28 }
0x3a52   :  { %v7563_v44 = vpop.f32.mrf.mxu0 }
0x3a53   :  { %v7573_v46 = vadd.f32 %v7569_v38, %v7377_v30  ;;  %v7564_v47 = vadd.f32 %v7930_v28, %v7563_v44 }
0x3a55   :  { %v7572_v42 = vadd.f32 %v7564_v47, %v7376_v32  ;;  %v7581_v45 = vsel %vm88_vm0, %v7573_v46, 0.0 }
0x3a56   :  { %7582 = vadd.xlane.f32.xlu0 %v7581_v45 }
0x3a57   :  { %v7578_v51 = vsel %vm88_vm0, %v7572_v42, 0.0 }
0x3a58   :  { %7579 = vadd.xlane.f32.xlu1 %v7578_v51 }
0x3adf   :  { %v7583_v23 = vpop.xlane.xlu0 %7582 }
0x3ae0   :  { %v7585_v13 = vmul.f32 0.03125, %v7583_v23 }
0x3ae1   :  { %v7580_v41 = vpop.xlane.xlu1 %7579 }
0x3ae2   :  { %v7587_v5 = vsub.f32 %v7573_v46, %v7585_v13  ;;  %v7584_v60 = vmul.f32 0.03125, %v7580_v41 }
0x3ae4   :  { %v7586_v2 = vsub.f32 %v7572_v42, %v7584_v60  ;;  %v7589_v56 = vmul.f32 %v7587_v5, %v7587_v5 }
0x3ae6   :  { %v7593_v21 = vsel %vm88_vm0, %v7589_v56, 0.0  ;;  %v7588_v36 = vmul.f32 %v7586_v2, %v7586_v2 }
0x3ae7   :  { %7594 = vadd.xlane.f32.xlu0 %v7593_v21 }
0x3ae8   :  { %v7590_v14 = vsel %vm88_vm0, %v7588_v36, 0.0 }
0x3ae9   :  { %7591 = vadd.xlane.f32.xlu1 %v7590_v14 }
0x3b70   :  { %v7595_v24 = vpop.xlane.xlu0 %7594 }
0x3b71   :  { %v7597_v10 = vmul.f32 0.03125, %v7595_v24 }
0x3b72   :  { %v7592_v4 = vpop.xlane.xlu1 %7591 }
0x3b73   :  { %v7599_v53 = vadd.f32 1e-05, %v7597_v10  ;;  %v7596_v58 = vmul.f32 0.03125, %v7592_v4 }
0x3b75   :  { %8997 = vrsqrt.f32 %v7599_v53  ;;  %v7598_v6 = vadd.f32 1e-05, %v7596_v58 }
0x3b77   :  { %8999 = vrsqrt.f32 %v7598_v6 }
0x3b82   :  { %v8998_v7 = vpop.eup %8997 }
0x3b83   :  { %v7603_v63 = vmul.f32 %v8998_v7, %v7587_v5 }
0x3b84   :  { %v9000_v37 = vpop.eup %8999 }
0x3b85   :  { %v7611_v8 = vmul.f32 %v7935_v49, %v7603_v63  ;;  %v7602_v27 = vmul.f32 %v9000_v37, %v7586_v2 }
0x3b87   :  { %v7619_v15 = vadd.f32 %v7936_v18, %v7611_v8  ;;  %v7610_v31 = vmul.f32 %v7935_v49, %v7602_v27 }
0x3b89   :  { %v7626_v22 = vsel %vm88_vm0, %v7619_v15, 0.0  ;;  %v7618_v20 = vadd.f32 %v7936_v18, %v7610_v31 }
0x3b8a   :  { %7627 = vadd.xlane.f32.xlu0 %v7626_v22 }
0x3b8b   :  { %v7623_v16 = vsel %vm88_vm0, %v7618_v20, 0.0 }
0x3b8c   :  { %7624 = vadd.xlane.f32.xlu1 %v7623_v16 }
0x3c13   :  { %v7628_v61 = vpop.xlane.xlu0 %7627 }
0x3c14   :  { %v7630_v33 = vmul.f32 0.03125, %v7628_v61 }
0x3c15   :  { %v7625_v62 = vpop.xlane.xlu1 %7624 }
0x3c16   :  { %v7632_v54 = vsub.f32 %v7619_v15, %v7630_v33  ;;  %v7629_v17 = vmul.f32 0.03125, %v7625_v62 }
0x3c18   :  { %v7631_v19 = vsub.f32 %v7618_v20, %v7629_v17  ;;  %v7634_v25 = vmul.f32 %v7632_v54, %v7632_v54 }
0x3c1a   :  { %v7638_v57 = vsel %vm88_vm0, %v7634_v25, 0.0  ;;  %v7633_v0 = vmul.f32 %v7631_v19, %v7631_v19 }
0x3c1b   :  { %7639 = vadd.xlane.f32.xlu0 %v7638_v57 }
0x3c1c   :  { %v7635_v1 = vsel %vm88_vm0, %v7633_v0, 0.0 }
0x3c1d   :  { %7636 = vadd.xlane.f32.xlu1 %v7635_v1 }
0x3ca4   :  { %v7640_v9 = vpop.xlane.xlu0 %7639 }
0x3ca5   :  { %v7642_v29 = vmul.f32 0.03125, %v7640_v9 }
0x3ca6   :  { %v7637_v12 = vpop.xlane.xlu1 %7636 }
0x3ca7   :  { %v7644_v32 = vadd.f32 1e-05, %v7642_v29  ;;  %v7641_v34 = vmul.f32 0.03125, %v7637_v12 }
0x3ca9   :  { %9001 = vrsqrt.f32 %v7644_v32  ;;  %v7643_v30 = vadd.f32 1e-05, %v7641_v34 }
0x3cab   :  { %9003 = vrsqrt.f32 %v7643_v30 }
0x3cb6   :  { %v9002_v3 = vpop.eup %9001 }
0x3cb7   :  { %v7648_v55 = vmul.f32 %v9002_v3, %v7632_v54 }
0x3cb8   :  { %v9004_v26 = vpop.eup %9003 }
0x3cb9   :  { %v7656_v50 = vmul.f32 %v7938_v59, %v7648_v55  ;;  %v7647_v48 = vmul.f32 %v9004_v26, %v7631_v19 }
0x3cbb   :  { %v7664_v35 = vadd.f32 %v7939_v11, %v7656_v50  ;;  %v7655_v40 = vmul.f32 %v7938_v59, %v7647_v48 }
0x3cbd   :  { %7666 = vst.msk [vmem:[%s10385_s8 + $0x8] sm:$0xff] %vm88_vm0, %v7664_v35  ;;  %v7663_v52 = vadd.f32 %v7939_v11, %v7655_v40 }
0x3cbf   :  { %7665 = vst.msk [vmem:[%s10385_s8] sm:$0xff] %vm88_vm0, %v7663_v52 }
0x3cc0   :  { %7671 = vsyncpa [#allocation3], 1 }
0x3cc1   :  { %7672 = vsyncpa [#allocation5], 1 }

</bundles_post_ra>
